<compile_context>
chip_gen: v6e
topology: v6e:2x2x1
jax: 0.10.0
libtpu: 0.0.40
codegen_flags: <defaults>
</compile_context>

<pallas_src>
import functools

import jax
import jax.numpy as jnp
from jax import lax
from jax.experimental import pallas as pl
from jax.experimental.pallas import tpu as pltpu


# ----------------------------------------------------------------------------
# Fused decoder kernel
# ----------------------------------------------------------------------------
def _lstm_cell(gates, c, H):
    """PyTorch gate order: i, f, g, o."""
    i = jax.nn.sigmoid(gates[:, 0 * H:1 * H])
    f = jax.nn.sigmoid(gates[:, 1 * H:2 * H])
    g = jnp.tanh(gates[:, 2 * H:3 * H])
    o = jax.nn.sigmoid(gates[:, 3 * H:4 * H])
    c_new = f * c + i * g
    h_new = o * jnp.tanh(c_new)
    return h_new, c_new


def decoder_kernel(
    # inputs
    x_ref,
    w0f_ih_ref, w0f_hh_ref, b0f_ref,
    w0b_ih_ref, w0b_hh_ref, b0b_ref,
    w1f_ih_ref, w1f_hh_ref, b1f_ref,
    w1b_ih_ref, w1b_hh_ref, b1b_ref,
    wd_ref, bd_ref,
    # outputs
    out_ref,
    # scratch
    xw_scr, h0f_scr, h0b_scr, h1f_scr, h1b_scr,
    *, T, B, H,
):
    """Whole Decoder forward in one kernel invocation.

    x_ref:     (T*B, I)   time-major input, (T, B) flattened
    w*_ih_ref: (I_l, 4H)  input->gate weights, pre-transposed
    w*_hh_ref: (H, 4H)    hidden->gate weights, pre-transposed
    b*_ref:    (1, 4H)    fused bias (b_ih + b_hh)
    wd_ref:    (2H, S)    dense weight, pre-transposed
    bd_ref:    (1, S)
    out_ref:   (T*B, S)
    """

    def run_direction(xw, w_hh_ref, out_scr, reverse):
        # xw: (T*B, 4H) = input projection + bias for ALL timesteps (one matmul).
        xw_scr[...] = xw
        whh = w_hh_ref[...]                                   # hoisted (H, 4H)
        h = jnp.zeros((B, H), jnp.float32)
        c = jnp.zeros((B, H), jnp.float32)
        time_order = range(T - 1, -1, -1) if reverse else range(T)
        for t in time_order:                                   # static unroll
            r = t * B
            gates = xw_scr[r:r + B, :] + jnp.dot(
                h, whh, preferred_element_type=jnp.float32)
            h, c = _lstm_cell(gates, c, H)
            out_scr[r:r + B, :] = h

    x2 = x_ref[...]                                            # (T*B, I)

    # ---- layer 0 -----------------------------------------------------------
    run_direction(
        jnp.dot(x2, w0f_ih_ref[...], preferred_element_type=jnp.float32)
        + b0f_ref[...],
        w0f_hh_ref, h0f_scr, reverse=False)
    run_direction(
        jnp.dot(x2, w0b_ih_ref[...], preferred_element_type=jnp.float32)
        + b0b_ref[...],
        w0b_hh_ref, h0b_scr, reverse=True)

    # ---- layer 1 (input = [h_fwd, h_bwd]; done as split matmuls, no concat) -
    h0f = h0f_scr[...]                                         # (T*B, H)
    h0b = h0b_scr[...]                                         # (T*B, H)
    run_direction(
        jnp.dot(h0f, w1f_ih_ref[0:H, :], preferred_element_type=jnp.float32)
        + jnp.dot(h0b, w1f_ih_ref[H:2 * H, :], preferred_element_type=jnp.float32)
        + b1f_ref[...],
        w1f_hh_ref, h1f_scr, reverse=False)
    run_direction(
        jnp.dot(h0f, w1b_ih_ref[0:H, :], preferred_element_type=jnp.float32)
        + jnp.dot(h0b, w1b_ih_ref[H:2 * H, :], preferred_element_type=jnp.float32)
        + b1b_ref[...],
        w1b_hh_ref, h1b_scr, reverse=True)

    # ---- dense epilogue: y = [h1_fwd, h1_bwd] @ Wd^T + bd -------------------
    out_ref[...] = (
        jnp.dot(h1f_scr[...], wd_ref[0:H, :], preferred_element_type=jnp.float32)
        + jnp.dot(h1b_scr[...], wd_ref[H:2 * H, :], preferred_element_type=jnp.float32)
        + bd_ref[...]
    )


# ----------------------------------------------------------------------------
# Wrappers
# ----------------------------------------------------------------------------
def prepare_params(params):
    """One-time conversion: transpose weights, fuse biases (kernel layout)."""
    def prep_dir(w_ih, w_hh, b_ih, b_hh):
        return (jnp.asarray(w_ih.T, jnp.float32),              # (I, 4H)
                jnp.asarray(w_hh.T, jnp.float32),              # (H, 4H)
                (b_ih + b_hh).reshape(1, -1).astype(jnp.float32))
    return {
        "l0_fwd": prep_dir(*params["l0_fwd"]),
        "l0_bwd": prep_dir(*params["l0_bwd"]),
        "l1_fwd": prep_dir(*params["l1_fwd"]),
        "l1_bwd": prep_dir(*params["l1_bwd"]),
        "dense_w": jnp.asarray(params["dense_w"].T, jnp.float32),   # (2H, S)
        "dense_b": params["dense_b"].reshape(1, -1).astype(jnp.float32),
    }


def decoder_forward(x, kp):
    """Equivalent of Decoder.forward: x (T,B,20) -> bi-LSTM x2 -> Linear."""
    T, B, I = x.shape
    H = kp["l0_fwd"][1].shape[0]
    S = kp["dense_w"].shape[1]
    x2 = x.reshape(T * B, I).astype(jnp.float32)

    args = [x2,
            *kp["l0_fwd"], *kp["l0_bwd"],
            *kp["l1_fwd"], *kp["l1_bwd"],
            kp["dense_w"], kp["dense_b"]]

    in_specs = [pl.BlockSpec(a.shape, lambda: (0, 0)) for a in args]
    kernel = functools.partial(decoder_kernel, T=T, B=B, H=H)

    y2 = pl.pallas_call(
        kernel,
        out_shape=jax.ShapeDtypeStruct((T * B, S), jnp.float32),
        in_specs=in_specs,
        out_specs=pl.BlockSpec((T * B, S), lambda: (0, 0)),
        scratch_shapes=[
            pltpu.VMEM((T * B, 4 * H), jnp.float32),   # hoisted input projection
            pltpu.VMEM((T * B, H), jnp.float32),       # layer-0 fwd hidden seq
            pltpu.VMEM((T * B, H), jnp.float32),       # layer-0 bwd hidden seq
            pltpu.VMEM((T * B, H), jnp.float32),       # layer-1 fwd hidden seq
            pltpu.VMEM((T * B, H), jnp.float32),       # layer-1 bwd hidden seq
        ],
    )(*args)
    return y2.reshape(T, B, S)


# ----------------------------------------------------------------------------
# Deterministic parameter init (PyTorch-style uniform(-1/sqrt(H), 1/sqrt(H)))
# ----------------------------------------------------------------------------
def init_params(key, input_size=20, hidden=64, signal_shape=100):
    k = 1.0 / jnp.sqrt(hidden)
    keys = iter(jax.random.split(key, 32))

    def u(shape):
        return jax.random.uniform(next(keys), shape, jnp.float32, -k, k)

    def lstm_dir_params(in_sz):
        return (u((4 * hidden, in_sz)),   # w_ih
                u((4 * hidden, hidden)),  # w_hh
                u((4 * hidden,)),         # b_ih
                u((4 * hidden,)))         # b_hh

    return {
        "l0_fwd": lstm_dir_params(input_size),
        "l0_bwd": lstm_dir_params(input_size),
        "l1_fwd": lstm_dir_params(2 * hidden),
        "l1_bwd": lstm_dir_params(2 * hidden),
        "dense_w": u((signal_shape, 2 * hidden)),
        "dense_b": u((signal_shape,)),
    }


# ----------------------------------------------------------------------------
# Pure-JAX reference (correctness check against the fused Pallas kernel)
# ----------------------------------------------------------------------------
def ref_lstm_direction(x, w_ih, w_hh, b_ih, b_hh):
    T, B, _ = x.shape
    H = w_hh.shape[1]

    def step(carry, x_t):
        h, c = carry
        gates = x_t @ w_ih.T + h @ w_hh.T + b_ih + b_hh
        i = jax.nn.sigmoid(gates[:, :H])
        f = jax.nn.sigmoid(gates[:, H:2 * H])
        g = jnp.tanh(gates[:, 2 * H:3 * H])
        o = jax.nn.sigmoid(gates[:, 3 * H:])
        c = f * c + i * g
        h = o * jnp.tanh(c)
        return (h, c), h

    (_, _), hs = lax.scan(step, (jnp.zeros((B, H)), jnp.zeros((B, H))), x)
    return hs


def ref_forward(x, params):
    def bilayer(h, pf, pb):
        hf = ref_lstm_direction(h, *pf)
        hb = jnp.flip(ref_lstm_direction(jnp.flip(h, 0), *pb), 0)
        return jnp.concatenate([hf, hb], axis=-1)

    h = bilayer(x, params["l0_fwd"], params["l0_bwd"])
    h = bilayer(h, params["l1_fwd"], params["l1_bwd"])
    return h @ params["dense_w"].T + params["dense_b"]


# ----------------------------------------------------------------------------
if __name__ == "__main__":
    T, B, INPUT, SIGNAL = 8, 2, 20, 100   # seq=8, batch=2, LSTM input=20, signal_shape=100

    key = jax.random.PRNGKey(0)
    k_x, k_p = jax.random.split(key)
    x = jax.random.normal(k_x, (T, B, INPUT), jnp.float32)
    params = init_params(k_p, input_size=INPUT, hidden=64, signal_shape=SIGNAL)
    kparams = prepare_params(params)      # pre-transpose / fuse ONCE

    out = decoder_forward(x, kparams)
    out = jax.block_until_ready(out)

    ref = ref_forward(x, params)
    assert out.shape == (T, B, SIGNAL), out.shape
    assert jnp.allclose(out, ref, rtol=1e-5, atol=1e-5), float(jnp.max(jnp.abs(out - ref)))

    print("KERNEL_OK")
</pallas_src>

<mosaic_0001>
module attributes {stable_mosaic.version = 11 : i64} {
  func.func @decoder_kernel(%arg0: memref<16x20xf32, #tpu.memory_space<vmem>>, %arg1: memref<20x256xf32, #tpu.memory_space<vmem>>, %arg2: memref<64x256xf32, #tpu.memory_space<vmem>>, %arg3: memref<1x256xf32, #tpu.memory_space<vmem>>, %arg4: memref<20x256xf32, #tpu.memory_space<vmem>>, %arg5: memref<64x256xf32, #tpu.memory_space<vmem>>, %arg6: memref<1x256xf32, #tpu.memory_space<vmem>>, %arg7: memref<128x256xf32, #tpu.memory_space<vmem>>, %arg8: memref<64x256xf32, #tpu.memory_space<vmem>>, %arg9: memref<1x256xf32, #tpu.memory_space<vmem>>, %arg10: memref<128x256xf32, #tpu.memory_space<vmem>>, %arg11: memref<64x256xf32, #tpu.memory_space<vmem>>, %arg12: memref<1x256xf32, #tpu.memory_space<vmem>>, %arg13: memref<128x100xf32, #tpu.memory_space<vmem>>, %arg14: memref<1x100xf32, #tpu.memory_space<vmem>>, %arg15: memref<16x100xf32, #tpu.memory_space<vmem>>, %arg16: memref<16x256xf32, #tpu.memory_space<vmem>>, %arg17: memref<16x64xf32, #tpu.memory_space<vmem>>, %arg18: memref<16x64xf32, #tpu.memory_space<vmem>>, %arg19: memref<16x64xf32, #tpu.memory_space<vmem>>, %arg20: memref<16x64xf32, #tpu.memory_space<vmem>>) attributes {dimension_semantics = [], scalar_prefetch = 0 : i64, scratch_operands = 5 : i64, tpu.core_type = #tpu.core_type<tc>} {
    %c0 = arith.constant 0 : index
    %c0_0 = arith.constant 0 : index
    %0 = vector.load %arg0[%c0, %c0_0] : memref<16x20xf32, #tpu.memory_space<vmem>>, vector<16x20xf32>
    %c0_1 = arith.constant 0 : index
    %c0_2 = arith.constant 0 : index
    %1 = vector.load %arg1[%c0_1, %c0_2] : memref<20x256xf32, #tpu.memory_space<vmem>>, vector<20x256xf32>
    %cst = arith.constant dense<0.000000e+00> : vector<16x256xf32>
    %2 = tpu.matmul %0, %1, %cst {dimension_numbers = #tpu.dot_dimension_numbers<[1], [0], [0], [1], [0, 0, 1, 1], [], []>} : vector<16x20xf32>, vector<20x256xf32>, vector<16x256xf32> -> vector<16x256xf32>
    %c0_3 = arith.constant 0 : index
    %c0_4 = arith.constant 0 : index
    %3 = vector.load %arg3[%c0_3, %c0_4] : memref<1x256xf32, #tpu.memory_space<vmem>>, vector<1x256xf32>
    %4 = vector.broadcast %3 : vector<1x256xf32> to vector<16x256xf32>
    %5 = arith.addf %2, %4 : vector<16x256xf32>
    %c0_5 = arith.constant 0 : index
    %c0_6 = arith.constant 0 : index
    %6 = vector.load %arg16[%c0_5, %c0_6] : memref<16x256xf32, #tpu.memory_space<vmem>>, vector<16x256xf32>
    tpu.vector_store %arg16[%c0_5, %c0_6], %5 {strides = array<i32>} : memref<16x256xf32, #tpu.memory_space<vmem>>, vector<16x256xf32>,
    %c0_7 = arith.constant 0 : index
    %c0_8 = arith.constant 0 : index
    %7 = vector.load %arg2[%c0_7, %c0_8] : memref<64x256xf32, #tpu.memory_space<vmem>>, vector<64x256xf32>
    %cst_9 = arith.constant 0.000000e+00 : f32
    %8 = vector.broadcast %cst_9 : f32 to vector<2x64xf32>
    %cst_10 = arith.constant 0.000000e+00 : f32
    %9 = vector.broadcast %cst_10 : f32 to vector<2x64xf32>
    %c0_11 = arith.constant 0 : index
    %c0_12 = arith.constant 0 : index
    %10 = vector.load %arg16[%c0_11, %c0_12] : memref<16x256xf32, #tpu.memory_space<vmem>>, vector<2x256xf32>
    %cst_13 = arith.constant dense<0.000000e+00> : vector<2x256xf32>
    %11 = tpu.matmul %8, %7, %cst_13 {dimension_numbers = #tpu.dot_dimension_numbers<[1], [0], [0], [1], [0, 0, 1, 1], [], []>} : vector<2x64xf32>, vector<64x256xf32>, vector<2x256xf32> -> vector<2x256xf32>
    %12 = arith.addf %10, %11 : vector<2x256xf32>
    %13 = vector.extract_strided_slice %12 {offsets = [0, 0], sizes = [2, 64], strides = [1, 1]} : vector<2x256xf32> to vector<2x64xf32>
    %14 = arith.negf %13 : vector<2x64xf32>
    %15 = math.exp %14 : vector<2x64xf32>
    %cst_14 = arith.constant 1.000000e+00 : f32
    %16 = vector.broadcast %cst_14 : f32 to vector<2x64xf32>
    %17 = arith.addf %16, %15 : vector<2x64xf32>
    %18 = arith.divf %16, %17 : vector<2x64xf32>
    %19 = vector.extract_strided_slice %12 {offsets = [0, 64], sizes = [2, 64], strides = [1, 1]} : vector<2x256xf32> to vector<2x64xf32>
    %20 = arith.negf %19 : vector<2x64xf32>
    %21 = math.exp %20 : vector<2x64xf32>
    %cst_15 = arith.constant 1.000000e+00 : f32
    %22 = vector.broadcast %cst_15 : f32 to vector<2x64xf32>
    %23 = arith.addf %22, %21 : vector<2x64xf32>
    %24 = arith.divf %22, %23 : vector<2x64xf32>
    %25 = vector.extract_strided_slice %12 {offsets = [0, 128], sizes = [2, 64], strides = [1, 1]} : vector<2x256xf32> to vector<2x64xf32>
    %26 = math.tanh %25 : vector<2x64xf32>
    %27 = vector.extract_strided_slice %12 {offsets = [0, 192], sizes = [2, 64], strides = [1, 1]} : vector<2x256xf32> to vector<2x64xf32>
    %28 = arith.negf %27 : vector<2x64xf32>
    %29 = math.exp %28 : vector<2x64xf32>
    %cst_16 = arith.constant 1.000000e+00 : f32
    %30 = vector.broadcast %cst_16 : f32 to vector<2x64xf32>
    %31 = arith.addf %30, %29 : vector<2x64xf32>
    %32 = arith.divf %30, %31 : vector<2x64xf32>
    %33 = arith.mulf %24, %9 : vector<2x64xf32>
    %34 = arith.mulf %18, %26 : vector<2x64xf32>
    %35 = arith.addf %33, %34 : vector<2x64xf32>
    %36 = math.tanh %35 : vector<2x64xf32>
    %37 = arith.mulf %32, %36 : vector<2x64xf32>
    %c0_17 = arith.constant 0 : index
    %c0_18 = arith.constant 0 : index
    %38 = vector.load %arg17[%c0_17, %c0_18] : memref<16x64xf32, #tpu.memory_space<vmem>>, vector<2x64xf32>
    tpu.vector_store %arg17[%c0_17, %c0_18], %37 {strides = array<i32>} : memref<16x64xf32, #tpu.memory_space<vmem>>, vector<2x64xf32>,
    %c2 = arith.constant 2 : index
    %c0_19 = arith.constant 0 : index
    %39 = vector.load %arg16[%c2, %c0_19] : memref<16x256xf32, #tpu.memory_space<vmem>>, vector<2x256xf32>
    %cst_20 = arith.constant dense<0.000000e+00> : vector<2x256xf32>
    %40 = tpu.matmul %37, %7, %cst_20 {dimension_numbers = #tpu.dot_dimension_numbers<[1], [0], [0], [1], [0, 0, 1, 1], [], []>} : vector<2x64xf32>, vector<64x256xf32>, vector<2x256xf32> -> vector<2x256xf32>
    %41 = arith.addf %39, %40 : vector<2x256xf32>
    %42 = vector.extract_strided_slice %41 {offsets = [0, 0], sizes = [2, 64], strides = [1, 1]} : vector<2x256xf32> to vector<2x64xf32>
    %43 = arith.negf %42 : vector<2x64xf32>
    %44 = math.exp %43 : vector<2x64xf32>
    %cst_21 = arith.constant 1.000000e+00 : f32
    %45 = vector.broadcast %cst_21 : f32 to vector<2x64xf32>
    %46 = arith.addf %45, %44 : vector<2x64xf32>
    %47 = arith.divf %45, %46 : vector<2x64xf32>
    %48 = vector.extract_strided_slice %41 {offsets = [0, 64], sizes = [2, 64], strides = [1, 1]} : vector<2x256xf32> to vector<2x64xf32>
    %49 = arith.negf %48 : vector<2x64xf32>
    %50 = math.exp %49 : vector<2x64xf32>
    %cst_22 = arith.constant 1.000000e+00 : f32
    %51 = vector.broadcast %cst_22 : f32 to vector<2x64xf32>
    %52 = arith.addf %51, %50 : vector<2x64xf32>
    %53 = arith.divf %51, %52 : vector<2x64xf32>
    %54 = vector.extract_strided_slice %41 {offsets = [0, 128], sizes = [2, 64], strides = [1, 1]} : vector<2x256xf32> to vector<2x64xf32>
    %55 = math.tanh %54 : vector<2x64xf32>
    %56 = vector.extract_strided_slice %41 {offsets = [0, 192], sizes = [2, 64], strides = [1, 1]} : vector<2x256xf32> to vector<2x64xf32>
    %57 = arith.negf %56 : vector<2x64xf32>
    %58 = math.exp %57 : vector<2x64xf32>
    %cst_23 = arith.constant 1.000000e+00 : f32
    %59 = vector.broadcast %cst_23 : f32 to vector<2x64xf32>
    %60 = arith.addf %59, %58 : vector<2x64xf32>
    %61 = arith.divf %59, %60 : vector<2x64xf32>
    %62 = arith.mulf %53, %35 : vector<2x64xf32>
    %63 = arith.mulf %47, %55 : vector<2x64xf32>
    %64 = arith.addf %62, %63 : vector<2x64xf32>
    %65 = math.tanh %64 : vector<2x64xf32>
    %66 = arith.mulf %61, %65 : vector<2x64xf32>
    %c2_24 = arith.constant 2 : index
    %c0_25 = arith.constant 0 : index
    %67 = vector.load %arg17[%c2_24, %c0_25] : memref<16x64xf32, #tpu.memory_space<vmem>>, vector<2x64xf32>
    tpu.vector_store %arg17[%c2_24, %c0_25], %66 {strides = array<i32>} : memref<16x64xf32, #tpu.memory_space<vmem>>, vector<2x64xf32>,
    %c4 = arith.constant 4 : index
    %c0_26 = arith.constant 0 : index
    %68 = vector.load %arg16[%c4, %c0_26] : memref<16x256xf32, #tpu.memory_space<vmem>>, vector<2x256xf32>
    %cst_27 = arith.constant dense<0.000000e+00> : vector<2x256xf32>
    %69 = tpu.matmul %66, %7, %cst_27 {dimension_numbers = #tpu.dot_dimension_numbers<[1], [0], [0], [1], [0, 0, 1, 1], [], []>} : vector<2x64xf32>, vector<64x256xf32>, vector<2x256xf32> -> vector<2x256xf32>
    %70 = arith.addf %68, %69 : vector<2x256xf32>
    %71 = vector.extract_strided_slice %70 {offsets = [0, 0], sizes = [2, 64], strides = [1, 1]} : vector<2x256xf32> to vector<2x64xf32>
    %72 = arith.negf %71 : vector<2x64xf32>
    %73 = math.exp %72 : vector<2x64xf32>
    %cst_28 = arith.constant 1.000000e+00 : f32
    %74 = vector.broadcast %cst_28 : f32 to vector<2x64xf32>
    %75 = arith.addf %74, %73 : vector<2x64xf32>
    %76 = arith.divf %74, %75 : vector<2x64xf32>
    %77 = vector.extract_strided_slice %70 {offsets = [0, 64], sizes = [2, 64], strides = [1, 1]} : vector<2x256xf32> to vector<2x64xf32>
    %78 = arith.negf %77 : vector<2x64xf32>
    %79 = math.exp %78 : vector<2x64xf32>
    %cst_29 = arith.constant 1.000000e+00 : f32
    %80 = vector.broadcast %cst_29 : f32 to vector<2x64xf32>
    %81 = arith.addf %80, %79 : vector<2x64xf32>
    %82 = arith.divf %80, %81 : vector<2x64xf32>
    %83 = vector.extract_strided_slice %70 {offsets = [0, 128], sizes = [2, 64], strides = [1, 1]} : vector<2x256xf32> to vector<2x64xf32>
    %84 = math.tanh %83 : vector<2x64xf32>
    %85 = vector.extract_strided_slice %70 {offsets = [0, 192], sizes = [2, 64], strides = [1, 1]} : vector<2x256xf32> to vector<2x64xf32>
    %86 = arith.negf %85 : vector<2x64xf32>
    %87 = math.exp %86 : vector<2x64xf32>
    %cst_30 = arith.constant 1.000000e+00 : f32
    %88 = vector.broadcast %cst_30 : f32 to vector<2x64xf32>
    %89 = arith.addf %88, %87 : vector<2x64xf32>
    %90 = arith.divf %88, %89 : vector<2x64xf32>
    %91 = arith.mulf %82, %64 : vector<2x64xf32>
    %92 = arith.mulf %76, %84 : vector<2x64xf32>
    %93 = arith.addf %91, %92 : vector<2x64xf32>
    %94 = math.tanh %93 : vector<2x64xf32>
    %95 = arith.mulf %90, %94 : vector<2x64xf32>
    %c4_31 = arith.constant 4 : index
    %c0_32 = arith.constant 0 : index
    %96 = vector.load %arg17[%c4_31, %c0_32] : memref<16x64xf32, #tpu.memory_space<vmem>>, vector<2x64xf32>
    tpu.vector_store %arg17[%c4_31, %c0_32], %95 {strides = array<i32>} : memref<16x64xf32, #tpu.memory_space<vmem>>, vector<2x64xf32>,
    %c6 = arith.constant 6 : index
    %c0_33 = arith.constant 0 : index
    %97 = vector.load %arg16[%c6, %c0_33] : memref<16x256xf32, #tpu.memory_space<vmem>>, vector<2x256xf32>
    %cst_34 = arith.constant dense<0.000000e+00> : vector<2x256xf32>
    %98 = tpu.matmul %95, %7, %cst_34 {dimension_numbers = #tpu.dot_dimension_numbers<[1], [0], [0], [1], [0, 0, 1, 1], [], []>} : vector<2x64xf32>, vector<64x256xf32>, vector<2x256xf32> -> vector<2x256xf32>
    %99 = arith.addf %97, %98 : vector<2x256xf32>
    %100 = vector.extract_strided_slice %99 {offsets = [0, 0], sizes = [2, 64], strides = [1, 1]} : vector<2x256xf32> to vector<2x64xf32>
    %101 = arith.negf %100 : vector<2x64xf32>
    %102 = math.exp %101 : vector<2x64xf32>
    %cst_35 = arith.constant 1.000000e+00 : f32
    %103 = vector.broadcast %cst_35 : f32 to vector<2x64xf32>
    %104 = arith.addf %103, %102 : vector<2x64xf32>
    %105 = arith.divf %103, %104 : vector<2x64xf32>
    %106 = vector.extract_strided_slice %99 {offsets = [0, 64], sizes = [2, 64], strides = [1, 1]} : vector<2x256xf32> to vector<2x64xf32>
    %107 = arith.negf %106 : vector<2x64xf32>
    %108 = math.exp %107 : vector<2x64xf32>
    %cst_36 = arith.constant 1.000000e+00 : f32
    %109 = vector.broadcast %cst_36 : f32 to vector<2x64xf32>
    %110 = arith.addf %109, %108 : vector<2x64xf32>
    %111 = arith.divf %109, %110 : vector<2x64xf32>
    %112 = vector.extract_strided_slice %99 {offsets = [0, 128], sizes = [2, 64], strides = [1, 1]} : vector<2x256xf32> to vector<2x64xf32>
    %113 = math.tanh %112 : vector<2x64xf32>
    %114 = vector.extract_strided_slice %99 {offsets = [0, 192], sizes = [2, 64], strides = [1, 1]} : vector<2x256xf32> to vector<2x64xf32>
    %115 = arith.negf %114 : vector<2x64xf32>
    %116 = math.exp %115 : vector<2x64xf32>
    %cst_37 = arith.constant 1.000000e+00 : f32
    %117 = vector.broadcast %cst_37 : f32 to vector<2x64xf32>
    %118 = arith.addf %117, %116 : vector<2x64xf32>
    %119 = arith.divf %117, %118 : vector<2x64xf32>
    %120 = arith.mulf %111, %93 : vector<2x64xf32>
    %121 = arith.mulf %105, %113 : vector<2x64xf32>
    %122 = arith.addf %120, %121 : vector<2x64xf32>
    %123 = math.tanh %122 : vector<2x64xf32>
    %124 = arith.mulf %119, %123 : vector<2x64xf32>
    %c6_38 = arith.constant 6 : index
    %c0_39 = arith.constant 0 : index
    %125 = vector.load %arg17[%c6_38, %c0_39] : memref<16x64xf32, #tpu.memory_space<vmem>>, vector<2x64xf32>
    tpu.vector_store %arg17[%c6_38, %c0_39], %124 {strides = array<i32>} : memref<16x64xf32, #tpu.memory_space<vmem>>, vector<2x64xf32>,
    %c8 = arith.constant 8 : index
    %c0_40 = arith.constant 0 : index
    %126 = vector.load %arg16[%c8, %c0_40] : memref<16x256xf32, #tpu.memory_space<vmem>>, vector<2x256xf32>
    %cst_41 = arith.constant dense<0.000000e+00> : vector<2x256xf32>
    %127 = tpu.matmul %124, %7, %cst_41 {dimension_numbers = #tpu.dot_dimension_numbers<[1], [0], [0], [1], [0, 0, 1, 1], [], []>} : vector<2x64xf32>, vector<64x256xf32>, vector<2x256xf32> -> vector<2x256xf32>
    %128 = arith.addf %126, %127 : vector<2x256xf32>
    %129 = vector.extract_strided_slice %128 {offsets = [0, 0], sizes = [2, 64], strides = [1, 1]} : vector<2x256xf32> to vector<2x64xf32>
    %130 = arith.negf %129 : vector<2x64xf32>
    %131 = math.exp %130 : vector<2x64xf32>
    %cst_42 = arith.constant 1.000000e+00 : f32
    %132 = vector.broadcast %cst_42 : f32 to vector<2x64xf32>
    %133 = arith.addf %132, %131 : vector<2x64xf32>
    %134 = arith.divf %132, %133 : vector<2x64xf32>
    %135 = vector.extract_strided_slice %128 {offsets = [0, 64], sizes = [2, 64], strides = [1, 1]} : vector<2x256xf32> to vector<2x64xf32>
    %136 = arith.negf %135 : vector<2x64xf32>
    %137 = math.exp %136 : vector<2x64xf32>
    %cst_43 = arith.constant 1.000000e+00 : f32
    %138 = vector.broadcast %cst_43 : f32 to vector<2x64xf32>
    %139 = arith.addf %138, %137 : vector<2x64xf32>
    %140 = arith.divf %138, %139 : vector<2x64xf32>
    %141 = vector.extract_strided_slice %128 {offsets = [0, 128], sizes = [2, 64], strides = [1, 1]} : vector<2x256xf32> to vector<2x64xf32>
    %142 = math.tanh %141 : vector<2x64xf32>
    %143 = vector.extract_strided_slice %128 {offsets = [0, 192], sizes = [2, 64], strides = [1, 1]} : vector<2x256xf32> to vector<2x64xf32>
    %144 = arith.negf %143 : vector<2x64xf32>
    %145 = math.exp %144 : vector<2x64xf32>
    %cst_44 = arith.constant 1.000000e+00 : f32
    %146 = vector.broadcast %cst_44 : f32 to vector<2x64xf32>
    %147 = arith.addf %146, %145 : vector<2x64xf32>
    %148 = arith.divf %146, %147 : vector<2x64xf32>
    %149 = arith.mulf %140, %122 : vector<2x64xf32>
    %150 = arith.mulf %134, %142 : vector<2x64xf32>
    %151 = arith.addf %149, %150 : vector<2x64xf32>
    %152 = math.tanh %151 : vector<2x64xf32>
    %153 = arith.mulf %148, %152 : vector<2x64xf32>
    %c8_45 = arith.constant 8 : index
    %c0_46 = arith.constant 0 : index
    %154 = vector.load %arg17[%c8_45, %c0_46] : memref<16x64xf32, #tpu.memory_space<vmem>>, vector<2x64xf32>
    tpu.vector_store %arg17[%c8_45, %c0_46], %153 {strides = array<i32>} : memref<16x64xf32, #tpu.memory_space<vmem>>, vector<2x64xf32>,
    %c10 = arith.constant 10 : index
    %c0_47 = arith.constant 0 : index
    %155 = vector.load %arg16[%c10, %c0_47] : memref<16x256xf32, #tpu.memory_space<vmem>>, vector<2x256xf32>
    %cst_48 = arith.constant dense<0.000000e+00> : vector<2x256xf32>
    %156 = tpu.matmul %153, %7, %cst_48 {dimension_numbers = #tpu.dot_dimension_numbers<[1], [0], [0], [1], [0, 0, 1, 1], [], []>} : vector<2x64xf32>, vector<64x256xf32>, vector<2x256xf32> -> vector<2x256xf32>
    %157 = arith.addf %155, %156 : vector<2x256xf32>
    %158 = vector.extract_strided_slice %157 {offsets = [0, 0], sizes = [2, 64], strides = [1, 1]} : vector<2x256xf32> to vector<2x64xf32>
    %159 = arith.negf %158 : vector<2x64xf32>
    %160 = math.exp %159 : vector<2x64xf32>
    %cst_49 = arith.constant 1.000000e+00 : f32
    %161 = vector.broadcast %cst_49 : f32 to vector<2x64xf32>
    %162 = arith.addf %161, %160 : vector<2x64xf32>
    %163 = arith.divf %161, %162 : vector<2x64xf32>
    %164 = vector.extract_strided_slice %157 {offsets = [0, 64], sizes = [2, 64], strides = [1, 1]} : vector<2x256xf32> to vector<2x64xf32>
    %165 = arith.negf %164 : vector<2x64xf32>
    %166 = math.exp %165 : vector<2x64xf32>
    %cst_50 = arith.constant 1.000000e+00 : f32
    %167 = vector.broadcast %cst_50 : f32 to vector<2x64xf32>
    %168 = arith.addf %167, %166 : vector<2x64xf32>
    %169 = arith.divf %167, %168 : vector<2x64xf32>
    %170 = vector.extract_strided_slice %157 {offsets = [0, 128], sizes = [2, 64], strides = [1, 1]} : vector<2x256xf32> to vector<2x64xf32>
    %171 = math.tanh %170 : vector<2x64xf32>
    %172 = vector.extract_strided_slice %157 {offsets = [0, 192], sizes = [2, 64], strides = [1, 1]} : vector<2x256xf32> to vector<2x64xf32>
    %173 = arith.negf %172 : vector<2x64xf32>
    %174 = math.exp %173 : vector<2x64xf32>
    %cst_51 = arith.constant 1.000000e+00 : f32
    %175 = vector.broadcast %cst_51 : f32 to vector<2x64xf32>
    %176 = arith.addf %175, %174 : vector<2x64xf32>
    %177 = arith.divf %175, %176 : vector<2x64xf32>
    %178 = arith.mulf %169, %151 : vector<2x64xf32>
    %179 = arith.mulf %163, %171 : vector<2x64xf32>
    %180 = arith.addf %178, %179 : vector<2x64xf32>
    %181 = math.tanh %180 : vector<2x64xf32>
    %182 = arith.mulf %177, %181 : vector<2x64xf32>
    %c10_52 = arith.constant 10 : index
    %c0_53 = arith.constant 0 : index
    %183 = vector.load %arg17[%c10_52, %c0_53] : memref<16x64xf32, #tpu.memory_space<vmem>>, vector<2x64xf32>
    tpu.vector_store %arg17[%c10_52, %c0_53], %182 {strides = array<i32>} : memref<16x64xf32, #tpu.memory_space<vmem>>, vector<2x64xf32>,
    %c12 = arith.constant 12 : index
    %c0_54 = arith.constant 0 : index
    %184 = vector.load %arg16[%c12, %c0_54] : memref<16x256xf32, #tpu.memory_space<vmem>>, vector<2x256xf32>
    %cst_55 = arith.constant dense<0.000000e+00> : vector<2x256xf32>
    %185 = tpu.matmul %182, %7, %cst_55 {dimension_numbers = #tpu.dot_dimension_numbers<[1], [0], [0], [1], [0, 0, 1, 1], [], []>} : vector<2x64xf32>, vector<64x256xf32>, vector<2x256xf32> -> vector<2x256xf32>
    %186 = arith.addf %184, %185 : vector<2x256xf32>
    %187 = vector.extract_strided_slice %186 {offsets = [0, 0], sizes = [2, 64], strides = [1, 1]} : vector<2x256xf32> to vector<2x64xf32>
    %188 = arith.negf %187 : vector<2x64xf32>
    %189 = math.exp %188 : vector<2x64xf32>
    %cst_56 = arith.constant 1.000000e+00 : f32
    %190 = vector.broadcast %cst_56 : f32 to vector<2x64xf32>
    %191 = arith.addf %190, %189 : vector<2x64xf32>
    %192 = arith.divf %190, %191 : vector<2x64xf32>
    %193 = vector.extract_strided_slice %186 {offsets = [0, 64], sizes = [2, 64], strides = [1, 1]} : vector<2x256xf32> to vector<2x64xf32>
    %194 = arith.negf %193 : vector<2x64xf32>
    %195 = math.exp %194 : vector<2x64xf32>
    %cst_57 = arith.constant 1.000000e+00 : f32
    %196 = vector.broadcast %cst_57 : f32 to vector<2x64xf32>
    %197 = arith.addf %196, %195 : vector<2x64xf32>
    %198 = arith.divf %196, %197 : vector<2x64xf32>
    %199 = vector.extract_strided_slice %186 {offsets = [0, 128], sizes = [2, 64], strides = [1, 1]} : vector<2x256xf32> to vector<2x64xf32>
    %200 = math.tanh %199 : vector<2x64xf32>
    %201 = vector.extract_strided_slice %186 {offsets = [0, 192], sizes = [2, 64], strides = [1, 1]} : vector<2x256xf32> to vector<2x64xf32>
    %202 = arith.negf %201 : vector<2x64xf32>
    %203 = math.exp %202 : vector<2x64xf32>
    %cst_58 = arith.constant 1.000000e+00 : f32
    %204 = vector.broadcast %cst_58 : f32 to vector<2x64xf32>
    %205 = arith.addf %204, %203 : vector<2x64xf32>
    %206 = arith.divf %204, %205 : vector<2x64xf32>
    %207 = arith.mulf %198, %180 : vector<2x64xf32>
    %208 = arith.mulf %192, %200 : vector<2x64xf32>
    %209 = arith.addf %207, %208 : vector<2x64xf32>
    %210 = math.tanh %209 : vector<2x64xf32>
    %211 = arith.mulf %206, %210 : vector<2x64xf32>
    %c12_59 = arith.constant 12 : index
    %c0_60 = arith.constant 0 : index
    %212 = vector.load %arg17[%c12_59, %c0_60] : memref<16x64xf32, #tpu.memory_space<vmem>>, vector<2x64xf32>
    tpu.vector_store %arg17[%c12_59, %c0_60], %211 {strides = array<i32>} : memref<16x64xf32, #tpu.memory_space<vmem>>, vector<2x64xf32>,
    %c14 = arith.constant 14 : index
    %c0_61 = arith.constant 0 : index
    %213 = vector.load %arg16[%c14, %c0_61] : memref<16x256xf32, #tpu.memory_space<vmem>>, vector<2x256xf32>
    %cst_62 = arith.constant dense<0.000000e+00> : vector<2x256xf32>
    %214 = tpu.matmul %211, %7, %cst_62 {dimension_numbers = #tpu.dot_dimension_numbers<[1], [0], [0], [1], [0, 0, 1, 1], [], []>} : vector<2x64xf32>, vector<64x256xf32>, vector<2x256xf32> -> vector<2x256xf32>
    %215 = arith.addf %213, %214 : vector<2x256xf32>
    %216 = vector.extract_strided_slice %215 {offsets = [0, 0], sizes = [2, 64], strides = [1, 1]} : vector<2x256xf32> to vector<2x64xf32>
    %217 = arith.negf %216 : vector<2x64xf32>
    %218 = math.exp %217 : vector<2x64xf32>
    %cst_63 = arith.constant 1.000000e+00 : f32
    %219 = vector.broadcast %cst_63 : f32 to vector<2x64xf32>
    %220 = arith.addf %219, %218 : vector<2x64xf32>
    %221 = arith.divf %219, %220 : vector<2x64xf32>
    %222 = vector.extract_strided_slice %215 {offsets = [0, 64], sizes = [2, 64], strides = [1, 1]} : vector<2x256xf32> to vector<2x64xf32>
    %223 = arith.negf %222 : vector<2x64xf32>
    %224 = math.exp %223 : vector<2x64xf32>
    %cst_64 = arith.constant 1.000000e+00 : f32
    %225 = vector.broadcast %cst_64 : f32 to vector<2x64xf32>
    %226 = arith.addf %225, %224 : vector<2x64xf32>
    %227 = arith.divf %225, %226 : vector<2x64xf32>
    %228 = vector.extract_strided_slice %215 {offsets = [0, 128], sizes = [2, 64], strides = [1, 1]} : vector<2x256xf32> to vector<2x64xf32>
    %229 = math.tanh %228 : vector<2x64xf32>
    %230 = vector.extract_strided_slice %215 {offsets = [0, 192], sizes = [2, 64], strides = [1, 1]} : vector<2x256xf32> to vector<2x64xf32>
    %231 = arith.negf %230 : vector<2x64xf32>
    %232 = math.exp %231 : vector<2x64xf32>
    %cst_65 = arith.constant 1.000000e+00 : f32
    %233 = vector.broadcast %cst_65 : f32 to vector<2x64xf32>
    %234 = arith.addf %233, %232 : vector<2x64xf32>
    %235 = arith.divf %233, %234 : vector<2x64xf32>
    %236 = arith.mulf %227, %209 : vector<2x64xf32>
    %237 = arith.mulf %221, %229 : vector<2x64xf32>
    %238 = arith.addf %236, %237 : vector<2x64xf32>
    %239 = math.tanh %238 : vector<2x64xf32>
    %240 = arith.mulf %235, %239 : vector<2x64xf32>
    %c14_66 = arith.constant 14 : index
    %c0_67 = arith.constant 0 : index
    %241 = vector.load %arg17[%c14_66, %c0_67] : memref<16x64xf32, #tpu.memory_space<vmem>>, vector<2x64xf32>
    tpu.vector_store %arg17[%c14_66, %c0_67], %240 {strides = array<i32>} : memref<16x64xf32, #tpu.memory_space<vmem>>, vector<2x64xf32>,
    %c0_68 = arith.constant 0 : index
    %c0_69 = arith.constant 0 : index
    %242 = vector.load %arg4[%c0_68, %c0_69] : memref<20x256xf32, #tpu.memory_space<vmem>>, vector<20x256xf32>
    %cst_70 = arith.constant dense<0.000000e+00> : vector<16x256xf32>
    %243 = tpu.matmul %0, %242, %cst_70 {dimension_numbers = #tpu.dot_dimension_numbers<[1], [0], [0], [1], [0, 0, 1, 1], [], []>} : vector<16x20xf32>, vector<20x256xf32>, vector<16x256xf32> -> vector<16x256xf32>
    %c0_71 = arith.constant 0 : index
    %c0_72 = arith.constant 0 : index
    %244 = vector.load %arg6[%c0_71, %c0_72] : memref<1x256xf32, #tpu.memory_space<vmem>>, vector<1x256xf32>
    %245 = vector.broadcast %244 : vector<1x256xf32> to vector<16x256xf32>
    %246 = arith.addf %243, %245 : vector<16x256xf32>
    %c0_73 = arith.constant 0 : index
    %c0_74 = arith.constant 0 : index
    %247 = vector.load %arg16[%c0_73, %c0_74] : memref<16x256xf32, #tpu.memory_space<vmem>>, vector<16x256xf32>
    tpu.vector_store %arg16[%c0_73, %c0_74], %246 {strides = array<i32>} : memref<16x256xf32, #tpu.memory_space<vmem>>, vector<16x256xf32>,
    %c0_75 = arith.constant 0 : index
    %c0_76 = arith.constant 0 : index
    %248 = vector.load %arg5[%c0_75, %c0_76] : memref<64x256xf32, #tpu.memory_space<vmem>>, vector<64x256xf32>
    %cst_77 = arith.constant 0.000000e+00 : f32
    %249 = vector.broadcast %cst_77 : f32 to vector<2x64xf32>
    %cst_78 = arith.constant 0.000000e+00 : f32
    %250 = vector.broadcast %cst_78 : f32 to vector<2x64xf32>
    %c14_79 = arith.constant 14 : index
    %c0_80 = arith.constant 0 : index
    %251 = vector.load %arg16[%c14_79, %c0_80] : memref<16x256xf32, #tpu.memory_space<vmem>>, vector<2x256xf32>
    %cst_81 = arith.constant dense<0.000000e+00> : vector<2x256xf32>
    %252 = tpu.matmul %249, %248, %cst_81 {dimension_numbers = #tpu.dot_dimension_numbers<[1], [0], [0], [1], [0, 0, 1, 1], [], []>} : vector<2x64xf32>, vector<64x256xf32>, vector<2x256xf32> -> vector<2x256xf32>
    %253 = arith.addf %251, %252 : vector<2x256xf32>
    %254 = vector.extract_strided_slice %253 {offsets = [0, 0], sizes = [2, 64], strides = [1, 1]} : vector<2x256xf32> to vector<2x64xf32>
    %255 = arith.negf %254 : vector<2x64xf32>
    %256 = math.exp %255 : vector<2x64xf32>
    %cst_82 = arith.constant 1.000000e+00 : f32
    %257 = vector.broadcast %cst_82 : f32 to vector<2x64xf32>
    %258 = arith.addf %257, %256 : vector<2x64xf32>
    %259 = arith.divf %257, %258 : vector<2x64xf32>
    %260 = vector.extract_strided_slice %253 {offsets = [0, 64], sizes = [2, 64], strides = [1, 1]} : vector<2x256xf32> to vector<2x64xf32>
    %261 = arith.negf %260 : vector<2x64xf32>
    %262 = math.exp %261 : vector<2x64xf32>
    %cst_83 = arith.constant 1.000000e+00 : f32
    %263 = vector.broadcast %cst_83 : f32 to vector<2x64xf32>
    %264 = arith.addf %263, %262 : vector<2x64xf32>
    %265 = arith.divf %263, %264 : vector<2x64xf32>
    %266 = vector.extract_strided_slice %253 {offsets = [0, 128], sizes = [2, 64], strides = [1, 1]} : vector<2x256xf32> to vector<2x64xf32>
    %267 = math.tanh %266 : vector<2x64xf32>
    %268 = vector.extract_strided_slice %253 {offsets = [0, 192], sizes = [2, 64], strides = [1, 1]} : vector<2x256xf32> to vector<2x64xf32>
    %269 = arith.negf %268 : vector<2x64xf32>
    %270 = math.exp %269 : vector<2x64xf32>
    %cst_84 = arith.constant 1.000000e+00 : f32
    %271 = vector.broadcast %cst_84 : f32 to vector<2x64xf32>
    %272 = arith.addf %271, %270 : vector<2x64xf32>
    %273 = arith.divf %271, %272 : vector<2x64xf32>
    %274 = arith.mulf %265, %250 : vector<2x64xf32>
    %275 = arith.mulf %259, %267 : vector<2x64xf32>
    %276 = arith.addf %274, %275 : vector<2x64xf32>
    %277 = math.tanh %276 : vector<2x64xf32>
    %278 = arith.mulf %273, %277 : vector<2x64xf32>
    %c14_85 = arith.constant 14 : index
    %c0_86 = arith.constant 0 : index
    %279 = vector.load %arg18[%c14_85, %c0_86] : memref<16x64xf32, #tpu.memory_space<vmem>>, vector<2x64xf32>
    tpu.vector_store %arg18[%c14_85, %c0_86], %278 {strides = array<i32>} : memref<16x64xf32, #tpu.memory_space<vmem>>, vector<2x64xf32>,
    %c12_87 = arith.constant 12 : index
    %c0_88 = arith.constant 0 : index
    %280 = vector.load %arg16[%c12_87, %c0_88] : memref<16x256xf32, #tpu.memory_space<vmem>>, vector<2x256xf32>
    %cst_89 = arith.constant dense<0.000000e+00> : vector<2x256xf32>
    %281 = tpu.matmul %278, %248, %cst_89 {dimension_numbers = #tpu.dot_dimension_numbers<[1], [0], [0], [1], [0, 0, 1, 1], [], []>} : vector<2x64xf32>, vector<64x256xf32>, vector<2x256xf32> -> vector<2x256xf32>
    %282 = arith.addf %280, %281 : vector<2x256xf32>
    %283 = vector.extract_strided_slice %282 {offsets = [0, 0], sizes = [2, 64], strides = [1, 1]} : vector<2x256xf32> to vector<2x64xf32>
    %284 = arith.negf %283 : vector<2x64xf32>
    %285 = math.exp %284 : vector<2x64xf32>
    %cst_90 = arith.constant 1.000000e+00 : f32
    %286 = vector.broadcast %cst_90 : f32 to vector<2x64xf32>
    %287 = arith.addf %286, %285 : vector<2x64xf32>
    %288 = arith.divf %286, %287 : vector<2x64xf32>
    %289 = vector.extract_strided_slice %282 {offsets = [0, 64], sizes = [2, 64], strides = [1, 1]} : vector<2x256xf32> to vector<2x64xf32>
    %290 = arith.negf %289 : vector<2x64xf32>
    %291 = math.exp %290 : vector<2x64xf32>
    %cst_91 = arith.constant 1.000000e+00 : f32
    %292 = vector.broadcast %cst_91 : f32 to vector<2x64xf32>
    %293 = arith.addf %292, %291 : vector<2x64xf32>
    %294 = arith.divf %292, %293 : vector<2x64xf32>
    %295 = vector.extract_strided_slice %282 {offsets = [0, 128], sizes = [2, 64], strides = [1, 1]} : vector<2x256xf32> to vector<2x64xf32>
    %296 = math.tanh %295 : vector<2x64xf32>
    %297 = vector.extract_strided_slice %282 {offsets = [0, 192], sizes = [2, 64], strides = [1, 1]} : vector<2x256xf32> to vector<2x64xf32>
    %298 = arith.negf %297 : vector<2x64xf32>
    %299 = math.exp %298 : vector<2x64xf32>
    %cst_92 = arith.constant 1.000000e+00 : f32
    %300 = vector.broadcast %cst_92 : f32 to vector<2x64xf32>
    %301 = arith.addf %300, %299 : vector<2x64xf32>
    %302 = arith.divf %300, %301 : vector<2x64xf32>
    %303 = arith.mulf %294, %276 : vector<2x64xf32>
    %304 = arith.mulf %288, %296 : vector<2x64xf32>
    %305 = arith.addf %303, %304 : vector<2x64xf32>
    %306 = math.tanh %305 : vector<2x64xf32>
    %307 = arith.mulf %302, %306 : vector<2x64xf32>
    %c12_93 = arith.constant 12 : index
    %c0_94 = arith.constant 0 : index
    %308 = vector.load %arg18[%c12_93, %c0_94] : memref<16x64xf32, #tpu.memory_space<vmem>>, vector<2x64xf32>
    tpu.vector_store %arg18[%c12_93, %c0_94], %307 {strides = array<i32>} : memref<16x64xf32, #tpu.memory_space<vmem>>, vector<2x64xf32>,
    %c10_95 = arith.constant 10 : index
    %c0_96 = arith.constant 0 : index
    %309 = vector.load %arg16[%c10_95, %c0_96] : memref<16x256xf32, #tpu.memory_space<vmem>>, vector<2x256xf32>
    %cst_97 = arith.constant dense<0.000000e+00> : vector<2x256xf32>
    %310 = tpu.matmul %307, %248, %cst_97 {dimension_numbers = #tpu.dot_dimension_numbers<[1], [0], [0], [1], [0, 0, 1, 1], [], []>} : vector<2x64xf32>, vector<64x256xf32>, vector<2x256xf32> -> vector<2x256xf32>
    %311 = arith.addf %309, %310 : vector<2x256xf32>
    %312 = vector.extract_strided_slice %311 {offsets = [0, 0], sizes = [2, 64], strides = [1, 1]} : vector<2x256xf32> to vector<2x64xf32>
    %313 = arith.negf %312 : vector<2x64xf32>
    %314 = math.exp %313 : vector<2x64xf32>
    %cst_98 = arith.constant 1.000000e+00 : f32
    %315 = vector.broadcast %cst_98 : f32 to vector<2x64xf32>
    %316 = arith.addf %315, %314 : vector<2x64xf32>
    %317 = arith.divf %315, %316 : vector<2x64xf32>
    %318 = vector.extract_strided_slice %311 {offsets = [0, 64], sizes = [2, 64], strides = [1, 1]} : vector<2x256xf32> to vector<2x64xf32>
    %319 = arith.negf %318 : vector<2x64xf32>
    %320 = math.exp %319 : vector<2x64xf32>
    %cst_99 = arith.constant 1.000000e+00 : f32
    %321 = vector.broadcast %cst_99 : f32 to vector<2x64xf32>
    %322 = arith.addf %321, %320 : vector<2x64xf32>
    %323 = arith.divf %321, %322 : vector<2x64xf32>
    %324 = vector.extract_strided_slice %311 {offsets = [0, 128], sizes = [2, 64], strides = [1, 1]} : vector<2x256xf32> to vector<2x64xf32>
    %325 = math.tanh %324 : vector<2x64xf32>
    %326 = vector.extract_strided_slice %311 {offsets = [0, 192], sizes = [2, 64], strides = [1, 1]} : vector<2x256xf32> to vector<2x64xf32>
    %327 = arith.negf %326 : vector<2x64xf32>
    %328 = math.exp %327 : vector<2x64xf32>
    %cst_100 = arith.constant 1.000000e+00 : f32
    %329 = vector.broadcast %cst_100 : f32 to vector<2x64xf32>
    %330 = arith.addf %329, %328 : vector<2x64xf32>
    %331 = arith.divf %329, %330 : vector<2x64xf32>
    %332 = arith.mulf %323, %305 : vector<2x64xf32>
    %333 = arith.mulf %317, %325 : vector<2x64xf32>
    %334 = arith.addf %332, %333 : vector<2x64xf32>
    %335 = math.tanh %334 : vector<2x64xf32>
    %336 = arith.mulf %331, %335 : vector<2x64xf32>
    %c10_101 = arith.constant 10 : index
    %c0_102 = arith.constant 0 : index
    %337 = vector.load %arg18[%c10_101, %c0_102] : memref<16x64xf32, #tpu.memory_space<vmem>>, vector<2x64xf32>
    tpu.vector_store %arg18[%c10_101, %c0_102], %336 {strides = array<i32>} : memref<16x64xf32, #tpu.memory_space<vmem>>, vector<2x64xf32>,
    %c8_103 = arith.constant 8 : index
    %c0_104 = arith.constant 0 : index
    %338 = vector.load %arg16[%c8_103, %c0_104] : memref<16x256xf32, #tpu.memory_space<vmem>>, vector<2x256xf32>
    %cst_105 = arith.constant dense<0.000000e+00> : vector<2x256xf32>
    %339 = tpu.matmul %336, %248, %cst_105 {dimension_numbers = #tpu.dot_dimension_numbers<[1], [0], [0], [1], [0, 0, 1, 1], [], []>} : vector<2x64xf32>, vector<64x256xf32>, vector<2x256xf32> -> vector<2x256xf32>
    %340 = arith.addf %338, %339 : vector<2x256xf32>
    %341 = vector.extract_strided_slice %340 {offsets = [0, 0], sizes = [2, 64], strides = [1, 1]} : vector<2x256xf32> to vector<2x64xf32>
    %342 = arith.negf %341 : vector<2x64xf32>
    %343 = math.exp %342 : vector<2x64xf32>
    %cst_106 = arith.constant 1.000000e+00 : f32
    %344 = vector.broadcast %cst_106 : f32 to vector<2x64xf32>
    %345 = arith.addf %344, %343 : vector<2x64xf32>
    %346 = arith.divf %344, %345 : vector<2x64xf32>
    %347 = vector.extract_strided_slice %340 {offsets = [0, 64], sizes = [2, 64], strides = [1, 1]} : vector<2x256xf32> to vector<2x64xf32>
    %348 = arith.negf %347 : vector<2x64xf32>
    %349 = math.exp %348 : vector<2x64xf32>
    %cst_107 = arith.constant 1.000000e+00 : f32
    %350 = vector.broadcast %cst_107 : f32 to vector<2x64xf32>
    %351 = arith.addf %350, %349 : vector<2x64xf32>
    %352 = arith.divf %350, %351 : vector<2x64xf32>
    %353 = vector.extract_strided_slice %340 {offsets = [0, 128], sizes = [2, 64], strides = [1, 1]} : vector<2x256xf32> to vector<2x64xf32>
    %354 = math.tanh %353 : vector<2x64xf32>
    %355 = vector.extract_strided_slice %340 {offsets = [0, 192], sizes = [2, 64], strides = [1, 1]} : vector<2x256xf32> to vector<2x64xf32>
    %356 = arith.negf %355 : vector<2x64xf32>
    %357 = math.exp %356 : vector<2x64xf32>
    %cst_108 = arith.constant 1.000000e+00 : f32
    %358 = vector.broadcast %cst_108 : f32 to vector<2x64xf32>
    %359 = arith.addf %358, %357 : vector<2x64xf32>
    %360 = arith.divf %358, %359 : vector<2x64xf32>
    %361 = arith.mulf %352, %334 : vector<2x64xf32>
    %362 = arith.mulf %346, %354 : vector<2x64xf32>
    %363 = arith.addf %361, %362 : vector<2x64xf32>
    %364 = math.tanh %363 : vector<2x64xf32>
    %365 = arith.mulf %360, %364 : vector<2x64xf32>
    %c8_109 = arith.constant 8 : index
    %c0_110 = arith.constant 0 : index
    %366 = vector.load %arg18[%c8_109, %c0_110] : memref<16x64xf32, #tpu.memory_space<vmem>>, vector<2x64xf32>
    tpu.vector_store %arg18[%c8_109, %c0_110], %365 {strides = array<i32>} : memref<16x64xf32, #tpu.memory_space<vmem>>, vector<2x64xf32>,
    %c6_111 = arith.constant 6 : index
    %c0_112 = arith.constant 0 : index
    %367 = vector.load %arg16[%c6_111, %c0_112] : memref<16x256xf32, #tpu.memory_space<vmem>>, vector<2x256xf32>
    %cst_113 = arith.constant dense<0.000000e+00> : vector<2x256xf32>
    %368 = tpu.matmul %365, %248, %cst_113 {dimension_numbers = #tpu.dot_dimension_numbers<[1], [0], [0], [1], [0, 0, 1, 1], [], []>} : vector<2x64xf32>, vector<64x256xf32>, vector<2x256xf32> -> vector<2x256xf32>
    %369 = arith.addf %367, %368 : vector<2x256xf32>
    %370 = vector.extract_strided_slice %369 {offsets = [0, 0], sizes = [2, 64], strides = [1, 1]} : vector<2x256xf32> to vector<2x64xf32>
    %371 = arith.negf %370 : vector<2x64xf32>
    %372 = math.exp %371 : vector<2x64xf32>
    %cst_114 = arith.constant 1.000000e+00 : f32
    %373 = vector.broadcast %cst_114 : f32 to vector<2x64xf32>
    %374 = arith.addf %373, %372 : vector<2x64xf32>
    %375 = arith.divf %373, %374 : vector<2x64xf32>
    %376 = vector.extract_strided_slice %369 {offsets = [0, 64], sizes = [2, 64], strides = [1, 1]} : vector<2x256xf32> to vector<2x64xf32>
    %377 = arith.negf %376 : vector<2x64xf32>
    %378 = math.exp %377 : vector<2x64xf32>
    %cst_115 = arith.constant 1.000000e+00 : f32
    %379 = vector.broadcast %cst_115 : f32 to vector<2x64xf32>
    %380 = arith.addf %379, %378 : vector<2x64xf32>
    %381 = arith.divf %379, %380 : vector<2x64xf32>
    %382 = vector.extract_strided_slice %369 {offsets = [0, 128], sizes = [2, 64], strides = [1, 1]} : vector<2x256xf32> to vector<2x64xf32>
    %383 = math.tanh %382 : vector<2x64xf32>
    %384 = vector.extract_strided_slice %369 {offsets = [0, 192], sizes = [2, 64], strides = [1, 1]} : vector<2x256xf32> to vector<2x64xf32>
    %385 = arith.negf %384 : vector<2x64xf32>
    %386 = math.exp %385 : vector<2x64xf32>
    %cst_116 = arith.constant 1.000000e+00 : f32
    %387 = vector.broadcast %cst_116 : f32 to vector<2x64xf32>
    %388 = arith.addf %387, %386 : vector<2x64xf32>
    %389 = arith.divf %387, %388 : vector<2x64xf32>
    %390 = arith.mulf %381, %363 : vector<2x64xf32>
    %391 = arith.mulf %375, %383 : vector<2x64xf32>
    %392 = arith.addf %390, %391 : vector<2x64xf32>
    %393 = math.tanh %392 : vector<2x64xf32>
    %394 = arith.mulf %389, %393 : vector<2x64xf32>
    %c6_117 = arith.constant 6 : index
    %c0_118 = arith.constant 0 : index
    %395 = vector.load %arg18[%c6_117, %c0_118] : memref<16x64xf32, #tpu.memory_space<vmem>>, vector<2x64xf32>
    tpu.vector_store %arg18[%c6_117, %c0_118], %394 {strides = array<i32>} : memref<16x64xf32, #tpu.memory_space<vmem>>, vector<2x64xf32>,
    %c4_119 = arith.constant 4 : index
    %c0_120 = arith.constant 0 : index
    %396 = vector.load %arg16[%c4_119, %c0_120] : memref<16x256xf32, #tpu.memory_space<vmem>>, vector<2x256xf32>
    %cst_121 = arith.constant dense<0.000000e+00> : vector<2x256xf32>
    %397 = tpu.matmul %394, %248, %cst_121 {dimension_numbers = #tpu.dot_dimension_numbers<[1], [0], [0], [1], [0, 0, 1, 1], [], []>} : vector<2x64xf32>, vector<64x256xf32>, vector<2x256xf32> -> vector<2x256xf32>
    %398 = arith.addf %396, %397 : vector<2x256xf32>
    %399 = vector.extract_strided_slice %398 {offsets = [0, 0], sizes = [2, 64], strides = [1, 1]} : vector<2x256xf32> to vector<2x64xf32>
    %400 = arith.negf %399 : vector<2x64xf32>
    %401 = math.exp %400 : vector<2x64xf32>
    %cst_122 = arith.constant 1.000000e+00 : f32
    %402 = vector.broadcast %cst_122 : f32 to vector<2x64xf32>
    %403 = arith.addf %402, %401 : vector<2x64xf32>
    %404 = arith.divf %402, %403 : vector<2x64xf32>
    %405 = vector.extract_strided_slice %398 {offsets = [0, 64], sizes = [2, 64], strides = [1, 1]} : vector<2x256xf32> to vector<2x64xf32>
    %406 = arith.negf %405 : vector<2x64xf32>
    %407 = math.exp %406 : vector<2x64xf32>
    %cst_123 = arith.constant 1.000000e+00 : f32
    %408 = vector.broadcast %cst_123 : f32 to vector<2x64xf32>
    %409 = arith.addf %408, %407 : vector<2x64xf32>
    %410 = arith.divf %408, %409 : vector<2x64xf32>
    %411 = vector.extract_strided_slice %398 {offsets = [0, 128], sizes = [2, 64], strides = [1, 1]} : vector<2x256xf32> to vector<2x64xf32>
    %412 = math.tanh %411 : vector<2x64xf32>
    %413 = vector.extract_strided_slice %398 {offsets = [0, 192], sizes = [2, 64], strides = [1, 1]} : vector<2x256xf32> to vector<2x64xf32>
    %414 = arith.negf %413 : vector<2x64xf32>
    %415 = math.exp %414 : vector<2x64xf32>
    %cst_124 = arith.constant 1.000000e+00 : f32
    %416 = vector.broadcast %cst_124 : f32 to vector<2x64xf32>
    %417 = arith.addf %416, %415 : vector<2x64xf32>
    %418 = arith.divf %416, %417 : vector<2x64xf32>
    %419 = arith.mulf %410, %392 : vector<2x64xf32>
    %420 = arith.mulf %404, %412 : vector<2x64xf32>
    %421 = arith.addf %419, %420 : vector<2x64xf32>
    %422 = math.tanh %421 : vector<2x64xf32>
    %423 = arith.mulf %418, %422 : vector<2x64xf32>
    %c4_125 = arith.constant 4 : index
    %c0_126 = arith.constant 0 : index
    %424 = vector.load %arg18[%c4_125, %c0_126] : memref<16x64xf32, #tpu.memory_space<vmem>>, vector<2x64xf32>
    tpu.vector_store %arg18[%c4_125, %c0_126], %423 {strides = array<i32>} : memref<16x64xf32, #tpu.memory_space<vmem>>, vector<2x64xf32>,
    %c2_127 = arith.constant 2 : index
    %c0_128 = arith.constant 0 : index
    %425 = vector.load %arg16[%c2_127, %c0_128] : memref<16x256xf32, #tpu.memory_space<vmem>>, vector<2x256xf32>
    %cst_129 = arith.constant dense<0.000000e+00> : vector<2x256xf32>
    %426 = tpu.matmul %423, %248, %cst_129 {dimension_numbers = #tpu.dot_dimension_numbers<[1], [0], [0], [1], [0, 0, 1, 1], [], []>} : vector<2x64xf32>, vector<64x256xf32>, vector<2x256xf32> -> vector<2x256xf32>
    %427 = arith.addf %425, %426 : vector<2x256xf32>
    %428 = vector.extract_strided_slice %427 {offsets = [0, 0], sizes = [2, 64], strides = [1, 1]} : vector<2x256xf32> to vector<2x64xf32>
    %429 = arith.negf %428 : vector<2x64xf32>
    %430 = math.exp %429 : vector<2x64xf32>
    %cst_130 = arith.constant 1.000000e+00 : f32
    %431 = vector.broadcast %cst_130 : f32 to vector<2x64xf32>
    %432 = arith.addf %431, %430 : vector<2x64xf32>
    %433 = arith.divf %431, %432 : vector<2x64xf32>
    %434 = vector.extract_strided_slice %427 {offsets = [0, 64], sizes = [2, 64], strides = [1, 1]} : vector<2x256xf32> to vector<2x64xf32>
    %435 = arith.negf %434 : vector<2x64xf32>
    %436 = math.exp %435 : vector<2x64xf32>
    %cst_131 = arith.constant 1.000000e+00 : f32
    %437 = vector.broadcast %cst_131 : f32 to vector<2x64xf32>
    %438 = arith.addf %437, %436 : vector<2x64xf32>
    %439 = arith.divf %437, %438 : vector<2x64xf32>
    %440 = vector.extract_strided_slice %427 {offsets = [0, 128], sizes = [2, 64], strides = [1, 1]} : vector<2x256xf32> to vector<2x64xf32>
    %441 = math.tanh %440 : vector<2x64xf32>
    %442 = vector.extract_strided_slice %427 {offsets = [0, 192], sizes = [2, 64], strides = [1, 1]} : vector<2x256xf32> to vector<2x64xf32>
    %443 = arith.negf %442 : vector<2x64xf32>
    %444 = math.exp %443 : vector<2x64xf32>
    %cst_132 = arith.constant 1.000000e+00 : f32
    %445 = vector.broadcast %cst_132 : f32 to vector<2x64xf32>
    %446 = arith.addf %445, %444 : vector<2x64xf32>
    %447 = arith.divf %445, %446 : vector<2x64xf32>
    %448 = arith.mulf %439, %421 : vector<2x64xf32>
    %449 = arith.mulf %433, %441 : vector<2x64xf32>
    %450 = arith.addf %448, %449 : vector<2x64xf32>
    %451 = math.tanh %450 : vector<2x64xf32>
    %452 = arith.mulf %447, %451 : vector<2x64xf32>
    %c2_133 = arith.constant 2 : index
    %c0_134 = arith.constant 0 : index
    %453 = vector.load %arg18[%c2_133, %c0_134] : memref<16x64xf32, #tpu.memory_space<vmem>>, vector<2x64xf32>
    tpu.vector_store %arg18[%c2_133, %c0_134], %452 {strides = array<i32>} : memref<16x64xf32, #tpu.memory_space<vmem>>, vector<2x64xf32>,
    %c0_135 = arith.constant 0 : index
    %c0_136 = arith.constant 0 : index
    %454 = vector.load %arg16[%c0_135, %c0_136] : memref<16x256xf32, #tpu.memory_space<vmem>>, vector<2x256xf32>
    %cst_137 = arith.constant dense<0.000000e+00> : vector<2x256xf32>
    %455 = tpu.matmul %452, %248, %cst_137 {dimension_numbers = #tpu.dot_dimension_numbers<[1], [0], [0], [1], [0, 0, 1, 1], [], []>} : vector<2x64xf32>, vector<64x256xf32>, vector<2x256xf32> -> vector<2x256xf32>
    %456 = arith.addf %454, %455 : vector<2x256xf32>
    %457 = vector.extract_strided_slice %456 {offsets = [0, 0], sizes = [2, 64], strides = [1, 1]} : vector<2x256xf32> to vector<2x64xf32>
    %458 = arith.negf %457 : vector<2x64xf32>
    %459 = math.exp %458 : vector<2x64xf32>
    %cst_138 = arith.constant 1.000000e+00 : f32
    %460 = vector.broadcast %cst_138 : f32 to vector<2x64xf32>
    %461 = arith.addf %460, %459 : vector<2x64xf32>
    %462 = arith.divf %460, %461 : vector<2x64xf32>
    %463 = vector.extract_strided_slice %456 {offsets = [0, 64], sizes = [2, 64], strides = [1, 1]} : vector<2x256xf32> to vector<2x64xf32>
    %464 = arith.negf %463 : vector<2x64xf32>
    %465 = math.exp %464 : vector<2x64xf32>
    %cst_139 = arith.constant 1.000000e+00 : f32
    %466 = vector.broadcast %cst_139 : f32 to vector<2x64xf32>
    %467 = arith.addf %466, %465 : vector<2x64xf32>
    %468 = arith.divf %466, %467 : vector<2x64xf32>
    %469 = vector.extract_strided_slice %456 {offsets = [0, 128], sizes = [2, 64], strides = [1, 1]} : vector<2x256xf32> to vector<2x64xf32>
    %470 = math.tanh %469 : vector<2x64xf32>
    %471 = vector.extract_strided_slice %456 {offsets = [0, 192], sizes = [2, 64], strides = [1, 1]} : vector<2x256xf32> to vector<2x64xf32>
    %472 = arith.negf %471 : vector<2x64xf32>
    %473 = math.exp %472 : vector<2x64xf32>
    %cst_140 = arith.constant 1.000000e+00 : f32
    %474 = vector.broadcast %cst_140 : f32 to vector<2x64xf32>
    %475 = arith.addf %474, %473 : vector<2x64xf32>
    %476 = arith.divf %474, %475 : vector<2x64xf32>
    %477 = arith.mulf %468, %450 : vector<2x64xf32>
    %478 = arith.mulf %462, %470 : vector<2x64xf32>
    %479 = arith.addf %477, %478 : vector<2x64xf32>
    %480 = math.tanh %479 : vector<2x64xf32>
    %481 = arith.mulf %476, %480 : vector<2x64xf32>
    %c0_141 = arith.constant 0 : index
    %c0_142 = arith.constant 0 : index
    %482 = vector.load %arg18[%c0_141, %c0_142] : memref<16x64xf32, #tpu.memory_space<vmem>>, vector<2x64xf32>
    tpu.vector_store %arg18[%c0_141, %c0_142], %481 {strides = array<i32>} : memref<16x64xf32, #tpu.memory_space<vmem>>, vector<2x64xf32>,
    %c0_143 = arith.constant 0 : index
    %c0_144 = arith.constant 0 : index
    %483 = vector.load %arg17[%c0_143, %c0_144] : memref<16x64xf32, #tpu.memory_space<vmem>>, vector<16x64xf32>
    %c0_145 = arith.constant 0 : index
    %c0_146 = arith.constant 0 : index
    %484 = vector.load %arg18[%c0_145, %c0_146] : memref<16x64xf32, #tpu.memory_space<vmem>>, vector<16x64xf32>
    %c0_147 = arith.constant 0 : index
    %c0_148 = arith.constant 0 : index
    %485 = vector.load %arg7[%c0_147, %c0_148] : memref<128x256xf32, #tpu.memory_space<vmem>>, vector<64x256xf32>
    %cst_149 = arith.constant dense<0.000000e+00> : vector<16x256xf32>
    %486 = tpu.matmul %483, %485, %cst_149 {dimension_numbers = #tpu.dot_dimension_numbers<[1], [0], [0], [1], [0, 0, 1, 1], [], []>} : vector<16x64xf32>, vector<64x256xf32>, vector<16x256xf32> -> vector<16x256xf32>
    %c64 = arith.constant 64 : index
    %c0_150 = arith.constant 0 : index
    %487 = vector.load %arg7[%c64, %c0_150] : memref<128x256xf32, #tpu.memory_space<vmem>>, vector<64x256xf32>
    %cst_151 = arith.constant dense<0.000000e+00> : vector<16x256xf32>
    %488 = tpu.matmul %484, %487, %cst_151 {dimension_numbers = #tpu.dot_dimension_numbers<[1], [0], [0], [1], [0, 0, 1, 1], [], []>} : vector<16x64xf32>, vector<64x256xf32>, vector<16x256xf32> -> vector<16x256xf32>
    %489 = arith.addf %486, %488 : vector<16x256xf32>
    %c0_152 = arith.constant 0 : index
    %c0_153 = arith.constant 0 : index
    %490 = vector.load %arg9[%c0_152, %c0_153] : memref<1x256xf32, #tpu.memory_space<vmem>>, vector<1x256xf32>
    %491 = vector.broadcast %490 : vector<1x256xf32> to vector<16x256xf32>
    %492 = arith.addf %489, %491 : vector<16x256xf32>
    %c0_154 = arith.constant 0 : index
    %c0_155 = arith.constant 0 : index
    %493 = vector.load %arg16[%c0_154, %c0_155] : memref<16x256xf32, #tpu.memory_space<vmem>>, vector<16x256xf32>
    tpu.vector_store %arg16[%c0_154, %c0_155], %492 {strides = array<i32>} : memref<16x256xf32, #tpu.memory_space<vmem>>, vector<16x256xf32>,
    %c0_156 = arith.constant 0 : index
    %c0_157 = arith.constant 0 : index
    %494 = vector.load %arg8[%c0_156, %c0_157] : memref<64x256xf32, #tpu.memory_space<vmem>>, vector<64x256xf32>
    %cst_158 = arith.constant 0.000000e+00 : f32
    %495 = vector.broadcast %cst_158 : f32 to vector<2x64xf32>
    %cst_159 = arith.constant 0.000000e+00 : f32
    %496 = vector.broadcast %cst_159 : f32 to vector<2x64xf32>
    %c0_160 = arith.constant 0 : index
    %c0_161 = arith.constant 0 : index
    %497 = vector.load %arg16[%c0_160, %c0_161] : memref<16x256xf32, #tpu.memory_space<vmem>>, vector<2x256xf32>
    %cst_162 = arith.constant dense<0.000000e+00> : vector<2x256xf32>
    %498 = tpu.matmul %495, %494, %cst_162 {dimension_numbers = #tpu.dot_dimension_numbers<[1], [0], [0], [1], [0, 0, 1, 1], [], []>} : vector<2x64xf32>, vector<64x256xf32>, vector<2x256xf32> -> vector<2x256xf32>
    %499 = arith.addf %497, %498 : vector<2x256xf32>
    %500 = vector.extract_strided_slice %499 {offsets = [0, 0], sizes = [2, 64], strides = [1, 1]} : vector<2x256xf32> to vector<2x64xf32>
    %501 = arith.negf %500 : vector<2x64xf32>
    %502 = math.exp %501 : vector<2x64xf32>
    %cst_163 = arith.constant 1.000000e+00 : f32
    %503 = vector.broadcast %cst_163 : f32 to vector<2x64xf32>
    %504 = arith.addf %503, %502 : vector<2x64xf32>
    %505 = arith.divf %503, %504 : vector<2x64xf32>
    %506 = vector.extract_strided_slice %499 {offsets = [0, 64], sizes = [2, 64], strides = [1, 1]} : vector<2x256xf32> to vector<2x64xf32>
    %507 = arith.negf %506 : vector<2x64xf32>
    %508 = math.exp %507 : vector<2x64xf32>
    %cst_164 = arith.constant 1.000000e+00 : f32
    %509 = vector.broadcast %cst_164 : f32 to vector<2x64xf32>
    %510 = arith.addf %509, %508 : vector<2x64xf32>
    %511 = arith.divf %509, %510 : vector<2x64xf32>
    %512 = vector.extract_strided_slice %499 {offsets = [0, 128], sizes = [2, 64], strides = [1, 1]} : vector<2x256xf32> to vector<2x64xf32>
    %513 = math.tanh %512 : vector<2x64xf32>
    %514 = vector.extract_strided_slice %499 {offsets = [0, 192], sizes = [2, 64], strides = [1, 1]} : vector<2x256xf32> to vector<2x64xf32>
    %515 = arith.negf %514 : vector<2x64xf32>
    %516 = math.exp %515 : vector<2x64xf32>
    %cst_165 = arith.constant 1.000000e+00 : f32
    %517 = vector.broadcast %cst_165 : f32 to vector<2x64xf32>
    %518 = arith.addf %517, %516 : vector<2x64xf32>
    %519 = arith.divf %517, %518 : vector<2x64xf32>
    %520 = arith.mulf %511, %496 : vector<2x64xf32>
    %521 = arith.mulf %505, %513 : vector<2x64xf32>
    %522 = arith.addf %520, %521 : vector<2x64xf32>
    %523 = math.tanh %522 : vector<2x64xf32>
    %524 = arith.mulf %519, %523 : vector<2x64xf32>
    %c0_166 = arith.constant 0 : index
    %c0_167 = arith.constant 0 : index
    %525 = vector.load %arg19[%c0_166, %c0_167] : memref<16x64xf32, #tpu.memory_space<vmem>>, vector<2x64xf32>
    tpu.vector_store %arg19[%c0_166, %c0_167], %524 {strides = array<i32>} : memref<16x64xf32, #tpu.memory_space<vmem>>, vector<2x64xf32>,
    %c2_168 = arith.constant 2 : index
    %c0_169 = arith.constant 0 : index
    %526 = vector.load %arg16[%c2_168, %c0_169] : memref<16x256xf32, #tpu.memory_space<vmem>>, vector<2x256xf32>
    %cst_170 = arith.constant dense<0.000000e+00> : vector<2x256xf32>
    %527 = tpu.matmul %524, %494, %cst_170 {dimension_numbers = #tpu.dot_dimension_numbers<[1], [0], [0], [1], [0, 0, 1, 1], [], []>} : vector<2x64xf32>, vector<64x256xf32>, vector<2x256xf32> -> vector<2x256xf32>
    %528 = arith.addf %526, %527 : vector<2x256xf32>
    %529 = vector.extract_strided_slice %528 {offsets = [0, 0], sizes = [2, 64], strides = [1, 1]} : vector<2x256xf32> to vector<2x64xf32>
    %530 = arith.negf %529 : vector<2x64xf32>
    %531 = math.exp %530 : vector<2x64xf32>
    %cst_171 = arith.constant 1.000000e+00 : f32
    %532 = vector.broadcast %cst_171 : f32 to vector<2x64xf32>
    %533 = arith.addf %532, %531 : vector<2x64xf32>
    %534 = arith.divf %532, %533 : vector<2x64xf32>
    %535 = vector.extract_strided_slice %528 {offsets = [0, 64], sizes = [2, 64], strides = [1, 1]} : vector<2x256xf32> to vector<2x64xf32>
    %536 = arith.negf %535 : vector<2x64xf32>
    %537 = math.exp %536 : vector<2x64xf32>
    %cst_172 = arith.constant 1.000000e+00 : f32
    %538 = vector.broadcast %cst_172 : f32 to vector<2x64xf32>
    %539 = arith.addf %538, %537 : vector<2x64xf32>
    %540 = arith.divf %538, %539 : vector<2x64xf32>
    %541 = vector.extract_strided_slice %528 {offsets = [0, 128], sizes = [2, 64], strides = [1, 1]} : vector<2x256xf32> to vector<2x64xf32>
    %542 = math.tanh %541 : vector<2x64xf32>
    %543 = vector.extract_strided_slice %528 {offsets = [0, 192], sizes = [2, 64], strides = [1, 1]} : vector<2x256xf32> to vector<2x64xf32>
    %544 = arith.negf %543 : vector<2x64xf32>
    %545 = math.exp %544 : vector<2x64xf32>
    %cst_173 = arith.constant 1.000000e+00 : f32
    %546 = vector.broadcast %cst_173 : f32 to vector<2x64xf32>
    %547 = arith.addf %546, %545 : vector<2x64xf32>
    %548 = arith.divf %546, %547 : vector<2x64xf32>
    %549 = arith.mulf %540, %522 : vector<2x64xf32>
    %550 = arith.mulf %534, %542 : vector<2x64xf32>
    %551 = arith.addf %549, %550 : vector<2x64xf32>
    %552 = math.tanh %551 : vector<2x64xf32>
    %553 = arith.mulf %548, %552 : vector<2x64xf32>
    %c2_174 = arith.constant 2 : index
    %c0_175 = arith.constant 0 : index
    %554 = vector.load %arg19[%c2_174, %c0_175] : memref<16x64xf32, #tpu.memory_space<vmem>>, vector<2x64xf32>
    tpu.vector_store %arg19[%c2_174, %c0_175], %553 {strides = array<i32>} : memref<16x64xf32, #tpu.memory_space<vmem>>, vector<2x64xf32>,
    %c4_176 = arith.constant 4 : index
    %c0_177 = arith.constant 0 : index
    %555 = vector.load %arg16[%c4_176, %c0_177] : memref<16x256xf32, #tpu.memory_space<vmem>>, vector<2x256xf32>
    %cst_178 = arith.constant dense<0.000000e+00> : vector<2x256xf32>
    %556 = tpu.matmul %553, %494, %cst_178 {dimension_numbers = #tpu.dot_dimension_numbers<[1], [0], [0], [1], [0, 0, 1, 1], [], []>} : vector<2x64xf32>, vector<64x256xf32>, vector<2x256xf32> -> vector<2x256xf32>
    %557 = arith.addf %555, %556 : vector<2x256xf32>
    %558 = vector.extract_strided_slice %557 {offsets = [0, 0], sizes = [2, 64], strides = [1, 1]} : vector<2x256xf32> to vector<2x64xf32>
    %559 = arith.negf %558 : vector<2x64xf32>
    %560 = math.exp %559 : vector<2x64xf32>
    %cst_179 = arith.constant 1.000000e+00 : f32
    %561 = vector.broadcast %cst_179 : f32 to vector<2x64xf32>
    %562 = arith.addf %561, %560 : vector<2x64xf32>
    %563 = arith.divf %561, %562 : vector<2x64xf32>
    %564 = vector.extract_strided_slice %557 {offsets = [0, 64], sizes = [2, 64], strides = [1, 1]} : vector<2x256xf32> to vector<2x64xf32>
    %565 = arith.negf %564 : vector<2x64xf32>
    %566 = math.exp %565 : vector<2x64xf32>
    %cst_180 = arith.constant 1.000000e+00 : f32
    %567 = vector.broadcast %cst_180 : f32 to vector<2x64xf32>
    %568 = arith.addf %567, %566 : vector<2x64xf32>
    %569 = arith.divf %567, %568 : vector<2x64xf32>
    %570 = vector.extract_strided_slice %557 {offsets = [0, 128], sizes = [2, 64], strides = [1, 1]} : vector<2x256xf32> to vector<2x64xf32>
    %571 = math.tanh %570 : vector<2x64xf32>
    %572 = vector.extract_strided_slice %557 {offsets = [0, 192], sizes = [2, 64], strides = [1, 1]} : vector<2x256xf32> to vector<2x64xf32>
    %573 = arith.negf %572 : vector<2x64xf32>
    %574 = math.exp %573 : vector<2x64xf32>
    %cst_181 = arith.constant 1.000000e+00 : f32
    %575 = vector.broadcast %cst_181 : f32 to vector<2x64xf32>
    %576 = arith.addf %575, %574 : vector<2x64xf32>
    %577 = arith.divf %575, %576 : vector<2x64xf32>
    %578 = arith.mulf %569, %551 : vector<2x64xf32>
    %579 = arith.mulf %563, %571 : vector<2x64xf32>
    %580 = arith.addf %578, %579 : vector<2x64xf32>
    %581 = math.tanh %580 : vector<2x64xf32>
    %582 = arith.mulf %577, %581 : vector<2x64xf32>
    %c4_182 = arith.constant 4 : index
    %c0_183 = arith.constant 0 : index
    %583 = vector.load %arg19[%c4_182, %c0_183] : memref<16x64xf32, #tpu.memory_space<vmem>>, vector<2x64xf32>
    tpu.vector_store %arg19[%c4_182, %c0_183], %582 {strides = array<i32>} : memref<16x64xf32, #tpu.memory_space<vmem>>, vector<2x64xf32>,
    %c6_184 = arith.constant 6 : index
    %c0_185 = arith.constant 0 : index
    %584 = vector.load %arg16[%c6_184, %c0_185] : memref<16x256xf32, #tpu.memory_space<vmem>>, vector<2x256xf32>
    %cst_186 = arith.constant dense<0.000000e+00> : vector<2x256xf32>
    %585 = tpu.matmul %582, %494, %cst_186 {dimension_numbers = #tpu.dot_dimension_numbers<[1], [0], [0], [1], [0, 0, 1, 1], [], []>} : vector<2x64xf32>, vector<64x256xf32>, vector<2x256xf32> -> vector<2x256xf32>
    %586 = arith.addf %584, %585 : vector<2x256xf32>
    %587 = vector.extract_strided_slice %586 {offsets = [0, 0], sizes = [2, 64], strides = [1, 1]} : vector<2x256xf32> to vector<2x64xf32>
    %588 = arith.negf %587 : vector<2x64xf32>
    %589 = math.exp %588 : vector<2x64xf32>
    %cst_187 = arith.constant 1.000000e+00 : f32
    %590 = vector.broadcast %cst_187 : f32 to vector<2x64xf32>
    %591 = arith.addf %590, %589 : vector<2x64xf32>
    %592 = arith.divf %590, %591 : vector<2x64xf32>
    %593 = vector.extract_strided_slice %586 {offsets = [0, 64], sizes = [2, 64], strides = [1, 1]} : vector<2x256xf32> to vector<2x64xf32>
    %594 = arith.negf %593 : vector<2x64xf32>
    %595 = math.exp %594 : vector<2x64xf32>
    %cst_188 = arith.constant 1.000000e+00 : f32
    %596 = vector.broadcast %cst_188 : f32 to vector<2x64xf32>
    %597 = arith.addf %596, %595 : vector<2x64xf32>
    %598 = arith.divf %596, %597 : vector<2x64xf32>
    %599 = vector.extract_strided_slice %586 {offsets = [0, 128], sizes = [2, 64], strides = [1, 1]} : vector<2x256xf32> to vector<2x64xf32>
    %600 = math.tanh %599 : vector<2x64xf32>
    %601 = vector.extract_strided_slice %586 {offsets = [0, 192], sizes = [2, 64], strides = [1, 1]} : vector<2x256xf32> to vector<2x64xf32>
    %602 = arith.negf %601 : vector<2x64xf32>
    %603 = math.exp %602 : vector<2x64xf32>
    %cst_189 = arith.constant 1.000000e+00 : f32
    %604 = vector.broadcast %cst_189 : f32 to vector<2x64xf32>
    %605 = arith.addf %604, %603 : vector<2x64xf32>
    %606 = arith.divf %604, %605 : vector<2x64xf32>
    %607 = arith.mulf %598, %580 : vector<2x64xf32>
    %608 = arith.mulf %592, %600 : vector<2x64xf32>
    %609 = arith.addf %607, %608 : vector<2x64xf32>
    %610 = math.tanh %609 : vector<2x64xf32>
    %611 = arith.mulf %606, %610 : vector<2x64xf32>
    %c6_190 = arith.constant 6 : index
    %c0_191 = arith.constant 0 : index
    %612 = vector.load %arg19[%c6_190, %c0_191] : memref<16x64xf32, #tpu.memory_space<vmem>>, vector<2x64xf32>
    tpu.vector_store %arg19[%c6_190, %c0_191], %611 {strides = array<i32>} : memref<16x64xf32, #tpu.memory_space<vmem>>, vector<2x64xf32>,
    %c8_192 = arith.constant 8 : index
    %c0_193 = arith.constant 0 : index
    %613 = vector.load %arg16[%c8_192, %c0_193] : memref<16x256xf32, #tpu.memory_space<vmem>>, vector<2x256xf32>
    %cst_194 = arith.constant dense<0.000000e+00> : vector<2x256xf32>
    %614 = tpu.matmul %611, %494, %cst_194 {dimension_numbers = #tpu.dot_dimension_numbers<[1], [0], [0], [1], [0, 0, 1, 1], [], []>} : vector<2x64xf32>, vector<64x256xf32>, vector<2x256xf32> -> vector<2x256xf32>
    %615 = arith.addf %613, %614 : vector<2x256xf32>
    %616 = vector.extract_strided_slice %615 {offsets = [0, 0], sizes = [2, 64], strides = [1, 1]} : vector<2x256xf32> to vector<2x64xf32>
    %617 = arith.negf %616 : vector<2x64xf32>
    %618 = math.exp %617 : vector<2x64xf32>
    %cst_195 = arith.constant 1.000000e+00 : f32
    %619 = vector.broadcast %cst_195 : f32 to vector<2x64xf32>
    %620 = arith.addf %619, %618 : vector<2x64xf32>
    %621 = arith.divf %619, %620 : vector<2x64xf32>
    %622 = vector.extract_strided_slice %615 {offsets = [0, 64], sizes = [2, 64], strides = [1, 1]} : vector<2x256xf32> to vector<2x64xf32>
    %623 = arith.negf %622 : vector<2x64xf32>
    %624 = math.exp %623 : vector<2x64xf32>
    %cst_196 = arith.constant 1.000000e+00 : f32
    %625 = vector.broadcast %cst_196 : f32 to vector<2x64xf32>
    %626 = arith.addf %625, %624 : vector<2x64xf32>
    %627 = arith.divf %625, %626 : vector<2x64xf32>
    %628 = vector.extract_strided_slice %615 {offsets = [0, 128], sizes = [2, 64], strides = [1, 1]} : vector<2x256xf32> to vector<2x64xf32>
    %629 = math.tanh %628 : vector<2x64xf32>
    %630 = vector.extract_strided_slice %615 {offsets = [0, 192], sizes = [2, 64], strides = [1, 1]} : vector<2x256xf32> to vector<2x64xf32>
    %631 = arith.negf %630 : vector<2x64xf32>
    %632 = math.exp %631 : vector<2x64xf32>
    %cst_197 = arith.constant 1.000000e+00 : f32
    %633 = vector.broadcast %cst_197 : f32 to vector<2x64xf32>
    %634 = arith.addf %633, %632 : vector<2x64xf32>
    %635 = arith.divf %633, %634 : vector<2x64xf32>
    %636 = arith.mulf %627, %609 : vector<2x64xf32>
    %637 = arith.mulf %621, %629 : vector<2x64xf32>
    %638 = arith.addf %636, %637 : vector<2x64xf32>
    %639 = math.tanh %638 : vector<2x64xf32>
    %640 = arith.mulf %635, %639 : vector<2x64xf32>
    %c8_198 = arith.constant 8 : index
    %c0_199 = arith.constant 0 : index
    %641 = vector.load %arg19[%c8_198, %c0_199] : memref<16x64xf32, #tpu.memory_space<vmem>>, vector<2x64xf32>
    tpu.vector_store %arg19[%c8_198, %c0_199], %640 {strides = array<i32>} : memref<16x64xf32, #tpu.memory_space<vmem>>, vector<2x64xf32>,
    %c10_200 = arith.constant 10 : index
    %c0_201 = arith.constant 0 : index
    %642 = vector.load %arg16[%c10_200, %c0_201] : memref<16x256xf32, #tpu.memory_space<vmem>>, vector<2x256xf32>
    %cst_202 = arith.constant dense<0.000000e+00> : vector<2x256xf32>
    %643 = tpu.matmul %640, %494, %cst_202 {dimension_numbers = #tpu.dot_dimension_numbers<[1], [0], [0], [1], [0, 0, 1, 1], [], []>} : vector<2x64xf32>, vector<64x256xf32>, vector<2x256xf32> -> vector<2x256xf32>
    %644 = arith.addf %642, %643 : vector<2x256xf32>
    %645 = vector.extract_strided_slice %644 {offsets = [0, 0], sizes = [2, 64], strides = [1, 1]} : vector<2x256xf32> to vector<2x64xf32>
    %646 = arith.negf %645 : vector<2x64xf32>
    %647 = math.exp %646 : vector<2x64xf32>
    %cst_203 = arith.constant 1.000000e+00 : f32
    %648 = vector.broadcast %cst_203 : f32 to vector<2x64xf32>
    %649 = arith.addf %648, %647 : vector<2x64xf32>
    %650 = arith.divf %648, %649 : vector<2x64xf32>
    %651 = vector.extract_strided_slice %644 {offsets = [0, 64], sizes = [2, 64], strides = [1, 1]} : vector<2x256xf32> to vector<2x64xf32>
    %652 = arith.negf %651 : vector<2x64xf32>
    %653 = math.exp %652 : vector<2x64xf32>
    %cst_204 = arith.constant 1.000000e+00 : f32
    %654 = vector.broadcast %cst_204 : f32 to vector<2x64xf32>
    %655 = arith.addf %654, %653 : vector<2x64xf32>
    %656 = arith.divf %654, %655 : vector<2x64xf32>
    %657 = vector.extract_strided_slice %644 {offsets = [0, 128], sizes = [2, 64], strides = [1, 1]} : vector<2x256xf32> to vector<2x64xf32>
    %658 = math.tanh %657 : vector<2x64xf32>
    %659 = vector.extract_strided_slice %644 {offsets = [0, 192], sizes = [2, 64], strides = [1, 1]} : vector<2x256xf32> to vector<2x64xf32>
    %660 = arith.negf %659 : vector<2x64xf32>
    %661 = math.exp %660 : vector<2x64xf32>
    %cst_205 = arith.constant 1.000000e+00 : f32
    %662 = vector.broadcast %cst_205 : f32 to vector<2x64xf32>
    %663 = arith.addf %662, %661 : vector<2x64xf32>
    %664 = arith.divf %662, %663 : vector<2x64xf32>
    %665 = arith.mulf %656, %638 : vector<2x64xf32>
    %666 = arith.mulf %650, %658 : vector<2x64xf32>
    %667 = arith.addf %665, %666 : vector<2x64xf32>
    %668 = math.tanh %667 : vector<2x64xf32>
    %669 = arith.mulf %664, %668 : vector<2x64xf32>
    %c10_206 = arith.constant 10 : index
    %c0_207 = arith.constant 0 : index
    %670 = vector.load %arg19[%c10_206, %c0_207] : memref<16x64xf32, #tpu.memory_space<vmem>>, vector<2x64xf32>
    tpu.vector_store %arg19[%c10_206, %c0_207], %669 {strides = array<i32>} : memref<16x64xf32, #tpu.memory_space<vmem>>, vector<2x64xf32>,
    %c12_208 = arith.constant 12 : index
    %c0_209 = arith.constant 0 : index
    %671 = vector.load %arg16[%c12_208, %c0_209] : memref<16x256xf32, #tpu.memory_space<vmem>>, vector<2x256xf32>
    %cst_210 = arith.constant dense<0.000000e+00> : vector<2x256xf32>
    %672 = tpu.matmul %669, %494, %cst_210 {dimension_numbers = #tpu.dot_dimension_numbers<[1], [0], [0], [1], [0, 0, 1, 1], [], []>} : vector<2x64xf32>, vector<64x256xf32>, vector<2x256xf32> -> vector<2x256xf32>
    %673 = arith.addf %671, %672 : vector<2x256xf32>
    %674 = vector.extract_strided_slice %673 {offsets = [0, 0], sizes = [2, 64], strides = [1, 1]} : vector<2x256xf32> to vector<2x64xf32>
    %675 = arith.negf %674 : vector<2x64xf32>
    %676 = math.exp %675 : vector<2x64xf32>
    %cst_211 = arith.constant 1.000000e+00 : f32
    %677 = vector.broadcast %cst_211 : f32 to vector<2x64xf32>
    %678 = arith.addf %677, %676 : vector<2x64xf32>
    %679 = arith.divf %677, %678 : vector<2x64xf32>
    %680 = vector.extract_strided_slice %673 {offsets = [0, 64], sizes = [2, 64], strides = [1, 1]} : vector<2x256xf32> to vector<2x64xf32>
    %681 = arith.negf %680 : vector<2x64xf32>
    %682 = math.exp %681 : vector<2x64xf32>
    %cst_212 = arith.constant 1.000000e+00 : f32
    %683 = vector.broadcast %cst_212 : f32 to vector<2x64xf32>
    %684 = arith.addf %683, %682 : vector<2x64xf32>
    %685 = arith.divf %683, %684 : vector<2x64xf32>
    %686 = vector.extract_strided_slice %673 {offsets = [0, 128], sizes = [2, 64], strides = [1, 1]} : vector<2x256xf32> to vector<2x64xf32>
    %687 = math.tanh %686 : vector<2x64xf32>
    %688 = vector.extract_strided_slice %673 {offsets = [0, 192], sizes = [2, 64], strides = [1, 1]} : vector<2x256xf32> to vector<2x64xf32>
    %689 = arith.negf %688 : vector<2x64xf32>
    %690 = math.exp %689 : vector<2x64xf32>
    %cst_213 = arith.constant 1.000000e+00 : f32
    %691 = vector.broadcast %cst_213 : f32 to vector<2x64xf32>
    %692 = arith.addf %691, %690 : vector<2x64xf32>
    %693 = arith.divf %691, %692 : vector<2x64xf32>
    %694 = arith.mulf %685, %667 : vector<2x64xf32>
    %695 = arith.mulf %679, %687 : vector<2x64xf32>
    %696 = arith.addf %694, %695 : vector<2x64xf32>
    %697 = math.tanh %696 : vector<2x64xf32>
    %698 = arith.mulf %693, %697 : vector<2x64xf32>
    %c12_214 = arith.constant 12 : index
    %c0_215 = arith.constant 0 : index
    %699 = vector.load %arg19[%c12_214, %c0_215] : memref<16x64xf32, #tpu.memory_space<vmem>>, vector<2x64xf32>
    tpu.vector_store %arg19[%c12_214, %c0_215], %698 {strides = array<i32>} : memref<16x64xf32, #tpu.memory_space<vmem>>, vector<2x64xf32>,
    %c14_216 = arith.constant 14 : index
    %c0_217 = arith.constant 0 : index
    %700 = vector.load %arg16[%c14_216, %c0_217] : memref<16x256xf32, #tpu.memory_space<vmem>>, vector<2x256xf32>
    %cst_218 = arith.constant dense<0.000000e+00> : vector<2x256xf32>
    %701 = tpu.matmul %698, %494, %cst_218 {dimension_numbers = #tpu.dot_dimension_numbers<[1], [0], [0], [1], [0, 0, 1, 1], [], []>} : vector<2x64xf32>, vector<64x256xf32>, vector<2x256xf32> -> vector<2x256xf32>
    %702 = arith.addf %700, %701 : vector<2x256xf32>
    %703 = vector.extract_strided_slice %702 {offsets = [0, 0], sizes = [2, 64], strides = [1, 1]} : vector<2x256xf32> to vector<2x64xf32>
    %704 = arith.negf %703 : vector<2x64xf32>
    %705 = math.exp %704 : vector<2x64xf32>
    %cst_219 = arith.constant 1.000000e+00 : f32
    %706 = vector.broadcast %cst_219 : f32 to vector<2x64xf32>
    %707 = arith.addf %706, %705 : vector<2x64xf32>
    %708 = arith.divf %706, %707 : vector<2x64xf32>
    %709 = vector.extract_strided_slice %702 {offsets = [0, 64], sizes = [2, 64], strides = [1, 1]} : vector<2x256xf32> to vector<2x64xf32>
    %710 = arith.negf %709 : vector<2x64xf32>
    %711 = math.exp %710 : vector<2x64xf32>
    %cst_220 = arith.constant 1.000000e+00 : f32
    %712 = vector.broadcast %cst_220 : f32 to vector<2x64xf32>
    %713 = arith.addf %712, %711 : vector<2x64xf32>
    %714 = arith.divf %712, %713 : vector<2x64xf32>
    %715 = vector.extract_strided_slice %702 {offsets = [0, 128], sizes = [2, 64], strides = [1, 1]} : vector<2x256xf32> to vector<2x64xf32>
    %716 = math.tanh %715 : vector<2x64xf32>
    %717 = vector.extract_strided_slice %702 {offsets = [0, 192], sizes = [2, 64], strides = [1, 1]} : vector<2x256xf32> to vector<2x64xf32>
    %718 = arith.negf %717 : vector<2x64xf32>
    %719 = math.exp %718 : vector<2x64xf32>
    %cst_221 = arith.constant 1.000000e+00 : f32
    %720 = vector.broadcast %cst_221 : f32 to vector<2x64xf32>
    %721 = arith.addf %720, %719 : vector<2x64xf32>
    %722 = arith.divf %720, %721 : vector<2x64xf32>
    %723 = arith.mulf %714, %696 : vector<2x64xf32>
    %724 = arith.mulf %708, %716 : vector<2x64xf32>
    %725 = arith.addf %723, %724 : vector<2x64xf32>
    %726 = math.tanh %725 : vector<2x64xf32>
    %727 = arith.mulf %722, %726 : vector<2x64xf32>
    %c14_222 = arith.constant 14 : index
    %c0_223 = arith.constant 0 : index
    %728 = vector.load %arg19[%c14_222, %c0_223] : memref<16x64xf32, #tpu.memory_space<vmem>>, vector<2x64xf32>
    tpu.vector_store %arg19[%c14_222, %c0_223], %727 {strides = array<i32>} : memref<16x64xf32, #tpu.memory_space<vmem>>, vector<2x64xf32>,
    %c0_224 = arith.constant 0 : index
    %c0_225 = arith.constant 0 : index
    %729 = vector.load %arg10[%c0_224, %c0_225] : memref<128x256xf32, #tpu.memory_space<vmem>>, vector<64x256xf32>
    %cst_226 = arith.constant dense<0.000000e+00> : vector<16x256xf32>
    %730 = tpu.matmul %483, %729, %cst_226 {dimension_numbers = #tpu.dot_dimension_numbers<[1], [0], [0], [1], [0, 0, 1, 1], [], []>} : vector<16x64xf32>, vector<64x256xf32>, vector<16x256xf32> -> vector<16x256xf32>
    %c64_227 = arith.constant 64 : index
    %c0_228 = arith.constant 0 : index
    %731 = vector.load %arg10[%c64_227, %c0_228] : memref<128x256xf32, #tpu.memory_space<vmem>>, vector<64x256xf32>
    %cst_229 = arith.constant dense<0.000000e+00> : vector<16x256xf32>
    %732 = tpu.matmul %484, %731, %cst_229 {dimension_numbers = #tpu.dot_dimension_numbers<[1], [0], [0], [1], [0, 0, 1, 1], [], []>} : vector<16x64xf32>, vector<64x256xf32>, vector<16x256xf32> -> vector<16x256xf32>
    %733 = arith.addf %730, %732 : vector<16x256xf32>
    %c0_230 = arith.constant 0 : index
    %c0_231 = arith.constant 0 : index
    %734 = vector.load %arg12[%c0_230, %c0_231] : memref<1x256xf32, #tpu.memory_space<vmem>>, vector<1x256xf32>
    %735 = vector.broadcast %734 : vector<1x256xf32> to vector<16x256xf32>
    %736 = arith.addf %733, %735 : vector<16x256xf32>
    %c0_232 = arith.constant 0 : index
    %c0_233 = arith.constant 0 : index
    %737 = vector.load %arg16[%c0_232, %c0_233] : memref<16x256xf32, #tpu.memory_space<vmem>>, vector<16x256xf32>
    tpu.vector_store %arg16[%c0_232, %c0_233], %736 {strides = array<i32>} : memref<16x256xf32, #tpu.memory_space<vmem>>, vector<16x256xf32>,
    %c0_234 = arith.constant 0 : index
    %c0_235 = arith.constant 0 : index
    %738 = vector.load %arg11[%c0_234, %c0_235] : memref<64x256xf32, #tpu.memory_space<vmem>>, vector<64x256xf32>
    %cst_236 = arith.constant 0.000000e+00 : f32
    %739 = vector.broadcast %cst_236 : f32 to vector<2x64xf32>
    %cst_237 = arith.constant 0.000000e+00 : f32
    %740 = vector.broadcast %cst_237 : f32 to vector<2x64xf32>
    %c14_238 = arith.constant 14 : index
    %c0_239 = arith.constant 0 : index
    %741 = vector.load %arg16[%c14_238, %c0_239] : memref<16x256xf32, #tpu.memory_space<vmem>>, vector<2x256xf32>
    %cst_240 = arith.constant dense<0.000000e+00> : vector<2x256xf32>
    %742 = tpu.matmul %739, %738, %cst_240 {dimension_numbers = #tpu.dot_dimension_numbers<[1], [0], [0], [1], [0, 0, 1, 1], [], []>} : vector<2x64xf32>, vector<64x256xf32>, vector<2x256xf32> -> vector<2x256xf32>
    %743 = arith.addf %741, %742 : vector<2x256xf32>
    %744 = vector.extract_strided_slice %743 {offsets = [0, 0], sizes = [2, 64], strides = [1, 1]} : vector<2x256xf32> to vector<2x64xf32>
    %745 = arith.negf %744 : vector<2x64xf32>
    %746 = math.exp %745 : vector<2x64xf32>
    %cst_241 = arith.constant 1.000000e+00 : f32
    %747 = vector.broadcast %cst_241 : f32 to vector<2x64xf32>
    %748 = arith.addf %747, %746 : vector<2x64xf32>
    %749 = arith.divf %747, %748 : vector<2x64xf32>
    %750 = vector.extract_strided_slice %743 {offsets = [0, 64], sizes = [2, 64], strides = [1, 1]} : vector<2x256xf32> to vector<2x64xf32>
    %751 = arith.negf %750 : vector<2x64xf32>
    %752 = math.exp %751 : vector<2x64xf32>
    %cst_242 = arith.constant 1.000000e+00 : f32
    %753 = vector.broadcast %cst_242 : f32 to vector<2x64xf32>
    %754 = arith.addf %753, %752 : vector<2x64xf32>
    %755 = arith.divf %753, %754 : vector<2x64xf32>
    %756 = vector.extract_strided_slice %743 {offsets = [0, 128], sizes = [2, 64], strides = [1, 1]} : vector<2x256xf32> to vector<2x64xf32>
    %757 = math.tanh %756 : vector<2x64xf32>
    %758 = vector.extract_strided_slice %743 {offsets = [0, 192], sizes = [2, 64], strides = [1, 1]} : vector<2x256xf32> to vector<2x64xf32>
    %759 = arith.negf %758 : vector<2x64xf32>
    %760 = math.exp %759 : vector<2x64xf32>
    %cst_243 = arith.constant 1.000000e+00 : f32
    %761 = vector.broadcast %cst_243 : f32 to vector<2x64xf32>
    %762 = arith.addf %761, %760 : vector<2x64xf32>
    %763 = arith.divf %761, %762 : vector<2x64xf32>
    %764 = arith.mulf %755, %740 : vector<2x64xf32>
    %765 = arith.mulf %749, %757 : vector<2x64xf32>
    %766 = arith.addf %764, %765 : vector<2x64xf32>
    %767 = math.tanh %766 : vector<2x64xf32>
    %768 = arith.mulf %763, %767 : vector<2x64xf32>
    %c14_244 = arith.constant 14 : index
    %c0_245 = arith.constant 0 : index
    %769 = vector.load %arg20[%c14_244, %c0_245] : memref<16x64xf32, #tpu.memory_space<vmem>>, vector<2x64xf32>
    tpu.vector_store %arg20[%c14_244, %c0_245], %768 {strides = array<i32>} : memref<16x64xf32, #tpu.memory_space<vmem>>, vector<2x64xf32>,
    %c12_246 = arith.constant 12 : index
    %c0_247 = arith.constant 0 : index
    %770 = vector.load %arg16[%c12_246, %c0_247] : memref<16x256xf32, #tpu.memory_space<vmem>>, vector<2x256xf32>
    %cst_248 = arith.constant dense<0.000000e+00> : vector<2x256xf32>
    %771 = tpu.matmul %768, %738, %cst_248 {dimension_numbers = #tpu.dot_dimension_numbers<[1], [0], [0], [1], [0, 0, 1, 1], [], []>} : vector<2x64xf32>, vector<64x256xf32>, vector<2x256xf32> -> vector<2x256xf32>
    %772 = arith.addf %770, %771 : vector<2x256xf32>
    %773 = vector.extract_strided_slice %772 {offsets = [0, 0], sizes = [2, 64], strides = [1, 1]} : vector<2x256xf32> to vector<2x64xf32>
    %774 = arith.negf %773 : vector<2x64xf32>
    %775 = math.exp %774 : vector<2x64xf32>
    %cst_249 = arith.constant 1.000000e+00 : f32
    %776 = vector.broadcast %cst_249 : f32 to vector<2x64xf32>
    %777 = arith.addf %776, %775 : vector<2x64xf32>
    %778 = arith.divf %776, %777 : vector<2x64xf32>
    %779 = vector.extract_strided_slice %772 {offsets = [0, 64], sizes = [2, 64], strides = [1, 1]} : vector<2x256xf32> to vector<2x64xf32>
    %780 = arith.negf %779 : vector<2x64xf32>
    %781 = math.exp %780 : vector<2x64xf32>
    %cst_250 = arith.constant 1.000000e+00 : f32
    %782 = vector.broadcast %cst_250 : f32 to vector<2x64xf32>
    %783 = arith.addf %782, %781 : vector<2x64xf32>
    %784 = arith.divf %782, %783 : vector<2x64xf32>
    %785 = vector.extract_strided_slice %772 {offsets = [0, 128], sizes = [2, 64], strides = [1, 1]} : vector<2x256xf32> to vector<2x64xf32>
    %786 = math.tanh %785 : vector<2x64xf32>
    %787 = vector.extract_strided_slice %772 {offsets = [0, 192], sizes = [2, 64], strides = [1, 1]} : vector<2x256xf32> to vector<2x64xf32>
    %788 = arith.negf %787 : vector<2x64xf32>
    %789 = math.exp %788 : vector<2x64xf32>
    %cst_251 = arith.constant 1.000000e+00 : f32
    %790 = vector.broadcast %cst_251 : f32 to vector<2x64xf32>
    %791 = arith.addf %790, %789 : vector<2x64xf32>
    %792 = arith.divf %790, %791 : vector<2x64xf32>
    %793 = arith.mulf %784, %766 : vector<2x64xf32>
    %794 = arith.mulf %778, %786 : vector<2x64xf32>
    %795 = arith.addf %793, %794 : vector<2x64xf32>
    %796 = math.tanh %795 : vector<2x64xf32>
    %797 = arith.mulf %792, %796 : vector<2x64xf32>
    %c12_252 = arith.constant 12 : index
    %c0_253 = arith.constant 0 : index
    %798 = vector.load %arg20[%c12_252, %c0_253] : memref<16x64xf32, #tpu.memory_space<vmem>>, vector<2x64xf32>
    tpu.vector_store %arg20[%c12_252, %c0_253], %797 {strides = array<i32>} : memref<16x64xf32, #tpu.memory_space<vmem>>, vector<2x64xf32>,
    %c10_254 = arith.constant 10 : index
    %c0_255 = arith.constant 0 : index
    %799 = vector.load %arg16[%c10_254, %c0_255] : memref<16x256xf32, #tpu.memory_space<vmem>>, vector<2x256xf32>
    %cst_256 = arith.constant dense<0.000000e+00> : vector<2x256xf32>
    %800 = tpu.matmul %797, %738, %cst_256 {dimension_numbers = #tpu.dot_dimension_numbers<[1], [0], [0], [1], [0, 0, 1, 1], [], []>} : vector<2x64xf32>, vector<64x256xf32>, vector<2x256xf32> -> vector<2x256xf32>
    %801 = arith.addf %799, %800 : vector<2x256xf32>
    %802 = vector.extract_strided_slice %801 {offsets = [0, 0], sizes = [2, 64], strides = [1, 1]} : vector<2x256xf32> to vector<2x64xf32>
    %803 = arith.negf %802 : vector<2x64xf32>
    %804 = math.exp %803 : vector<2x64xf32>
    %cst_257 = arith.constant 1.000000e+00 : f32
    %805 = vector.broadcast %cst_257 : f32 to vector<2x64xf32>
    %806 = arith.addf %805, %804 : vector<2x64xf32>
    %807 = arith.divf %805, %806 : vector<2x64xf32>
    %808 = vector.extract_strided_slice %801 {offsets = [0, 64], sizes = [2, 64], strides = [1, 1]} : vector<2x256xf32> to vector<2x64xf32>
    %809 = arith.negf %808 : vector<2x64xf32>
    %810 = math.exp %809 : vector<2x64xf32>
    %cst_258 = arith.constant 1.000000e+00 : f32
    %811 = vector.broadcast %cst_258 : f32 to vector<2x64xf32>
    %812 = arith.addf %811, %810 : vector<2x64xf32>
    %813 = arith.divf %811, %812 : vector<2x64xf32>
    %814 = vector.extract_strided_slice %801 {offsets = [0, 128], sizes = [2, 64], strides = [1, 1]} : vector<2x256xf32> to vector<2x64xf32>
    %815 = math.tanh %814 : vector<2x64xf32>
    %816 = vector.extract_strided_slice %801 {offsets = [0, 192], sizes = [2, 64], strides = [1, 1]} : vector<2x256xf32> to vector<2x64xf32>
    %817 = arith.negf %816 : vector<2x64xf32>
    %818 = math.exp %817 : vector<2x64xf32>
    %cst_259 = arith.constant 1.000000e+00 : f32
    %819 = vector.broadcast %cst_259 : f32 to vector<2x64xf32>
    %820 = arith.addf %819, %818 : vector<2x64xf32>
    %821 = arith.divf %819, %820 : vector<2x64xf32>
    %822 = arith.mulf %813, %795 : vector<2x64xf32>
    %823 = arith.mulf %807, %815 : vector<2x64xf32>
    %824 = arith.addf %822, %823 : vector<2x64xf32>
    %825 = math.tanh %824 : vector<2x64xf32>
    %826 = arith.mulf %821, %825 : vector<2x64xf32>
    %c10_260 = arith.constant 10 : index
    %c0_261 = arith.constant 0 : index
    %827 = vector.load %arg20[%c10_260, %c0_261] : memref<16x64xf32, #tpu.memory_space<vmem>>, vector<2x64xf32>
    tpu.vector_store %arg20[%c10_260, %c0_261], %826 {strides = array<i32>} : memref<16x64xf32, #tpu.memory_space<vmem>>, vector<2x64xf32>,
    %c8_262 = arith.constant 8 : index
    %c0_263 = arith.constant 0 : index
    %828 = vector.load %arg16[%c8_262, %c0_263] : memref<16x256xf32, #tpu.memory_space<vmem>>, vector<2x256xf32>
    %cst_264 = arith.constant dense<0.000000e+00> : vector<2x256xf32>
    %829 = tpu.matmul %826, %738, %cst_264 {dimension_numbers = #tpu.dot_dimension_numbers<[1], [0], [0], [1], [0, 0, 1, 1], [], []>} : vector<2x64xf32>, vector<64x256xf32>, vector<2x256xf32> -> vector<2x256xf32>
    %830 = arith.addf %828, %829 : vector<2x256xf32>
    %831 = vector.extract_strided_slice %830 {offsets = [0, 0], sizes = [2, 64], strides = [1, 1]} : vector<2x256xf32> to vector<2x64xf32>
    %832 = arith.negf %831 : vector<2x64xf32>
    %833 = math.exp %832 : vector<2x64xf32>
    %cst_265 = arith.constant 1.000000e+00 : f32
    %834 = vector.broadcast %cst_265 : f32 to vector<2x64xf32>
    %835 = arith.addf %834, %833 : vector<2x64xf32>
    %836 = arith.divf %834, %835 : vector<2x64xf32>
    %837 = vector.extract_strided_slice %830 {offsets = [0, 64], sizes = [2, 64], strides = [1, 1]} : vector<2x256xf32> to vector<2x64xf32>
    %838 = arith.negf %837 : vector<2x64xf32>
    %839 = math.exp %838 : vector<2x64xf32>
    %cst_266 = arith.constant 1.000000e+00 : f32
    %840 = vector.broadcast %cst_266 : f32 to vector<2x64xf32>
    %841 = arith.addf %840, %839 : vector<2x64xf32>
    %842 = arith.divf %840, %841 : vector<2x64xf32>
    %843 = vector.extract_strided_slice %830 {offsets = [0, 128], sizes = [2, 64], strides = [1, 1]} : vector<2x256xf32> to vector<2x64xf32>
    %844 = math.tanh %843 : vector<2x64xf32>
    %845 = vector.extract_strided_slice %830 {offsets = [0, 192], sizes = [2, 64], strides = [1, 1]} : vector<2x256xf32> to vector<2x64xf32>
    %846 = arith.negf %845 : vector<2x64xf32>
    %847 = math.exp %846 : vector<2x64xf32>
    %cst_267 = arith.constant 1.000000e+00 : f32
    %848 = vector.broadcast %cst_267 : f32 to vector<2x64xf32>
    %849 = arith.addf %848, %847 : vector<2x64xf32>
    %850 = arith.divf %848, %849 : vector<2x64xf32>
    %851 = arith.mulf %842, %824 : vector<2x64xf32>
    %852 = arith.mulf %836, %844 : vector<2x64xf32>
    %853 = arith.addf %851, %852 : vector<2x64xf32>
    %854 = math.tanh %853 : vector<2x64xf32>
    %855 = arith.mulf %850, %854 : vector<2x64xf32>
    %c8_268 = arith.constant 8 : index
    %c0_269 = arith.constant 0 : index
    %856 = vector.load %arg20[%c8_268, %c0_269] : memref<16x64xf32, #tpu.memory_space<vmem>>, vector<2x64xf32>
    tpu.vector_store %arg20[%c8_268, %c0_269], %855 {strides = array<i32>} : memref<16x64xf32, #tpu.memory_space<vmem>>, vector<2x64xf32>,
    %c6_270 = arith.constant 6 : index
    %c0_271 = arith.constant 0 : index
    %857 = vector.load %arg16[%c6_270, %c0_271] : memref<16x256xf32, #tpu.memory_space<vmem>>, vector<2x256xf32>
    %cst_272 = arith.constant dense<0.000000e+00> : vector<2x256xf32>
    %858 = tpu.matmul %855, %738, %cst_272 {dimension_numbers = #tpu.dot_dimension_numbers<[1], [0], [0], [1], [0, 0, 1, 1], [], []>} : vector<2x64xf32>, vector<64x256xf32>, vector<2x256xf32> -> vector<2x256xf32>
    %859 = arith.addf %857, %858 : vector<2x256xf32>
    %860 = vector.extract_strided_slice %859 {offsets = [0, 0], sizes = [2, 64], strides = [1, 1]} : vector<2x256xf32> to vector<2x64xf32>
    %861 = arith.negf %860 : vector<2x64xf32>
    %862 = math.exp %861 : vector<2x64xf32>
    %cst_273 = arith.constant 1.000000e+00 : f32
    %863 = vector.broadcast %cst_273 : f32 to vector<2x64xf32>
    %864 = arith.addf %863, %862 : vector<2x64xf32>
    %865 = arith.divf %863, %864 : vector<2x64xf32>
    %866 = vector.extract_strided_slice %859 {offsets = [0, 64], sizes = [2, 64], strides = [1, 1]} : vector<2x256xf32> to vector<2x64xf32>
    %867 = arith.negf %866 : vector<2x64xf32>
    %868 = math.exp %867 : vector<2x64xf32>
    %cst_274 = arith.constant 1.000000e+00 : f32
    %869 = vector.broadcast %cst_274 : f32 to vector<2x64xf32>
    %870 = arith.addf %869, %868 : vector<2x64xf32>
    %871 = arith.divf %869, %870 : vector<2x64xf32>
    %872 = vector.extract_strided_slice %859 {offsets = [0, 128], sizes = [2, 64], strides = [1, 1]} : vector<2x256xf32> to vector<2x64xf32>
    %873 = math.tanh %872 : vector<2x64xf32>
    %874 = vector.extract_strided_slice %859 {offsets = [0, 192], sizes = [2, 64], strides = [1, 1]} : vector<2x256xf32> to vector<2x64xf32>
    %875 = arith.negf %874 : vector<2x64xf32>
    %876 = math.exp %875 : vector<2x64xf32>
    %cst_275 = arith.constant 1.000000e+00 : f32
    %877 = vector.broadcast %cst_275 : f32 to vector<2x64xf32>
    %878 = arith.addf %877, %876 : vector<2x64xf32>
    %879 = arith.divf %877, %878 : vector<2x64xf32>
    %880 = arith.mulf %871, %853 : vector<2x64xf32>
    %881 = arith.mulf %865, %873 : vector<2x64xf32>
    %882 = arith.addf %880, %881 : vector<2x64xf32>
    %883 = math.tanh %882 : vector<2x64xf32>
    %884 = arith.mulf %879, %883 : vector<2x64xf32>
    %c6_276 = arith.constant 6 : index
    %c0_277 = arith.constant 0 : index
    %885 = vector.load %arg20[%c6_276, %c0_277] : memref<16x64xf32, #tpu.memory_space<vmem>>, vector<2x64xf32>
    tpu.vector_store %arg20[%c6_276, %c0_277], %884 {strides = array<i32>} : memref<16x64xf32, #tpu.memory_space<vmem>>, vector<2x64xf32>,
    %c4_278 = arith.constant 4 : index
    %c0_279 = arith.constant 0 : index
    %886 = vector.load %arg16[%c4_278, %c0_279] : memref<16x256xf32, #tpu.memory_space<vmem>>, vector<2x256xf32>
    %cst_280 = arith.constant dense<0.000000e+00> : vector<2x256xf32>
    %887 = tpu.matmul %884, %738, %cst_280 {dimension_numbers = #tpu.dot_dimension_numbers<[1], [0], [0], [1], [0, 0, 1, 1], [], []>} : vector<2x64xf32>, vector<64x256xf32>, vector<2x256xf32> -> vector<2x256xf32>
    %888 = arith.addf %886, %887 : vector<2x256xf32>
    %889 = vector.extract_strided_slice %888 {offsets = [0, 0], sizes = [2, 64], strides = [1, 1]} : vector<2x256xf32> to vector<2x64xf32>
    %890 = arith.negf %889 : vector<2x64xf32>
    %891 = math.exp %890 : vector<2x64xf32>
    %cst_281 = arith.constant 1.000000e+00 : f32
    %892 = vector.broadcast %cst_281 : f32 to vector<2x64xf32>
    %893 = arith.addf %892, %891 : vector<2x64xf32>
    %894 = arith.divf %892, %893 : vector<2x64xf32>
    %895 = vector.extract_strided_slice %888 {offsets = [0, 64], sizes = [2, 64], strides = [1, 1]} : vector<2x256xf32> to vector<2x64xf32>
    %896 = arith.negf %895 : vector<2x64xf32>
    %897 = math.exp %896 : vector<2x64xf32>
    %cst_282 = arith.constant 1.000000e+00 : f32
    %898 = vector.broadcast %cst_282 : f32 to vector<2x64xf32>
    %899 = arith.addf %898, %897 : vector<2x64xf32>
    %900 = arith.divf %898, %899 : vector<2x64xf32>
    %901 = vector.extract_strided_slice %888 {offsets = [0, 128], sizes = [2, 64], strides = [1, 1]} : vector<2x256xf32> to vector<2x64xf32>
    %902 = math.tanh %901 : vector<2x64xf32>
    %903 = vector.extract_strided_slice %888 {offsets = [0, 192], sizes = [2, 64], strides = [1, 1]} : vector<2x256xf32> to vector<2x64xf32>
    %904 = arith.negf %903 : vector<2x64xf32>
    %905 = math.exp %904 : vector<2x64xf32>
    %cst_283 = arith.constant 1.000000e+00 : f32
    %906 = vector.broadcast %cst_283 : f32 to vector<2x64xf32>
    %907 = arith.addf %906, %905 : vector<2x64xf32>
    %908 = arith.divf %906, %907 : vector<2x64xf32>
    %909 = arith.mulf %900, %882 : vector<2x64xf32>
    %910 = arith.mulf %894, %902 : vector<2x64xf32>
    %911 = arith.addf %909, %910 : vector<2x64xf32>
    %912 = math.tanh %911 : vector<2x64xf32>
    %913 = arith.mulf %908, %912 : vector<2x64xf32>
    %c4_284 = arith.constant 4 : index
    %c0_285 = arith.constant 0 : index
    %914 = vector.load %arg20[%c4_284, %c0_285] : memref<16x64xf32, #tpu.memory_space<vmem>>, vector<2x64xf32>
    tpu.vector_store %arg20[%c4_284, %c0_285], %913 {strides = array<i32>} : memref<16x64xf32, #tpu.memory_space<vmem>>, vector<2x64xf32>,
    %c2_286 = arith.constant 2 : index
    %c0_287 = arith.constant 0 : index
    %915 = vector.load %arg16[%c2_286, %c0_287] : memref<16x256xf32, #tpu.memory_space<vmem>>, vector<2x256xf32>
    %cst_288 = arith.constant dense<0.000000e+00> : vector<2x256xf32>
    %916 = tpu.matmul %913, %738, %cst_288 {dimension_numbers = #tpu.dot_dimension_numbers<[1], [0], [0], [1], [0, 0, 1, 1], [], []>} : vector<2x64xf32>, vector<64x256xf32>, vector<2x256xf32> -> vector<2x256xf32>
    %917 = arith.addf %915, %916 : vector<2x256xf32>
    %918 = vector.extract_strided_slice %917 {offsets = [0, 0], sizes = [2, 64], strides = [1, 1]} : vector<2x256xf32> to vector<2x64xf32>
    %919 = arith.negf %918 : vector<2x64xf32>
    %920 = math.exp %919 : vector<2x64xf32>
    %cst_289 = arith.constant 1.000000e+00 : f32
    %921 = vector.broadcast %cst_289 : f32 to vector<2x64xf32>
    %922 = arith.addf %921, %920 : vector<2x64xf32>
    %923 = arith.divf %921, %922 : vector<2x64xf32>
    %924 = vector.extract_strided_slice %917 {offsets = [0, 64], sizes = [2, 64], strides = [1, 1]} : vector<2x256xf32> to vector<2x64xf32>
    %925 = arith.negf %924 : vector<2x64xf32>
    %926 = math.exp %925 : vector<2x64xf32>
    %cst_290 = arith.constant 1.000000e+00 : f32
    %927 = vector.broadcast %cst_290 : f32 to vector<2x64xf32>
    %928 = arith.addf %927, %926 : vector<2x64xf32>
    %929 = arith.divf %927, %928 : vector<2x64xf32>
    %930 = vector.extract_strided_slice %917 {offsets = [0, 128], sizes = [2, 64], strides = [1, 1]} : vector<2x256xf32> to vector<2x64xf32>
    %931 = math.tanh %930 : vector<2x64xf32>
    %932 = vector.extract_strided_slice %917 {offsets = [0, 192], sizes = [2, 64], strides = [1, 1]} : vector<2x256xf32> to vector<2x64xf32>
    %933 = arith.negf %932 : vector<2x64xf32>
    %934 = math.exp %933 : vector<2x64xf32>
    %cst_291 = arith.constant 1.000000e+00 : f32
    %935 = vector.broadcast %cst_291 : f32 to vector<2x64xf32>
    %936 = arith.addf %935, %934 : vector<2x64xf32>
    %937 = arith.divf %935, %936 : vector<2x64xf32>
    %938 = arith.mulf %929, %911 : vector<2x64xf32>
    %939 = arith.mulf %923, %931 : vector<2x64xf32>
    %940 = arith.addf %938, %939 : vector<2x64xf32>
    %941 = math.tanh %940 : vector<2x64xf32>
    %942 = arith.mulf %937, %941 : vector<2x64xf32>
    %c2_292 = arith.constant 2 : index
    %c0_293 = arith.constant 0 : index
    %943 = vector.load %arg20[%c2_292, %c0_293] : memref<16x64xf32, #tpu.memory_space<vmem>>, vector<2x64xf32>
    tpu.vector_store %arg20[%c2_292, %c0_293], %942 {strides = array<i32>} : memref<16x64xf32, #tpu.memory_space<vmem>>, vector<2x64xf32>,
    %c0_294 = arith.constant 0 : index
    %c0_295 = arith.constant 0 : index
    %944 = vector.load %arg16[%c0_294, %c0_295] : memref<16x256xf32, #tpu.memory_space<vmem>>, vector<2x256xf32>
    %cst_296 = arith.constant dense<0.000000e+00> : vector<2x256xf32>
    %945 = tpu.matmul %942, %738, %cst_296 {dimension_numbers = #tpu.dot_dimension_numbers<[1], [0], [0], [1], [0, 0, 1, 1], [], []>} : vector<2x64xf32>, vector<64x256xf32>, vector<2x256xf32> -> vector<2x256xf32>
    %946 = arith.addf %944, %945 : vector<2x256xf32>
    %947 = vector.extract_strided_slice %946 {offsets = [0, 0], sizes = [2, 64], strides = [1, 1]} : vector<2x256xf32> to vector<2x64xf32>
    %948 = arith.negf %947 : vector<2x64xf32>
    %949 = math.exp %948 : vector<2x64xf32>
    %cst_297 = arith.constant 1.000000e+00 : f32
    %950 = vector.broadcast %cst_297 : f32 to vector<2x64xf32>
    %951 = arith.addf %950, %949 : vector<2x64xf32>
    %952 = arith.divf %950, %951 : vector<2x64xf32>
    %953 = vector.extract_strided_slice %946 {offsets = [0, 64], sizes = [2, 64], strides = [1, 1]} : vector<2x256xf32> to vector<2x64xf32>
    %954 = arith.negf %953 : vector<2x64xf32>
    %955 = math.exp %954 : vector<2x64xf32>
    %cst_298 = arith.constant 1.000000e+00 : f32
    %956 = vector.broadcast %cst_298 : f32 to vector<2x64xf32>
    %957 = arith.addf %956, %955 : vector<2x64xf32>
    %958 = arith.divf %956, %957 : vector<2x64xf32>
    %959 = vector.extract_strided_slice %946 {offsets = [0, 128], sizes = [2, 64], strides = [1, 1]} : vector<2x256xf32> to vector<2x64xf32>
    %960 = math.tanh %959 : vector<2x64xf32>
    %961 = vector.extract_strided_slice %946 {offsets = [0, 192], sizes = [2, 64], strides = [1, 1]} : vector<2x256xf32> to vector<2x64xf32>
    %962 = arith.negf %961 : vector<2x64xf32>
    %963 = math.exp %962 : vector<2x64xf32>
    %cst_299 = arith.constant 1.000000e+00 : f32
    %964 = vector.broadcast %cst_299 : f32 to vector<2x64xf32>
    %965 = arith.addf %964, %963 : vector<2x64xf32>
    %966 = arith.divf %964, %965 : vector<2x64xf32>
    %967 = arith.mulf %958, %940 : vector<2x64xf32>
    %968 = arith.mulf %952, %960 : vector<2x64xf32>
    %969 = arith.addf %967, %968 : vector<2x64xf32>
    %970 = math.tanh %969 : vector<2x64xf32>
    %971 = arith.mulf %966, %970 : vector<2x64xf32>
    %c0_300 = arith.constant 0 : index
    %c0_301 = arith.constant 0 : index
    %972 = vector.load %arg20[%c0_300, %c0_301] : memref<16x64xf32, #tpu.memory_space<vmem>>, vector<2x64xf32>
    tpu.vector_store %arg20[%c0_300, %c0_301], %971 {strides = array<i32>} : memref<16x64xf32, #tpu.memory_space<vmem>>, vector<2x64xf32>,
    %c0_302 = arith.constant 0 : index
    %c0_303 = arith.constant 0 : index
    %973 = vector.load %arg19[%c0_302, %c0_303] : memref<16x64xf32, #tpu.memory_space<vmem>>, vector<16x64xf32>
    %c0_304 = arith.constant 0 : index
    %c0_305 = arith.constant 0 : index
    %974 = vector.load %arg13[%c0_304, %c0_305] : memref<128x100xf32, #tpu.memory_space<vmem>>, vector<64x100xf32>
    %cst_306 = arith.constant dense<0.000000e+00> : vector<16x100xf32>
    %975 = tpu.matmul %973, %974, %cst_306 {dimension_numbers = #tpu.dot_dimension_numbers<[1], [0], [0], [1], [0, 0, 1, 1], [], []>} : vector<16x64xf32>, vector<64x100xf32>, vector<16x100xf32> -> vector<16x100xf32>
    %c0_307 = arith.constant 0 : index
    %c0_308 = arith.constant 0 : index
    %976 = vector.load %arg20[%c0_307, %c0_308] : memref<16x64xf32, #tpu.memory_space<vmem>>, vector<16x64xf32>
    %c64_309 = arith.constant 64 : index
    %c0_310 = arith.constant 0 : index
    %977 = vector.load %arg13[%c64_309, %c0_310] : memref<128x100xf32, #tpu.memory_space<vmem>>, vector<64x100xf32>
    %cst_311 = arith.constant dense<0.000000e+00> : vector<16x100xf32>
    %978 = tpu.matmul %976, %977, %cst_311 {dimension_numbers = #tpu.dot_dimension_numbers<[1], [0], [0], [1], [0, 0, 1, 1], [], []>} : vector<16x64xf32>, vector<64x100xf32>, vector<16x100xf32> -> vector<16x100xf32>
    %979 = arith.addf %975, %978 : vector<16x100xf32>
    %c0_312 = arith.constant 0 : index
    %c0_313 = arith.constant 0 : index
    %980 = vector.load %arg14[%c0_312, %c0_313] : memref<1x100xf32, #tpu.memory_space<vmem>>, vector<1x100xf32>
    %981 = vector.broadcast %980 : vector<1x100xf32> to vector<16x100xf32>
    %982 = arith.addf %979, %981 : vector<16x100xf32>
    %c0_314 = arith.constant 0 : index
    %c0_315 = arith.constant 0 : index
    %983 = vector.load %arg15[%c0_314, %c0_315] : memref<16x100xf32, #tpu.memory_space<vmem>>, vector<16x100xf32>
    tpu.vector_store %arg15[%c0_314, %c0_315], %982 {strides = array<i32>} : memref<16x100xf32, #tpu.memory_space<vmem>>, vector<16x100xf32>,
    return
  }
}

</mosaic_0001>

<bundles_post_ra>
// kernel: tpu_custom_call.1
= control target key start
LH: loop header
LB: loop body
LE: loop exit
PB: predicated region body
PF: predicated region fallthrough
CT: control target
= control target key end

     0   :  { %20 = vsyncpa [#allocation8], 0  ;;  %s6692_s0 = inlined_call_operand.hbm [shape: f32[16,20], index: 0, kind: input, shape index: {}]   ;;  %s6693_s1 = inlined_call_operand.vmem [shape: f32[20,256], index: 1, kind: input, shape index: {}]   ;;  %s6694_s2 = inlined_call_operand.vmem [shape: f32[64,256], index: 2, kind: input, shape index: {}]   ;;  %s6695_s3 = inlined_call_operand.vmem [shape: f32[1,256], index: 3, kind: input, shape index: {}]   ;;  %s6696_s4 = inlined_call_operand.vmem [shape: f32[20,256], index: 4, kind: input, shape index: {}]   ;;  %s6697_s5 = inlined_call_operand.hbm [shape: f32[64,256], index: 5, kind: input, shape index: {}]   ;;  %s6698_s6 = inlined_call_operand.vmem [shape: f32[1,256], index: 6, kind: input, shape index: {}]   ;;  %s6699_s7 = inlined_call_operand.hbm [shape: f32[128,256], index: 7, kind: input, shape index: {}]   ;;  %s6700_s8 = inlined_call_operand.hbm [shape: f32[64,256], index: 8, kind: input, shape index: {}]   ;;  %s6701_s9 = inlined_call_operand.vmem [shape: f32[1,256], index: 9, kind: input, shape index: {}]   ;;  %s6702_s10 = inlined_call_operand.hbm [shape: f32[128,256], index: 10, kind: input, shape index: {}]   ;;  %s6703_s11 = inlined_call_operand.hbm [shape: f32[64,256], index: 11, kind: input, shape index: {}]   ;;  %s6704_s12 = inlined_call_operand.vmem [shape: f32[1,256], index: 12, kind: input, shape index: {}]   ;;  %s6705_s13 = inlined_call_operand.vmem [shape: f32[128,100], index: 13, kind: input, shape index: {}]   ;;  %s6706_s14 = inlined_call_operand.vmem [shape: f32[1,100], index: 14, kind: input, shape index: {}]   ;;  %s6707_s15 = inlined_call_operand.hbm [shape: f32[16,100], index: 15, kind: output, shape index: {}]  }
   0x1   :  { %21 = vsyncpa [#allocation11], 0 }
   0x2   :  { %22 = vsyncpa [#allocation14], 0 }
   0x3   :  { %23 = vsyncpa [#allocation17], 0 }
   0x4   :  { %24 = vsyncpa [#allocation9], 0  ;;  %s5400_s18 = smov [#allocation10]  }
   0x5   :  { %s50_s19 = sshll.u32 %s5400_s18, 4  ;;  %s51_s19 = int_to_ptr.vmem [resolvable:$true] %s50_s19 }
   0x6   :  { %s5258_s20 = scalar_lea.vmem %s51_s19, 2048  ;;  %p5263_p1 = scmp.lt.s32.totalorder %s51_s19, %s51_s19 }
   0x7   :  { %p5259_p0 = scmp.ne.s32.totalorder %s51_s19, %s5258_s20  ;;  %p5264_p2 = scmp.lt.s32.totalorder %s5258_s20, %s5258_s20 }
   0x9   :  { %p5265_p3 = por %p5264_p2, %p5263_p1 }
   0xb   :  { %p5266_p4 = pnand %p5265_p3, %p5259_p0 }
   0xd   :  { %5269 = shalt.err (!%p5266_p4)
}
   0xe   :  { %s5401_s21 = smov 256   ;;  %s5402_s22 = smov 16  }
   0xf   :  { %56 = dma.hbm_to_vmem [thread:$0]  %s6697_s5, 2048, %s51_s19, [#allocation11], %s5401_s21, %s5401_s21, %s5402_s22  }
  0x10   :  { %s5403_s25 = smov [#allocation13]   ;;  %s5404_s27 = smov [#allocation7]  }
  0x11   :  { %s76_s26 = sshll.u32 %s5403_s25, 4  ;;  %s30_s28 = sshll.u32 %s5404_s27, 4  ;;  %s77_s26 = int_to_ptr.vmem [resolvable:$true] %s76_s26  ;;  %s31_s28 = int_to_ptr.vmem [resolvable:$true] %s30_s28 }
  0x12   :  { %s5278_s29 = scalar_lea.vmem %s77_s26, 2048  ;;  %p5283_p6 = scmp.lt.s32.totalorder %s77_s26, %s77_s26 }
  0x13   :  { %p5279_p5 = scmp.ne.s32.totalorder %s77_s26, %s5278_s29  ;;  %p5284_p7 = scmp.lt.s32.totalorder %s5278_s29, %s5278_s29 }
  0x15   :  { %p5285_p8 = por %p5284_p7, %p5283_p6 }
  0x17   :  { %p5286_p9 = pnand %p5285_p8, %p5279_p5 }
  0x19   :  { %5289 = shalt.err (!%p5286_p9)
}
  0x1a   :  { %82 = dma.hbm_to_vmem [thread:$0]  %s6700_s8, 2048, %s77_s26, [#allocation14], %s5401_s21, %s5401_s21, %s5402_s22  }
  0x1b   :  { %s5298_s5 = scalar_lea.vmem %s31_s28, 256  ;;  %p5303_p11 = scmp.lt.s32.totalorder %s31_s28, %s31_s28 }
  0x1c   :  { %p5299_p10 = scmp.ne.s32.totalorder %s31_s28, %s5298_s5  ;;  %p5304_p12 = scmp.lt.s32.totalorder %s5298_s5, %s5298_s5 }
  0x1e   :  { %p5305_p13 = por %p5304_p12, %p5303_p11 }
  0x20   :  { %p5306_p0 = pnand %p5305_p13, %p5299_p10 }
  0x22   :  { %5309 = shalt.err (!%p5306_p0)
}
  0x23   :  { %s5405_s17 = smov 128   ;;  %s5406_s18 = smov 8  }
  0x24   :  { %36 = dma.hbm_to_vmem [thread:$0]  %s6692_s0, 256, %s31_s28, [#allocation8], %s5405_s17, %s5405_s17, %s5406_s18  }
  0x25   :  { %s5407_s23 = smov [#allocation12]   ;;  %s5408_s8 = smov [#allocation15]  }
  0x26   :  { %s64_s24 = sshll.u32 %s5407_s23, 4  ;;  %s90_s25 = sshll.u32 %s5408_s8, 4  ;;  %s65_s24 = int_to_ptr.vmem [resolvable:$true] %s64_s24  ;;  %s91_s25 = int_to_ptr.vmem [resolvable:$true] %s90_s25 }
  0x27   :  { %s5318_s26 = scalar_lea.vmem %s65_s24, 4096  ;;  %p5323_p2 = scmp.lt.s32.totalorder %s65_s24, %s65_s24 }
  0x28   :  { %p5319_p1 = scmp.ne.s32.totalorder %s65_s24, %s5318_s26  ;;  %p5324_p3 = scmp.lt.s32.totalorder %s5318_s26, %s5318_s26 }
  0x2a   :  { %p5325_p4 = por %p5324_p3, %p5323_p2 }
  0x2c   :  { %p5326_p5 = pnand %p5325_p4, %p5319_p1 }
  0x2e   :  { %5329 = shalt.err (!%p5326_p5)
}
  0x2f   :  { %70 = dma.hbm_to_vmem [thread:$0]  %s6699_s7, 4096, %s65_s24, [#allocation11], %s5401_s21, %s5401_s21, %s5402_s22  }
  0x30   :  { %s5338_s0 = scalar_lea.vmem %s91_s25, 4096  ;;  %p5343_p7 = scmp.lt.s32.totalorder %s91_s25, %s91_s25 }
  0x31   :  { %p5339_p6 = scmp.ne.s32.totalorder %s91_s25, %s5338_s0  ;;  %p5344_p8 = scmp.lt.s32.totalorder %s5338_s0, %s5338_s0 }
  0x33   :  { %p5345_p9 = por %p5344_p8, %p5343_p7 }
  0x35   :  { %p5346_p10 = pnand %p5345_p9, %p5339_p6 }
  0x37   :  { %5349 = shalt.err (!%p5346_p10)
}
  0x38   :  { %96 = dma.hbm_to_vmem [thread:$0]  %s6702_s10, 4096, %s91_s25, [#allocation14], %s5401_s21, %s5401_s21, %s5402_s22  }
  0x39   :  { %s5409_s16 = smov [#allocation16]  }
  0x3a   :  { %s102_s5 = sshll.u32 %s5409_s16, 4  ;;  %s103_s5 = int_to_ptr.vmem [resolvable:$true] %s102_s5 }
  0x3b   :  { %s5358_s19 = scalar_lea.vmem %s103_s5, 2048  ;;  %p5363_p12 = scmp.lt.s32.totalorder %s103_s5, %s103_s5 }
  0x3c   :  { %p5359_p11 = scmp.ne.s32.totalorder %s103_s5, %s5358_s19  ;;  %p5364_p13 = scmp.lt.s32.totalorder %s5358_s19, %s5358_s19 }
  0x3e   :  { %p5365_p0 = por %p5364_p13, %p5363_p12 }
  0x40   :  { %p5366_p1 = pnand %p5365_p0, %p5359_p11 }
  0x42   :  { %5369 = shalt.err (!%p5366_p1)
}
  0x43   :  { %108 = dma.hbm_to_vmem [thread:$0]  %s6703_s11, 2048, %s103_s5, [#allocation17], %s5401_s21, %s5401_s21, %s5402_s22  }
  0x44   :  { %5390 = dma.done.wait [#allocation8], 256  }
  0x45   :  { %5391 = vsyncadd [#allocation8], 4294967040 }
  0x46   :  { %5392 = dma.done.wait [#allocation11], 6144  }
  0x47   :  { %5393 = vsyncadd [#allocation11], 4294961152 }
  0x48   :  { %5394 = dma.done.wait [#allocation14], 6144  }
  0x49   :  { %5395 = vsyncadd [#allocation14], 4294961152 }
  0x4a   :  { %5396 = dma.done.wait [#allocation17], 2048  }
  0x4b   :  { %5397 = vsyncadd [#allocation17], 4294965248  ;;  %v5410_v0 = vmov 0.0   ;;  %vm160_vm0 = vcmask 1043456   ;;  %v140_v1 = vld [vmem:[%s6693_s1 + $0x28] sm:$0xf]  ;;  %v143_v24 = vlaneseq }
  0x4c   :  { %231 = vmatprep.mubr.f32.mxu0 %v5410_v0  ;;  %334 = vmatprep.mubr.f32.mxu1 %v5410_v0  ;;  %v5537_v2 = vld [vmem:[%s6694_s2 + $0x78] sm:$0xff]  ;;  %v139_v3 = vld [vmem:[%s6693_s1 + $0x20] sm:$0xf]  ;;  %v5547_v4 = vld [vmem:[%s6694_s2 + $0x70] sm:$0xff]  ;;  %vm153_vm1 = vcmask 162816   ;;  %vm369_vm2 = vcmask 517120  }
  0x4d   :  { %4681 = vmatprep.subr.msk.mxu0 %vm160_vm0, %v140_v1  ;;  %286 = vmatprep.subr.mxu1 %v5537_v2  ;;  %v138_v5 = vld [vmem:[%s6693_s1 + $0x18] sm:$0xff]  ;;  %v5555_v6 = vld [vmem:[%s6694_s2 + $0x68] sm:$0xff]  ;;  %v137_v7 = vld [vmem:[%s6693_s1 + $0x10] sm:$0xff]  ;;  %v144_v25 = vshrl.u32 %v143_v24, 7  ;;  %vm266_vm3 = vcmask 523264   ;;  %vm717_vm4 = vcmask 523270  }
  0x4e   :  { %4682 = vmatpush1.msk.msra.mxu0 %vm160_vm0, %v139_v3  ;;  %287 = vmatpush1.msra.mxu1 %v5547_v4  ;;  %v5565_v8 = vld [vmem:[%s6694_s2 + $0x60] sm:$0xff]  ;;  %v136_v9 = vld [vmem:[%s6693_s1 + $0x8] sm:$0xff]  ;;  %v5574_v10 = vld [vmem:[%s6694_s2 + $0x58] sm:$0xff]  ;;  %vm483_vm5 = vcmask 519170   ;;  %vm600_vm6 = vcmask 521220   ;;  %vm4658_vm7 = vcmask 818176  }
  0x4f   :  { %195 = vmatprep.subr.mxu0 %v138_v5  ;;  %288 = vmatprep.subr.mxu1 %v5555_v6  ;;  %v135_v11 = vld [vmem:[%s6693_s1] sm:$0xff]  ;;  %v5582_v12 = vld [vmem:[%s6694_s2 + $0x50] sm:$0xff]  ;;  %v5590_v14 = vld [vmem:[%s6694_s2 + $0x48] sm:$0xff]  ;;  %v5688_v26 = vsub.s32 0, %v144_v25  ;;  %v5693_v28 = vsub.s32 1, %v144_v25 }
  0x50   :  { %196 = vmatpush1.msra.mxu0 %v137_v7  ;;  %289 = vmatpush1.msra.mxu1 %v5565_v8  ;;  %v5585_v13 = vld [vmem:[#allocation7] sm:$0xff]  ;;  %v5602_v16 = vld [vmem:[%s6694_s2 + $0x38] sm:$0xff]  ;;  %v5610_v17 = vld [vmem:[%s6694_s2 + $0x30] sm:$0xff] }
  0x51   :  { %197 = vmatprep.subr.mxu0 %v136_v9  ;;  %290 = vmatprep.subr.mxu1 %v5574_v10  ;;  %v5596_v15 = vld [vmem:[%s6694_s2 + $0x40] sm:$0xff]  ;;  %v5616_v18 = vld [vmem:[%s6694_s2 + $0x28] sm:$0xff]  ;;  %v5630_v20 = vld [vmem:[%s6694_s2 + $0x18] sm:$0xff] }
  0x52   :  { %198 = vmatpush1.msra.mxu0 %v135_v11  ;;  %291 = vmatpush1.msra.mxu1 %v5582_v12  ;;  %v5623_v19 = vld [vmem:[%s6694_s2 + $0x20] sm:$0xff]  ;;  %v5637_v21 = vld [vmem:[%s6694_s2 + $0x10] sm:$0xff]  ;;  %v5644_v22 = vld [vmem:[%s6694_s2 + $0x8] sm:$0xff] }
  0x53   :  { %4683 = vmatmul.mubr.msk.f32.vlgmr.msra.gmra.mxu0 %vm153_vm1, %v5585_v13  ;;  %292 = vmatprep.subr.mxu1 %v5590_v14  ;;  %v5651_v23 = vld [vmem:[%s6694_s2] sm:$0xff]  ;;  %v5698_v47 = vld [vmem:[#allocation7 + $0x8] sm:$0xff] }
  0x54   :  { %293 = vmatpush1.msra.mxu1 %v5596_v15  ;;  %391 = vmatprep.subr.mxu0 %v5537_v2  ;;  %v141_v27 = vld [vmem:[%s6695_s3] sm:$0x3]  ;;  %s5411_s3 = smov 64  }
  0x55   :  { %294 = vmatprep.subr.mxu1 %v5602_v16  ;;  %392 = vmatpush1.msra.mxu0 %v5547_v4  ;;  %v146_v29 = vrot.slane %v141_v27, %v5688_v26  ;;  %v150_v30 = vrot.slane %v141_v27, %v5693_v28 }
  0x56   :  { %295 = vmatpush1.msra.mxu1 %v5610_v17  ;;  %393 = vmatprep.subr.mxu0 %v5555_v6 }
  0x57   :  { %296 = vmatprep.subr.mxu1 %v5616_v18  ;;  %394 = vmatpush1.msra.mxu0 %v5565_v8 }
  0x58   :  { %297 = vmatpush1.msra.mxu1 %v5623_v19  ;;  %395 = vmatprep.subr.mxu0 %v5574_v10 }
  0x59   :  { %298 = vmatprep.subr.mxu1 %v5630_v20  ;;  %396 = vmatpush1.msra.mxu0 %v5582_v12 }
  0x5a   :  { %299 = vmatpush1.msra.mxu1 %v5637_v21  ;;  %397 = vmatprep.subr.mxu0 %v5590_v14 }
  0x5b   :  { %300 = vmatprep.subr.mxu1 %v5644_v22  ;;  %398 = vmatpush1.msra.mxu0 %v5596_v15 }
  0x5c   :  { %301 = vmatpush1.msra.mxu1 %v5651_v23  ;;  %399 = vmatprep.subr.mxu0 %v5602_v16 }
  0x5d   :  { %335 = vmatmul.mubr.f32.vlgmr.msra.gmra.mxu1 %v5410_v0  ;;  %237 = vmatprep.mubr.f32.mxu0 %v5410_v0 }
  0x5e   :  { %400 = vmatpush1.msra.mxu0 %v5610_v17  ;;  %508 = vmatprep.subr.mxu1 %v5537_v2 }
  0x5f   :  { %401 = vmatprep.subr.mxu0 %v5616_v18  ;;  %509 = vmatpush1.msra.mxu1 %v5547_v4 }
  0x60   :  { %402 = vmatpush1.msra.mxu0 %v5623_v19  ;;  %510 = vmatprep.subr.mxu1 %v5555_v6 }
  0x61   :  { %403 = vmatprep.subr.mxu0 %v5630_v20  ;;  %511 = vmatpush1.msra.mxu1 %v5565_v8 }
  0x62   :  { %404 = vmatpush1.msra.mxu0 %v5637_v21  ;;  %512 = vmatprep.subr.mxu1 %v5574_v10 }
  0x63   :  { %405 = vmatprep.subr.mxu0 %v5644_v22  ;;  %513 = vmatpush1.msra.mxu1 %v5582_v12 }
  0x64   :  { %406 = vmatpush1.msra.mxu0 %v5651_v23  ;;  %514 = vmatprep.subr.mxu1 %v5590_v14 }
  0x65   :  { %515 = vmatpush1.msra.mxu1 %v5596_v15  ;;  %556 = vmatprep.mubr.f32.mxu1 %v5410_v0 }
  0x66   :  { %516 = vmatprep.subr.mxu1 %v5602_v16  ;;  %625 = vmatprep.subr.mxu0 %v5537_v2 }
  0x67   :  { %517 = vmatpush1.msra.mxu1 %v5610_v17  ;;  %4684 = vmatmul.mubr.msk.f32.gmra.mxu0 %vm153_vm1, %v5698_v47 }
  0x68   :  { %518 = vmatprep.subr.mxu1 %v5616_v18  ;;  %439 = vmatprep.mubr.f32.mxu0 %v5410_v0 }
  0x69   :  { %519 = vmatpush1.msra.mxu1 %v5623_v19 }
  0x6a   :  { %520 = vmatprep.subr.mxu1 %v5630_v20 }
  0x6b   :  { %521 = vmatpush1.msra.mxu1 %v5637_v21 }
  0x6c   :  { %522 = vmatprep.subr.mxu1 %v5644_v22 }
  0x6d   :  { %523 = vmatpush1.msra.mxu1 %v5651_v23 }
  0x6e   :  { %742 = vmatprep.subr.mxu1 %v5537_v2 }
 0x113   :  { %v233_v31 = vpop.f32.mrf.mxu0 }
 0x114   :  { %v234_v32 = vadd.f32 %v233_v31, %v146_v29 }
 0x115   :  { %v235_v33 = vpop.f32.mrf.mxu0 }
 0x116   :  { %244 = vst [vmem:[#allocation2 + $0x10] sm:$0xff] %v234_v32  ;;  %v236_v34 = vadd.f32 %v235_v33, %v150_v30 }
 0x118   :  { %245 = vst [vmem:[#allocation2] sm:$0xff] %v236_v34 }
 0x11d   :  { %v264_v35 = vld [vmem:[#allocation2 + $0x10] sm:$0x3]  ;;  %v336_v36 = vpop.f32.mrf.mxu1  ;;  %v371_v1 = vld [vmem:[#allocation2 + $0x10] sm:$0xc] }
 0x11e   :  { %v341_v37 = vadd.f32 %v336_v36, %v264_v35 }
 0x11f   :  { %v265_v39 = vld [vmem:[#allocation2] sm:$0x3]  ;;  %v338_v40 = vpop.f32.mrf.mxu1  ;;  %v372_v11 = vld [vmem:[#allocation2] sm:$0xc] }
 0x120   :  { %v4685_v38 = vmul.f32 -1.442695, %v341_v37  ;;  %v342_v41 = vadd.f32 %v338_v40, %v265_v39 }
 0x122   :  { %4865 = vpow2.f32 %v4685_v38  ;;  %v4686_v48 = vmul.f32 -1.442695, %v342_v41 }
 0x123   :  { %4867 = vtanh.f32 %v342_v41 }
 0x127   :  { %v239_v57 = vpop.f32.mrf.mxu0 }
 0x128   :  { %v240_v58 = vadd.f32 %v239_v57, %v146_v29 }
 0x129   :  { %v241_v59 = vpop.f32.mrf.mxu0 }
 0x12a   :  { %246 = vst [vmem:[#allocation2 + $0x18] sm:$0xff] %v240_v58  ;;  %v242_v60 = vadd.f32 %v241_v59, %v150_v30 }
 0x12c   :  { %247 = vst [vmem:[#allocation2 + $0x8] sm:$0xff] %v242_v60 }
 0x12f   :  { %v4866_v42 = vpop.eup %4865 }
 0x130   :  { %v346_v43 = vadd.f32 1.0, %v4866_v42  ;;  %v4868_v44 = vpop.eup %4867 }
 0x132   :  { %4869 = vrcp.f32 %v346_v43 }
 0x133   :  { %4871 = vpow2.f32 %v4686_v48 }
 0x13f   :  { %v4870_v45 = vpop.eup %4869 }
 0x140   :  { %v357_v46 = vmul.f32 %v4870_v45, %v4868_v44  ;;  %v4872_v49 = vpop.eup %4871  ;;  %v356_v51 = vmul.f32 0.0, %v4870_v45 }
 0x141   :  { %v353_v50 = vadd.f32 1.0, %v4872_v49 }
 0x142   :  { %359 = vrot.lane.b32.xlu0 %v357_v46, %s5411_s3  ;;  %v485_v46 = vld [vmem:[#allocation2 + $0x10] sm:$0x30] }
 0x143   :  { %4873 = vrcp.f32 %v353_v50 }
 0x150   :  { %v4874_v54 = vpop.eup %4873 }
 0x1b4   :  { %v360_v52 = vpop.permute.xlu0 %359 }
 0x1b5   :  { %v362_v53 = vadd.f32 %v360_v52, %v356_v51  ;;  %v486_v52 = vld [vmem:[#allocation2] sm:$0x30] }
 0x1b7   :  { %4875 = vtanh.f32 %v362_v53  ;;  %v468_v30 = vrot.slane %v362_v53, 6 }
 0x1c4   :  { %v4876_v55 = vpop.eup %4875 }
 0x1c5   :  { %v364_v56 = vmul.f32 %v4876_v55, %v4874_v54 }
 0x1c7   :  { %366 = vrot.lane.b32.xlu0 %v364_v56, %s5411_s3 }
 0x239   :  { %v367_v61 = vpop.permute.xlu0 %366 }
 0x23a   :  { %370 = vst.msk [vmem:[#allocation3] sm:$0x3] %vm369_vm2, %v367_v61  ;;  %4687 = vmatmul.mubr.msk.f32.vlgmr.msra.gmra.mxu0 %vm266_vm3, %v367_v61 }
 0x23b   :  { %626 = vmatpush1.msra.mxu0 %v5547_v4  ;;  %673 = vmatprep.mubr.f32.mxu0 %v5410_v0 }
 0x23c   :  { %627 = vmatprep.subr.mxu0 %v5555_v6 }
 0x23d   :  { %628 = vmatpush1.msra.mxu0 %v5565_v8 }
 0x23e   :  { %629 = vmatprep.subr.mxu0 %v5574_v10 }
 0x23f   :  { %630 = vmatpush1.msra.mxu0 %v5582_v12 }
 0x240   :  { %631 = vmatprep.subr.mxu0 %v5590_v14 }
 0x241   :  { %632 = vmatpush1.msra.mxu0 %v5596_v15 }
 0x242   :  { %633 = vmatprep.subr.mxu0 %v5602_v16 }
 0x243   :  { %634 = vmatpush1.msra.mxu0 %v5610_v17 }
 0x244   :  { %635 = vmatprep.subr.mxu0 %v5616_v18 }
 0x245   :  { %636 = vmatpush1.msra.mxu0 %v5623_v19 }
 0x246   :  { %637 = vmatprep.subr.mxu0 %v5630_v20 }
 0x247   :  { %638 = vmatpush1.msra.mxu0 %v5637_v21 }
 0x248   :  { %639 = vmatprep.subr.mxu0 %v5644_v22 }
 0x249   :  { %640 = vmatpush1.msra.mxu0 %v5651_v23 }
 0x24a   :  { %849 = vmatprep.subr.mxu0 %v5537_v2 }
 0x2fa   :  { %v441_v62 = vpop.f32.mrf.mxu0 }
 0x2fb   :  { %v448_v63 = vrot.slane %v441_v62, 6 }
 0x2fc   :  { %v443_v7 = vpop.f32.mrf.mxu0 }
 0x2fd   :  { %v452_v3 = vadd.f32 %v448_v63, %v371_v1  ;;  %v449_v9 = vrot.slane %v443_v7, 6 }
 0x2ff   :  { %v4688_v5 = vmul.f32 -1.442695, %v452_v3  ;;  %v453_v24 = vadd.f32 %v449_v9, %v372_v11 }
 0x301   :  { %4877 = vpow2.f32 %v4688_v5  ;;  %v4689_v34 = vmul.f32 -1.442695, %v453_v24 }
 0x302   :  { %4879 = vtanh.f32 %v453_v24 }
 0x30e   :  { %v4878_v25 = vpop.eup %4877 }
 0x30f   :  { %v457_v27 = vadd.f32 1.0, %v4878_v25  ;;  %v4880_v29 = vpop.eup %4879 }
 0x311   :  { %4881 = vrcp.f32 %v457_v27 }
 0x312   :  { %4883 = vpow2.f32 %v4689_v34  ;;  %v603_v34 = vld [vmem:[#allocation2] sm:$0xc0] }
 0x31e   :  { %v4882_v31 = vpop.eup %4881 }
 0x31f   :  { %v471_v32 = vmul.f32 %v4882_v31, %v4880_v29  ;;  %v470_v33 = vmul.f32 %v4882_v31, %v468_v30  ;;  %v4884_v35 = vpop.eup %4883  ;;  %v602_v29 = vld [vmem:[#allocation2 + $0x10] sm:$0xc0] }
 0x320   :  { %v464_v36 = vadd.f32 1.0, %v4884_v35 }
 0x321   :  { %473 = vrot.lane.b32.xlu1 %v471_v32, %s5411_s3 }
 0x322   :  { %4885 = vrcp.f32 %v464_v36 }
 0x32f   :  { %v4886_v39 = vpop.eup %4885 }
 0x393   :  { %v474_v37 = vpop.permute.xlu1 %473 }
 0x394   :  { %v476_v38 = vadd.f32 %v474_v37, %v470_v33 }
 0x396   :  { %4887 = vtanh.f32 %v476_v38  ;;  %v585_v57 = vrot.slane %v476_v38, 6 }
 0x3a3   :  { %v4888_v40 = vpop.eup %4887 }
 0x3a4   :  { %v5724_v41 = vmul.f32 %v4888_v40, %v4886_v39 }
 0x3a6   :  { %v487_v42 = vrot.slane %v5724_v41, 2 }
 0x3a8   :  { %488 = vrot.lane.b32.xlu1 %v487_v42, %s5411_s3 }
 0x41a   :  { %v489_v43 = vpop.permute.xlu1 %488 }
 0x41b   :  { %4690 = vmatmul.mubr.msk.f32.vlgmr.msra.gmra.mxu1 %vm266_vm3, %v489_v43 }
 0x41c   :  { %743 = vmatpush1.msra.mxu1 %v5547_v4  ;;  %790 = vmatprep.mubr.f32.mxu1 %v5410_v0 }
 0x41d   :  { %744 = vmatprep.subr.mxu1 %v5555_v6 }
 0x41e   :  { %745 = vmatpush1.msra.mxu1 %v5565_v8 }
 0x41f   :  { %746 = vmatprep.subr.mxu1 %v5574_v10 }
 0x420   :  { %747 = vmatpush1.msra.mxu1 %v5582_v12 }
 0x421   :  { %748 = vmatprep.subr.mxu1 %v5590_v14 }
 0x422   :  { %749 = vmatpush1.msra.mxu1 %v5596_v15 }
 0x423   :  { %750 = vmatprep.subr.mxu1 %v5602_v16 }
 0x424   :  { %751 = vmatpush1.msra.mxu1 %v5610_v17 }
 0x425   :  { %752 = vmatprep.subr.mxu1 %v5616_v18 }
 0x426   :  { %753 = vmatpush1.msra.mxu1 %v5623_v19 }
 0x427   :  { %754 = vmatprep.subr.mxu1 %v5630_v20 }
 0x428   :  { %755 = vmatpush1.msra.mxu1 %v5637_v21 }
 0x429   :  { %756 = vmatprep.subr.mxu1 %v5644_v22 }
 0x42a   :  { %757 = vmatpush1.msra.mxu1 %v5651_v23 }
 0x42b   :  { %965 = vmatprep.subr.mxu1 %v5537_v2 }
 0x4db   :  { %v558_v44 = vpop.f32.mrf.mxu1 }
 0x4dc   :  { %v565_v45 = vrot.slane %v558_v44, 4 }
 0x4dd   :  { %v560_v50 = vpop.f32.mrf.mxu1 }
 0x4de   :  { %v569_v48 = vadd.f32 %v565_v45, %v485_v46  ;;  %v566_v51 = vrot.slane %v560_v50, 4 }
 0x4e0   :  { %v4691_v49 = vmul.f32 -1.442695, %v569_v48  ;;  %v570_v53 = vadd.f32 %v566_v51, %v486_v52 }
 0x4e2   :  { %4889 = vpow2.f32 %v4691_v49  ;;  %v4692_v61 = vmul.f32 -1.442695, %v570_v53 }
 0x4e3   :  { %4891 = vtanh.f32 %v570_v53 }
 0x4ef   :  { %v4890_v54 = vpop.eup %4889 }
 0x4f0   :  { %v574_v55 = vadd.f32 1.0, %v4890_v54  ;;  %v4892_v56 = vpop.eup %4891  ;;  %v719_v54 = vld [vmem:[#allocation2 + $0x18] sm:$0x3] }
 0x4f2   :  { %4893 = vrcp.f32 %v574_v55 }
 0x4f3   :  { %4895 = vpow2.f32 %v4692_v61 }
 0x4ff   :  { %v4894_v58 = vpop.eup %4893 }
 0x500   :  { %v588_v59 = vmul.f32 %v4894_v58, %v4892_v56  ;;  %v587_v60 = vmul.f32 %v4894_v58, %v585_v57  ;;  %v4896_v62 = vpop.eup %4895 }
 0x501   :  { %v581_v63 = vadd.f32 1.0, %v4896_v62 }
 0x502   :  { %590 = vrot.lane.b32.xlu0 %v588_v59, %s5411_s3  ;;  %v720_v59 = vld [vmem:[#allocation2 + $0x8] sm:$0x3] }
 0x503   :  { %4897 = vrcp.f32 %v581_v63 }
 0x510   :  { %v4898_v5 = vpop.eup %4897 }
 0x574   :  { %v591_v1 = vpop.permute.xlu0 %590 }
 0x575   :  { %v593_v3 = vadd.f32 %v591_v1, %v587_v60 }
 0x577   :  { %4899 = vtanh.f32 %v593_v3  ;;  %v702_v39 = vrot.slane %v593_v3, 6 }
 0x584   :  { %v4900_v7 = vpop.eup %4899 }
 0x585   :  { %v5747_v9 = vmul.f32 %v4900_v7, %v4898_v5 }
 0x587   :  { %v604_v11 = vrot.slane %v5747_v9, 4 }
 0x589   :  { %605 = vrot.lane.b32.xlu1 %v604_v11, %s5411_s3 }
 0x5fb   :  { %v606_v24 = vpop.permute.xlu1 %605 }
 0x5fc   :  { %4693 = vmatmul.mubr.msk.f32.vlgmr.msra.gmra.mxu0 %vm266_vm3, %v606_v24 }
 0x5fd   :  { %850 = vmatpush1.msra.mxu0 %v5547_v4  ;;  %897 = vmatprep.mubr.f32.mxu0 %v5410_v0 }
 0x5fe   :  { %851 = vmatprep.subr.mxu0 %v5555_v6 }
 0x5ff   :  { %852 = vmatpush1.msra.mxu0 %v5565_v8 }
 0x600   :  { %853 = vmatprep.subr.mxu0 %v5574_v10 }
 0x601   :  { %854 = vmatpush1.msra.mxu0 %v5582_v12 }
 0x602   :  { %855 = vmatprep.subr.mxu0 %v5590_v14 }
 0x603   :  { %856 = vmatpush1.msra.mxu0 %v5596_v15 }
 0x604   :  { %857 = vmatprep.subr.mxu0 %v5602_v16 }
 0x605   :  { %858 = vmatpush1.msra.mxu0 %v5610_v17 }
 0x606   :  { %859 = vmatprep.subr.mxu0 %v5616_v18 }
 0x607   :  { %860 = vmatpush1.msra.mxu0 %v5623_v19 }
 0x608   :  { %861 = vmatprep.subr.mxu0 %v5630_v20 }
 0x609   :  { %862 = vmatpush1.msra.mxu0 %v5637_v21 }
 0x60a   :  { %863 = vmatprep.subr.mxu0 %v5644_v22 }
 0x60b   :  { %864 = vmatpush1.msra.mxu0 %v5651_v23 }
 0x60c   :  { %1081 = vmatprep.subr.mxu0 %v5537_v2 }
 0x6bc   :  { %v675_v25 = vpop.f32.mrf.mxu0 }
 0x6bd   :  { %v682_v27 = vrot.slane %v675_v25, 2 }
 0x6be   :  { %v677_v32 = vpop.f32.mrf.mxu0 }
 0x6bf   :  { %v686_v30 = vadd.f32 %v682_v27, %v602_v29  ;;  %v683_v33 = vrot.slane %v677_v32, 2 }
 0x6c1   :  { %v4694_v31 = vmul.f32 -1.442695, %v686_v30  ;;  %v687_v35 = vadd.f32 %v683_v33, %v603_v34 }
 0x6c3   :  { %4901 = vpow2.f32 %v4694_v31  ;;  %v4695_v2 = vmul.f32 -1.442695, %v687_v35 }
 0x6c4   :  { %4903 = vtanh.f32 %v687_v35 }
 0x6d0   :  { %v4902_v36 = vpop.eup %4901 }
 0x6d1   :  { %v691_v37 = vadd.f32 1.0, %v4902_v36  ;;  %v4904_v38 = vpop.eup %4903 }
 0x6d3   :  { %4905 = vrcp.f32 %v691_v37 }
 0x6d4   :  { %4907 = vpow2.f32 %v4695_v2 }
 0x6e0   :  { %v4906_v40 = vpop.eup %4905 }
 0x6e1   :  { %v705_v42 = vmul.f32 %v4906_v40, %v4904_v38  ;;  %v704_v43 = vmul.f32 %v4906_v40, %v702_v39  ;;  %v4908_v44 = vpop.eup %4907 }
 0x6e2   :  { %v698_v45 = vadd.f32 1.0, %v4908_v44 }
 0x6e3   :  { %707 = vrot.lane.b32.xlu0 %v705_v42, %s5411_s3 }
 0x6e4   :  { %4909 = vrcp.f32 %v698_v45 }
 0x6f1   :  { %v4910_v49 = vpop.eup %4909 }
 0x755   :  { %v708_v46 = vpop.permute.xlu0 %707 }
 0x756   :  { %v710_v48 = vadd.f32 %v708_v46, %v704_v43 }
 0x758   :  { %4911 = vtanh.f32 %v710_v48  ;;  %v813_v1 = vrot.slane %v710_v48, 6  ;;  %v942_v48 = vld [vmem:[#allocation2 + $0x18] sm:$0x30] }
 0x765   :  { %v4912_v50 = vpop.eup %4911 }
 0x766   :  { %v5770_v51 = vmul.f32 %v4912_v50, %v4910_v49 }
 0x768   :  { %v721_v52 = vrot.slane %v5770_v51, 6 }
 0x76a   :  { %722 = vrot.lane.b32.xlu1 %v721_v52, %s5411_s3 }
 0x7dc   :  { %v723_v53 = vpop.permute.xlu1 %722 }
 0x7dd   :  { %4696 = vmatmul.mubr.msk.f32.vlgmr.msra.gmra.mxu1 %vm266_vm3, %v723_v53 }
 0x7de   :  { %966 = vmatpush1.msra.mxu1 %v5547_v4  ;;  %1013 = vmatprep.mubr.f32.mxu1 %v5410_v0 }
 0x7df   :  { %967 = vmatprep.subr.mxu1 %v5555_v6 }
 0x7e0   :  { %968 = vmatpush1.msra.mxu1 %v5565_v8 }
 0x7e1   :  { %969 = vmatprep.subr.mxu1 %v5574_v10 }
 0x7e2   :  { %970 = vmatpush1.msra.mxu1 %v5582_v12 }
 0x7e3   :  { %971 = vmatprep.subr.mxu1 %v5590_v14 }
 0x7e4   :  { %972 = vmatpush1.msra.mxu1 %v5596_v15 }
 0x7e5   :  { %973 = vmatprep.subr.mxu1 %v5602_v16 }
 0x7e6   :  { %974 = vmatpush1.msra.mxu1 %v5610_v17 }
 0x7e7   :  { %975 = vmatprep.subr.mxu1 %v5616_v18 }
 0x7e8   :  { %976 = vmatpush1.msra.mxu1 %v5623_v19 }
 0x7e9   :  { %977 = vmatprep.subr.mxu1 %v5630_v20 }
 0x7ea   :  { %978 = vmatpush1.msra.mxu1 %v5637_v21 }
 0x7eb   :  { %979 = vmatprep.subr.mxu1 %v5644_v22 }
 0x7ec   :  { %980 = vmatpush1.msra.mxu1 %v5651_v23 }
 0x89d   :  { %v792_v55 = vpop.f32.mrf.mxu1 }
 0x89e   :  { %v797_v56 = vadd.f32 %v792_v55, %v719_v54  ;;  %v943_v54 = vld [vmem:[#allocation2 + $0x8] sm:$0x30] }
 0x89f   :  { %v794_v58 = vpop.f32.mrf.mxu1 }
 0x8a0   :  { %v4697_v57 = vmul.f32 -1.442695, %v797_v56  ;;  %v798_v60 = vadd.f32 %v794_v58, %v720_v59 }
 0x8a2   :  { %4913 = vpow2.f32 %v4697_v57  ;;  %v4698_v11 = vmul.f32 -1.442695, %v798_v60 }
 0x8a3   :  { %4915 = vtanh.f32 %v798_v60 }
 0x8af   :  { %v4914_v61 = vpop.eup %4913 }
 0x8b0   :  { %v802_v62 = vadd.f32 1.0, %v4914_v61  ;;  %v4916_v63 = vpop.eup %4915 }
 0x8b2   :  { %4917 = vrcp.f32 %v802_v62 }
 0x8b3   :  { %4919 = vpow2.f32 %v4698_v11  ;;  %v1175_v11 = vld [vmem:[%s6696_s4 + $0x8] sm:$0xff] }
 0x8bf   :  { %v4918_v3 = vpop.eup %4917 }
 0x8c0   :  { %v816_v5 = vmul.f32 %v4918_v3, %v4916_v63  ;;  %v815_v7 = vmul.f32 %v4918_v3, %v813_v1  ;;  %v4920_v24 = vpop.eup %4919  ;;  %v1179_v63 = vld [vmem:[%s6696_s4 + $0x28] sm:$0xf]  ;;  %v1178_v1 = vld [vmem:[%s6696_s4 + $0x20] sm:$0xf]  ;;  %v1177_v3 = vld [vmem:[%s6696_s4 + $0x18] sm:$0xff] }
 0x8c1   :  { %v809_v25 = vadd.f32 1.0, %v4920_v24  ;;  %4708 = vmatprep.subr.msk.mxu1 %vm160_vm0, %v1179_v63 }
 0x8c2   :  { %818 = vrot.lane.b32.xlu0 %v816_v5, %s5411_s3  ;;  %v1176_v5 = vld [vmem:[%s6696_s4 + $0x10] sm:$0xff] }
 0x8c3   :  { %4921 = vrcp.f32 %v809_v25 }
 0x8d0   :  { %v4922_v30 = vpop.eup %4921 }
 0x934   :  { %v819_v27 = vpop.permute.xlu0 %818 }
 0x935   :  { %v821_v29 = vadd.f32 %v819_v27, %v815_v7  ;;  %v5832_v7 = vld [vmem:[#allocation10 + $0x78] sm:$0xff] }
 0x937   :  { %4923 = vtanh.f32 %v821_v29 }
 0x944   :  { %v4924_v31 = vpop.eup %4923 }
 0x945   :  { %v823_v32 = vmul.f32 %v4924_v31, %v4922_v30  ;;  %v1174_v31 = vld [vmem:[%s6696_s4] sm:$0xff] }
 0x947   :  { %825 = vrot.lane.b32.xlu1 %v823_v32, %s5411_s3  ;;  %v5845_v32 = vld [vmem:[#allocation10 + $0x70] sm:$0xff] }
 0x9b9   :  { %v826_v33 = vpop.permute.xlu1 %825 }
 0x9ba   :  { %828 = vst.msk [vmem:[#allocation3 + $0x8] sm:$0x3] %vm369_vm2, %v826_v33  ;;  %4699 = vmatmul.mubr.msk.f32.vlgmr.msra.gmra.mxu0 %vm266_vm3, %v826_v33  ;;  %v5850_v33 = vld [vmem:[#allocation10 + $0x68] sm:$0xff] }
 0x9bb   :  { %1082 = vmatpush1.msra.mxu0 %v5547_v4  ;;  %1129 = vmatprep.mubr.f32.mxu0 %v5410_v0 }
 0x9bc   :  { %1083 = vmatprep.subr.mxu0 %v5555_v6 }
 0x9bd   :  { %1084 = vmatpush1.msra.mxu0 %v5565_v8  ;;  %v829_v8 = vld [vmem:[#allocation2 + $0x18] sm:$0xc] }
 0x9be   :  { %1085 = vmatprep.subr.mxu0 %v5574_v10 }
 0x9bf   :  { %1086 = vmatpush1.msra.mxu0 %v5582_v12 }
 0x9c0   :  { %1087 = vmatprep.subr.mxu0 %v5590_v14 }
 0x9c1   :  { %1088 = vmatpush1.msra.mxu0 %v5596_v15 }
 0x9c2   :  { %1089 = vmatprep.subr.mxu0 %v5602_v16  ;;  %v830_v16 = vld [vmem:[#allocation2 + $0x8] sm:$0xc] }
 0x9c3   :  { %1090 = vmatpush1.msra.mxu0 %v5610_v17 }
 0x9c4   :  { %1091 = vmatprep.subr.mxu0 %v5616_v18 }
 0x9c5   :  { %1092 = vmatpush1.msra.mxu0 %v5623_v19 }
 0x9c6   :  { %1093 = vmatprep.subr.mxu0 %v5630_v20 }
 0x9c7   :  { %1094 = vmatpush1.msra.mxu0 %v5637_v21  ;;  %v926_v21 = vrot.slane %v821_v29, 6 }
 0x9c8   :  { %1095 = vmatprep.subr.mxu0 %v5644_v22 }
 0x9c9   :  { %1096 = vmatpush1.msra.mxu0 %v5651_v23 }
 0x9ca   :  { %1313 = vmatprep.subr.mxu0 %v5832_v7 }
 0xa7a   :  { %v899_v4 = vpop.f32.mrf.mxu0 }
 0xa7b   :  { %v906_v6 = vrot.slane %v899_v4, 6  ;;  %v5854_v4 = vld [vmem:[#allocation10 + $0x60] sm:$0xff] }
 0xa7c   :  { %v901_v14 = vpop.f32.mrf.mxu0 }
 0xa7d   :  { %v910_v10 = vadd.f32 %v906_v6, %v829_v8  ;;  %v907_v15 = vrot.slane %v901_v14, 6  ;;  %v5857_v6 = vld [vmem:[#allocation10 + $0x58] sm:$0xff]  ;;  %v5860_v8 = vld [vmem:[#allocation10 + $0x50] sm:$0xff]  ;;  %v5869_v14 = vld [vmem:[#allocation10 + $0x40] sm:$0xff] }
 0xa7f   :  { %v4700_v12 = vmul.f32 -1.442695, %v910_v10  ;;  %v911_v17 = vadd.f32 %v907_v15, %v830_v16  ;;  %v5865_v10 = vld [vmem:[#allocation10 + $0x48] sm:$0xff]  ;;  %v5874_v16 = vld [vmem:[#allocation10 + $0x38] sm:$0xff] }
 0xa81   :  { %4925 = vpow2.f32 %v4700_v12  ;;  %v4701_v23 = vmul.f32 -1.442695, %v911_v17 }
 0xa82   :  { %4927 = vtanh.f32 %v911_v17 }
 0xa8e   :  { %v4926_v18 = vpop.eup %4925 }
 0xa8f   :  { %v915_v19 = vadd.f32 1.0, %v4926_v18  ;;  %v4928_v20 = vpop.eup %4927  ;;  %v5881_v18 = vld [vmem:[#allocation10 + $0x28] sm:$0xff] }
 0xa91   :  { %4929 = vrcp.f32 %v915_v19  ;;  %v5884_v19 = vld [vmem:[#allocation10 + $0x20] sm:$0xff] }
 0xa92   :  { %4931 = vpow2.f32 %v4701_v23  ;;  %v1180_v23 = vld [vmem:[%s6698_s6] sm:$0x3] }
 0xa9e   :  { %v4930_v34 = vpop.eup %4929 }
 0xa9f   :  { %v929_v22 = vmul.f32 %v4930_v34, %v4928_v20  ;;  %v928_v35 = vmul.f32 %v4930_v34, %v926_v21  ;;  %v4932_v36 = vpop.eup %4931  ;;  %v5888_v20 = vld [vmem:[#allocation10 + $0x18] sm:$0xff]  ;;  %v5891_v21 = vld [vmem:[#allocation10 + $0x10] sm:$0xff]  ;;  %v5894_v34 = vld [vmem:[#allocation10 + $0x8] sm:$0xff] }
 0xaa0   :  { %v922_v37 = vadd.f32 1.0, %v4932_v36 }
 0xaa1   :  { %931 = vrot.lane.b32.xlu0 %v929_v22, %s5411_s3  ;;  %v5897_v22 = vld [vmem:[#allocation10] sm:$0xff] }
 0xaa2   :  { %4933 = vrcp.f32 %v922_v37  ;;  %v1185_v37 = vrot.slane %v1180_v23, %v5688_v26 }
 0xaaf   :  { %v4934_v40 = vpop.eup %4933 }
 0xb13   :  { %v932_v38 = vpop.permute.xlu0 %931 }
 0xb14   :  { %v934_v39 = vadd.f32 %v932_v38, %v928_v35  ;;  %v1189_v38 = vrot.slane %v1180_v23, %v5693_v28 }
 0xb16   :  { %4935 = vtanh.f32 %v934_v39  ;;  %v1042_v59 = vrot.slane %v934_v39, 6 }
 0xb23   :  { %v4936_v42 = vpop.eup %4935 }
 0xb24   :  { %v5812_v43 = vmul.f32 %v4936_v42, %v4934_v40 }
 0xb26   :  { %v944_v2 = vrot.slane %v5812_v43, 2 }
 0xb28   :  { %945 = vrot.lane.b32.xlu1 %v944_v2, %s5411_s3 }
 0xb9a   :  { %v946_v44 = vpop.permute.xlu1 %945 }
 0xb9b   :  { %4702 = vmatmul.mubr.msk.f32.vlgmr.msra.gmra.mxu1 %vm266_vm3, %v946_v44 }
 0xb9c   :  { %1262 = vmatprep.mubr.f32.mxu1 %v5410_v0  ;;  %4709 = vmatpush1.msk.msra.mxu1 %vm160_vm0, %v1178_v1 }
 0xb9d   :  { %1226 = vmatprep.subr.mxu1 %v1177_v3 }
 0xb9e   :  { %1227 = vmatpush1.msra.mxu1 %v1176_v5 }
 0xb9f   :  { %1228 = vmatprep.subr.mxu1 %v1175_v11 }
 0xba0   :  { %1229 = vmatpush1.msra.mxu1 %v1174_v31 }
 0xba1   :  { %4710 = vmatmul.mubr.msk.f32.vlgmr.msra.gmra.mxu1 %vm153_vm1, %v5585_v13  ;;  %1426 = vmatprep.subr.mxu1 %v5832_v7 }
 0xba2   :  { %1268 = vmatprep.mubr.f32.mxu1 %v5410_v0  ;;  %1427 = vmatpush1.msra.mxu1 %v5845_v32 }
 0xba3   :  { %1428 = vmatprep.subr.mxu1 %v5850_v33 }
 0xba4   :  { %1429 = vmatpush1.msra.mxu1 %v5854_v4 }
 0xba5   :  { %4711 = vmatmul.mubr.msk.f32.gmra.mxu1 %vm153_vm1, %v5698_v47  ;;  %1430 = vmatprep.subr.mxu1 %v5857_v6  ;;  %v5877_v47 = vld [vmem:[#allocation10 + $0x30] sm:$0xff] }
 0xba6   :  { %1431 = vmatpush1.msra.mxu1 %v5860_v8  ;;  %1474 = vmatprep.mubr.f32.mxu1 %v5410_v0 }
 0xba7   :  { %1432 = vmatprep.subr.mxu1 %v5865_v10 }
 0xba8   :  { %1433 = vmatpush1.msra.mxu1 %v5869_v14 }
 0xba9   :  { %1434 = vmatprep.subr.mxu1 %v5874_v16 }
 0xbaa   :  { %1435 = vmatpush1.msra.mxu1 %v5877_v47 }
 0xbab   :  { %1436 = vmatprep.subr.mxu1 %v5881_v18 }
 0xbac   :  { %1437 = vmatpush1.msra.mxu1 %v5884_v19 }
 0xbad   :  { %1438 = vmatprep.subr.mxu1 %v5888_v20 }
 0xbae   :  { %1439 = vmatpush1.msra.mxu1 %v5891_v21 }
 0xbaf   :  { %1440 = vmatprep.subr.mxu1 %v5894_v34 }
 0xbb0   :  { %1441 = vmatpush1.msra.mxu1 %v5897_v22 }
 0xbb1   :  { %1658 = vmatprep.subr.mxu1 %v5832_v7 }
 0xc5b   :  { %v1015_v45 = vpop.f32.mrf.mxu1 }
 0xc5c   :  { %v1022_v46 = vrot.slane %v1015_v45, 4 }
 0xc5d   :  { %v1017_v52 = vpop.f32.mrf.mxu1 }
 0xc5e   :  { %v1026_v49 = vadd.f32 %v1022_v46, %v942_v48  ;;  %v1023_v53 = vrot.slane %v1017_v52, 4  ;;  %v1058_v48 = vld [vmem:[#allocation2 + $0x18] sm:$0xc0] }
 0xc60   :  { %v4703_v50 = vmul.f32 -1.442695, %v1026_v49  ;;  %v1027_v55 = vadd.f32 %v1023_v53, %v943_v54  ;;  %v1059_v49 = vld [vmem:[#allocation2 + $0x8] sm:$0xc0] }
 0xc61   :  { %v1264_v36 = vpop.f32.mrf.mxu1 }
 0xc62   :  { %4937 = vpow2.f32 %v4703_v50  ;;  %v4704_v24 = vmul.f32 -1.442695, %v1027_v55  ;;  %v1265_v40 = vadd.f32 %v1264_v36, %v1185_v37 }
 0xc63   :  { %4939 = vtanh.f32 %v1027_v55  ;;  %v1266_v39 = vpop.f32.mrf.mxu1 }
 0xc64   :  { %v1267_v42 = vadd.f32 %v1266_v39, %v1189_v38  ;;  %1275 = vst [vmem:[#allocation2 + $0x10] sm:$0xff] %v1265_v40 }
 0xc65   :  { %v1270_v2 = vpop.f32.mrf.mxu1 }
 0xc66   :  { %1276 = vst [vmem:[#allocation2] sm:$0xff] %v1267_v42  ;;  %v1271_v45 = vadd.f32 %v1270_v2, %v1185_v37 }
 0xc67   :  { %v1272_v44 = vpop.f32.mrf.mxu1 }
 0xc68   :  { %v1273_v46 = vadd.f32 %v1272_v44, %v1189_v38  ;;  %1277 = vst [vmem:[#allocation2 + $0x18] sm:$0xff] %v1271_v45 }
 0xc6a   :  { %1278 = vst [vmem:[#allocation2 + $0x8] sm:$0xff] %v1273_v46 }
 0xc6f   :  { %v4938_v56 = vpop.eup %4937 }
 0xc70   :  { %v1031_v57 = vadd.f32 1.0, %v4938_v56  ;;  %v4940_v58 = vpop.eup %4939 }
 0xc71   :  { %v1296_v11 = vld [vmem:[#allocation2 + $0x8] sm:$0xc0] }
 0xc72   :  { %4941 = vrcp.f32 %v1031_v57  ;;  %v1295_v57 = vld [vmem:[#allocation2 + $0x18] sm:$0xc0] }
 0xc73   :  { %4943 = vpow2.f32 %v4704_v24 }
 0xc7f   :  { %v4942_v60 = vpop.eup %4941 }
 0xc80   :  { %v1045_v61 = vmul.f32 %v4942_v60, %v4940_v58  ;;  %v1044_v62 = vmul.f32 %v4942_v60, %v1042_v59  ;;  %v4944_v25 = vpop.eup %4943 }
 0xc81   :  { %v1038_v27 = vadd.f32 1.0, %v4944_v25 }
 0xc82   :  { %1047 = vrot.lane.b32.xlu0 %v1045_v61, %s5411_s3 }
 0xc83   :  { %4945 = vrcp.f32 %v1038_v27 }
 0xc90   :  { %v4946_v13 = vpop.eup %4945 }
 0xcf4   :  { %v1048_v29 = vpop.permute.xlu0 %1047 }
 0xcf5   :  { %v5839_v30 = vadd.f32 %v1048_v29, %v1044_v62 }
 0xcf7   :  { %4947 = vtanh.f32 %v5839_v30  ;;  %v1158_v25 = vrot.slane %v5839_v30, 6 }
 0xd04   :  { %v4948_v12 = vpop.eup %4947 }
 0xd05   :  { %v5872_v15 = vmul.f32 %v4948_v12, %v4946_v13 }
 0xd07   :  { %v1060_v17 = vrot.slane %v5872_v15, 4 }
 0xd09   :  { %1061 = vrot.lane.b32.xlu1 %v1060_v17, %s5411_s3 }
 0xd7b   :  { %v1062_v35 = vpop.permute.xlu1 %1061 }
 0xd7c   :  { %4705 = vmatmul.mubr.msk.f32.vlgmr.msra.gmra.mxu0 %vm266_vm3, %v1062_v35 }
 0xd7d   :  { %1314 = vmatpush1.msra.mxu0 %v5845_v32  ;;  %1361 = vmatprep.mubr.f32.mxu0 %v5410_v0 }
 0xd7e   :  { %1315 = vmatprep.subr.mxu0 %v5850_v33 }
 0xd7f   :  { %1316 = vmatpush1.msra.mxu0 %v5854_v4 }
 0xd80   :  { %1317 = vmatprep.subr.mxu0 %v5857_v6 }
 0xd81   :  { %1318 = vmatpush1.msra.mxu0 %v5860_v8 }
 0xd82   :  { %1319 = vmatprep.subr.mxu0 %v5865_v10 }
 0xd83   :  { %1320 = vmatpush1.msra.mxu0 %v5869_v14 }
 0xd84   :  { %1321 = vmatprep.subr.mxu0 %v5874_v16 }
 0xd85   :  { %1322 = vmatpush1.msra.mxu0 %v5877_v47 }
 0xd86   :  { %1323 = vmatprep.subr.mxu0 %v5881_v18 }
 0xd87   :  { %1324 = vmatpush1.msra.mxu0 %v5884_v19 }
 0xd88   :  { %1325 = vmatprep.subr.mxu0 %v5888_v20 }
 0xd89   :  { %1326 = vmatpush1.msra.mxu0 %v5891_v21 }
 0xd8a   :  { %1327 = vmatprep.subr.mxu0 %v5894_v34 }
 0xd8b   :  { %1328 = vmatpush1.msra.mxu0 %v5897_v22 }
 0xd8c   :  { %1362 = vmatmul.mubr.f32.vlgmr.msra.gmra.mxu0 %v5410_v0  ;;  %1542 = vmatprep.subr.mxu0 %v5832_v7 }
 0xd8d   :  { %1543 = vmatpush1.msra.mxu0 %v5845_v32  ;;  %1590 = vmatprep.mubr.f32.mxu0 %v5410_v0 }
 0xd8e   :  { %1544 = vmatprep.subr.mxu0 %v5850_v33 }
 0xd8f   :  { %1545 = vmatpush1.msra.mxu0 %v5854_v4 }
 0xd90   :  { %1546 = vmatprep.subr.mxu0 %v5857_v6 }
 0xd91   :  { %1547 = vmatpush1.msra.mxu0 %v5860_v8 }
 0xd92   :  { %1548 = vmatprep.subr.mxu0 %v5865_v10 }
 0xd93   :  { %1549 = vmatpush1.msra.mxu0 %v5869_v14 }
 0xd94   :  { %1550 = vmatprep.subr.mxu0 %v5874_v16 }
 0xd95   :  { %1551 = vmatpush1.msra.mxu0 %v5877_v47 }
 0xd96   :  { %1552 = vmatprep.subr.mxu0 %v5881_v18 }
 0xd97   :  { %1553 = vmatpush1.msra.mxu0 %v5884_v19 }
 0xd98   :  { %1554 = vmatprep.subr.mxu0 %v5888_v20 }
 0xd99   :  { %1555 = vmatpush1.msra.mxu0 %v5891_v21 }
 0xd9a   :  { %1556 = vmatprep.subr.mxu0 %v5894_v34 }
 0xd9b   :  { %1557 = vmatpush1.msra.mxu0 %v5897_v22 }
 0xd9c   :  { %1765 = vmatprep.subr.mxu0 %v5832_v7 }
 0xe3c   :  { %v1131_v50 = vpop.f32.mrf.mxu0 }
 0xe3d   :  { %v1138_v52 = vrot.slane %v1131_v50, 2 }
 0xe3e   :  { %v1133_v55 = vpop.f32.mrf.mxu0 }
 0xe3f   :  { %v1142_v53 = vadd.f32 %v1138_v52, %v1058_v48  ;;  %v1139_v56 = vrot.slane %v1133_v55, 2  ;;  %v1403_v52 = vld [vmem:[#allocation2 + $0x18] sm:$0x30] }
 0xe41   :  { %v4706_v54 = vmul.f32 -1.442695, %v1142_v53  ;;  %v5943_v60 = vadd.f32 %v1139_v56, %v1059_v49 }
 0xe43   :  { %4949 = vpow2.f32 %v4706_v54 }
 0xe44   :  { %4951 = vtanh.f32 %v5943_v60 }
 0xe4c   :  { %v1363_v58 = vpop.f32.mrf.mxu0 }
 0xe4d   :  { %v1370_v59 = vrot.slane %v1363_v58, 2 }
 0xe4e   :  { %v1365_v3 = vpop.f32.mrf.mxu0 }
 0xe4f   :  { %v1374_v61 = vadd.f32 %v1370_v59, %v1295_v57  ;;  %v1371_v5 = vrot.slane %v1365_v3, 2  ;;  %v1404_v57 = vld [vmem:[#allocation2 + $0x8] sm:$0x30] }
 0xe50   :  { %v4950_v62 = vpop.eup %4949 }
 0xe51   :  { %v1147_v63 = vadd.f32 1.0, %v4950_v62  ;;  %v4712_v1 = vmul.f32 -1.442695, %v1374_v61  ;;  %v4952_v24 = vpop.eup %4951  ;;  %v1375_v27 = vadd.f32 %v1371_v5, %v1296_v11 }
 0xe53   :  { %4953 = vrcp.f32 %v1147_v63  ;;  %v4713_v37 = vmul.f32 -1.442695, %v1375_v27 }
 0xe54   :  { %4955 = vpow2.f32 %v4712_v1 }
 0xe55   :  { %4957 = vtanh.f32 %v1375_v27 }
 0xe60   :  { %v4954_v29 = vpop.eup %4953 }
 0xe61   :  { %v4956_v31 = vpop.eup %4955  ;;  %v5947_v13 = vmul.f32 %v4954_v29, %v4952_v24  ;;  %v5949_v12 = vmul.f32 %v4954_v29, %v1158_v25 }
 0xe62   :  { %v1379_v17 = vadd.f32 1.0, %v4956_v31  ;;  %v4958_v35 = vpop.eup %4957 }
 0xe64   :  { %4959 = vrcp.f32 %v1379_v17 }
 0xe65   :  { %4961 = vpow2.f32 %v4713_v37 }
 0xe71   :  { %v4960_v23 = vpop.eup %4959 }
 0xe72   :  { %v1390_v36 = vmul.f32 %v4960_v23, %v4958_v35  ;;  %v4962_v38 = vpop.eup %4961  ;;  %v1389_v30 = vmul.f32 0.0, %v4960_v23 }
 0xe73   :  { %v1386_v39 = vadd.f32 1.0, %v4962_v38 }
 0xe74   :  { %1392 = vrot.lane.b32.xlu0 %v1390_v36, %s5411_s3 }
 0xe75   :  { %4963 = vrcp.f32 %v1386_v39  ;;  %v1519_v39 = vld [vmem:[#allocation2 + $0x18] sm:$0xc] }
 0xe82   :  { %v4964_v2 = vpop.eup %4963 }
 0xee6   :  { %v1393_v40 = vpop.permute.xlu0 %1392 }
 0xee7   :  { %v1395_v42 = vadd.f32 %v1393_v40, %v1389_v30 }
 0xee9   :  { %4965 = vtanh.f32 %v1395_v42  ;;  %v1503_v63 = vrot.slane %v1395_v42, 2 }
 0xef6   :  { %v4966_v44 = vpop.eup %4965 }
 0xef7   :  { %v5952_v45 = vmul.f32 %v4966_v44, %v4964_v2  ;;  %v1520_v44 = vld [vmem:[#allocation2 + $0x8] sm:$0xc] }
 0xef9   :  { %v1405_v46 = vrot.slane %v5952_v45, 6 }
 0xefb   :  { %1406 = vrot.lane.b32.xlu1 %v1405_v46, %s5411_s3 }
 0xf6d   :  { %v1407_v48 = vpop.permute.xlu1 %1406 }
 0xf6e   :  { %4714 = vmatmul.mubr.msk.f32.vlgmr.msra.gmra.mxu1 %vm266_vm3, %v1407_v48 }
 0xf6f   :  { %1659 = vmatpush1.msra.mxu1 %v5845_v32  ;;  %1706 = vmatprep.mubr.f32.mxu1 %v5410_v0 }
 0xf70   :  { %1660 = vmatprep.subr.mxu1 %v5850_v33 }
 0xf71   :  { %1661 = vmatpush1.msra.mxu1 %v5854_v4 }
 0xf72   :  { %1662 = vmatprep.subr.mxu1 %v5857_v6 }
 0xf73   :  { %1663 = vmatpush1.msra.mxu1 %v5860_v8 }
 0xf74   :  { %1664 = vmatprep.subr.mxu1 %v5865_v10 }
 0xf75   :  { %1665 = vmatpush1.msra.mxu1 %v5869_v14 }
 0xf76   :  { %1666 = vmatprep.subr.mxu1 %v5874_v16 }
 0xf77   :  { %1667 = vmatpush1.msra.mxu1 %v5877_v47 }
 0xf78   :  { %1668 = vmatprep.subr.mxu1 %v5881_v18 }
 0xf79   :  { %1669 = vmatpush1.msra.mxu1 %v5884_v19 }
 0xf7a   :  { %1670 = vmatprep.subr.mxu1 %v5888_v20 }
 0xf7b   :  { %1671 = vmatpush1.msra.mxu1 %v5891_v21 }
 0xf7c   :  { %1672 = vmatprep.subr.mxu1 %v5894_v34 }
 0xf7d   :  { %1673 = vmatpush1.msra.mxu1 %v5897_v22 }
 0xf7e   :  { %1881 = vmatprep.subr.mxu1 %v5832_v7 }
0x102e   :  { %v1476_v49 = vpop.f32.mrf.mxu1 }
0x102f   :  { %v1483_v50 = vrot.slane %v1476_v49, 4 }
0x1030   :  { %v1478_v55 = vpop.f32.mrf.mxu1 }
0x1031   :  { %v1487_v53 = vadd.f32 %v1483_v50, %v1403_v52  ;;  %v1484_v56 = vrot.slane %v1478_v55, 4 }
0x1033   :  { %v4715_v54 = vmul.f32 -1.442695, %v1487_v53  ;;  %v1488_v58 = vadd.f32 %v1484_v56, %v1404_v57 }
0x1035   :  { %4967 = vpow2.f32 %v4715_v54  ;;  %v4716_v11 = vmul.f32 -1.442695, %v1488_v58 }
0x1036   :  { %4969 = vtanh.f32 %v1488_v58 }
0x1042   :  { %v4968_v59 = vpop.eup %4967 }
0x1043   :  { %v1492_v61 = vadd.f32 1.0, %v4968_v59  ;;  %v4970_v62 = vpop.eup %4969 }
0x1045   :  { %4971 = vrcp.f32 %v1492_v61 }
0x1046   :  { %4973 = vpow2.f32 %v4716_v11  ;;  %v1635_v11 = vld [vmem:[#allocation2 + $0x18] sm:$0x3] }
0x1052   :  { %v4972_v1 = vpop.eup %4971 }
0x1053   :  { %v1506_v3 = vmul.f32 %v4972_v1, %v4970_v62  ;;  %v1505_v5 = vmul.f32 %v4972_v1, %v1503_v63  ;;  %v4974_v24 = vpop.eup %4973 }
0x1054   :  { %v1499_v25 = vadd.f32 1.0, %v4974_v24 }
0x1055   :  { %1508 = vrot.lane.b32.xlu0 %v1506_v3, %s5411_s3 }
0x1056   :  { %4975 = vrcp.f32 %v1499_v25 }
0x1063   :  { %v4976_v31 = vpop.eup %4975 }
0x10c7   :  { %v1509_v27 = vpop.permute.xlu0 %1508 }
0x10c8   :  { %v1511_v29 = vadd.f32 %v1509_v27, %v1505_v5 }
0x10ca   :  { %4977 = vtanh.f32 %v1511_v29  ;;  %v1619_v52 = vrot.slane %v1511_v29, 2 }
0x10d7   :  { %v4978_v17 = vpop.eup %4977 }
0x10d8   :  { %v5975_v35 = vmul.f32 %v4978_v17, %v4976_v31  ;;  %v1636_v31 = vld [vmem:[#allocation2 + $0x8] sm:$0x3] }
0x10da   :  { %v1521_v23 = vrot.slane %v5975_v35, 4 }
0x10dc   :  { %1522 = vrot.lane.b32.xlu1 %v1521_v23, %s5411_s3 }
0x114e   :  { %v1523_v36 = vpop.permute.xlu1 %1522 }
0x114f   :  { %4717 = vmatmul.mubr.msk.f32.vlgmr.msra.gmra.mxu0 %vm266_vm3, %v1523_v36 }
0x1150   :  { %1766 = vmatpush1.msra.mxu0 %v5845_v32  ;;  %1813 = vmatprep.mubr.f32.mxu0 %v5410_v0 }
0x1151   :  { %1767 = vmatprep.subr.mxu0 %v5850_v33 }
0x1152   :  { %1768 = vmatpush1.msra.mxu0 %v5854_v4 }
0x1153   :  { %1769 = vmatprep.subr.mxu0 %v5857_v6 }
0x1154   :  { %1770 = vmatpush1.msra.mxu0 %v5860_v8 }
0x1155   :  { %1771 = vmatprep.subr.mxu0 %v5865_v10 }
0x1156   :  { %1772 = vmatpush1.msra.mxu0 %v5869_v14 }
0x1157   :  { %1773 = vmatprep.subr.mxu0 %v5874_v16 }
0x1158   :  { %1774 = vmatpush1.msra.mxu0 %v5877_v47 }
0x1159   :  { %1775 = vmatprep.subr.mxu0 %v5881_v18 }
0x115a   :  { %1776 = vmatpush1.msra.mxu0 %v5884_v19 }
0x115b   :  { %1777 = vmatprep.subr.mxu0 %v5888_v20 }
0x115c   :  { %1778 = vmatpush1.msra.mxu0 %v5891_v21 }
0x115d   :  { %1779 = vmatprep.subr.mxu0 %v5894_v34 }
0x115e   :  { %1780 = vmatpush1.msra.mxu0 %v5897_v22 }
0x115f   :  { %1997 = vmatprep.subr.mxu0 %v5832_v7 }
0x120f   :  { %v1592_v37 = vpop.f32.mrf.mxu0 }
0x1210   :  { %v1599_v38 = vrot.slane %v1592_v37, 6 }
0x1211   :  { %v1594_v42 = vpop.f32.mrf.mxu0 }
0x1212   :  { %v1603_v30 = vadd.f32 %v1599_v38, %v1519_v39  ;;  %v1600_v2 = vrot.slane %v1594_v42, 6 }
0x1214   :  { %v4718_v40 = vmul.f32 -1.442695, %v1603_v30  ;;  %v1604_v46 = vadd.f32 %v1600_v2, %v1520_v44 }
0x1216   :  { %4979 = vpow2.f32 %v4718_v40  ;;  %v4719_v56 = vmul.f32 -1.442695, %v1604_v46 }
0x1217   :  { %4981 = vtanh.f32 %v1604_v46 }
0x1223   :  { %v4980_v48 = vpop.eup %4979 }
0x1224   :  { %v1608_v49 = vadd.f32 1.0, %v4980_v48  ;;  %v4982_v50 = vpop.eup %4981 }
0x1226   :  { %4983 = vrcp.f32 %v1608_v49 }
0x1227   :  { %4985 = vpow2.f32 %v4719_v56 }
0x1233   :  { %v4984_v53 = vpop.eup %4983 }
0x1234   :  { %v1622_v54 = vmul.f32 %v4984_v53, %v4982_v50  ;;  %v1621_v55 = vmul.f32 %v4984_v53, %v1619_v52  ;;  %v4986_v57 = vpop.eup %4985 }
0x1235   :  { %v1615_v58 = vadd.f32 1.0, %v4986_v57 }
0x1236   :  { %1624 = vrot.lane.b32.xlu0 %v1622_v54, %s5411_s3 }
0x1237   :  { %4987 = vrcp.f32 %v1615_v58 }
0x1244   :  { %v4988_v62 = vpop.eup %4987 }
0x12a8   :  { %v1625_v59 = vpop.permute.xlu0 %1624 }
0x12a9   :  { %v1627_v61 = vadd.f32 %v1625_v59, %v1621_v55  ;;  %v1745_v55 = vld [vmem:[#allocation2 + $0x10] sm:$0xc0] }
0x12ab   :  { %4989 = vtanh.f32 %v1627_v61  ;;  %v1729_v38 = vrot.slane %v1627_v61, 2  ;;  %v1746_v61 = vld [vmem:[#allocation2] sm:$0xc0] }
0x12b8   :  { %v4990_v63 = vpop.eup %4989 }
0x12b9   :  { %v5998_v1 = vmul.f32 %v4990_v63, %v4988_v62 }
0x12bb   :  { %v1637_v3 = vrot.slane %v5998_v1, 2 }
0x12bd   :  { %1638 = vrot.lane.b32.xlu1 %v1637_v3, %s5411_s3 }
0x132f   :  { %v1639_v5 = vpop.permute.xlu1 %1638 }
0x1330   :  { %4720 = vmatmul.mubr.msk.f32.vlgmr.msra.gmra.mxu1 %vm266_vm3, %v1639_v5 }
0x1331   :  { %1882 = vmatpush1.msra.mxu1 %v5845_v32  ;;  %1929 = vmatprep.mubr.f32.mxu1 %v5410_v0 }
0x1332   :  { %1883 = vmatprep.subr.mxu1 %v5850_v33 }
0x1333   :  { %1884 = vmatpush1.msra.mxu1 %v5854_v4 }
0x1334   :  { %1885 = vmatprep.subr.mxu1 %v5857_v6 }
0x1335   :  { %1886 = vmatpush1.msra.mxu1 %v5860_v8 }
0x1336   :  { %1887 = vmatprep.subr.mxu1 %v5865_v10 }
0x1337   :  { %1888 = vmatpush1.msra.mxu1 %v5869_v14 }
0x1338   :  { %1889 = vmatprep.subr.mxu1 %v5874_v16 }
0x1339   :  { %1890 = vmatpush1.msra.mxu1 %v5877_v47 }
0x133a   :  { %1891 = vmatprep.subr.mxu1 %v5881_v18 }
0x133b   :  { %1892 = vmatpush1.msra.mxu1 %v5884_v19 }
0x133c   :  { %1893 = vmatprep.subr.mxu1 %v5888_v20 }
0x133d   :  { %1894 = vmatpush1.msra.mxu1 %v5891_v21 }
0x133e   :  { %1895 = vmatprep.subr.mxu1 %v5894_v34 }
0x133f   :  { %1896 = vmatpush1.msra.mxu1 %v5897_v22 }
0x1340   :  { %2113 = vmatprep.subr.mxu1 %v5832_v7 }
0x13f0   :  { %v1708_v24 = vpop.f32.mrf.mxu1 }
0x13f1   :  { %v1713_v25 = vadd.f32 %v1708_v24, %v1635_v11 }
0x13f2   :  { %v1710_v29 = vpop.f32.mrf.mxu1 }
0x13f3   :  { %v4721_v27 = vmul.f32 -1.442695, %v1713_v25  ;;  %v1714_v17 = vadd.f32 %v1710_v29, %v1636_v31 }
0x13f5   :  { %4991 = vpow2.f32 %v4721_v27  ;;  %v4722_v7 = vmul.f32 -1.442695, %v1714_v17 }
0x13f6   :  { %4993 = vtanh.f32 %v1714_v17 }
0x1402   :  { %v4992_v23 = vpop.eup %4991 }
0x1403   :  { %v1718_v36 = vadd.f32 1.0, %v4992_v23  ;;  %v4994_v37 = vpop.eup %4993 }
0x1405   :  { %4995 = vrcp.f32 %v1718_v36 }
0x1406   :  { %4997 = vpow2.f32 %v4722_v7 }
0x1412   :  { %v4996_v39 = vpop.eup %4995 }
0x1413   :  { %v1732_v30 = vmul.f32 %v4996_v39, %v4994_v37  ;;  %v1731_v40 = vmul.f32 %v4996_v39, %v1729_v38  ;;  %v4998_v42 = vpop.eup %4997 }
0x1414   :  { %v1725_v2 = vadd.f32 1.0, %v4998_v42 }
0x1415   :  { %1734 = vrot.lane.b32.xlu0 %v1732_v30, %s5411_s3 }
0x1416   :  { %4999 = vrcp.f32 %v1725_v2 }
0x1423   :  { %v5000_v48 = vpop.eup %4999 }
0x1487   :  { %v1735_v44 = vpop.permute.xlu0 %1734 }
0x1488   :  { %v1737_v46 = vadd.f32 %v1735_v44, %v1731_v40 }
0x148a   :  { %5001 = vtanh.f32 %v1737_v46  ;;  %v1842_v11 = vrot.slane %v1737_v46, 2 }
0x1497   :  { %v5002_v49 = vpop.eup %5001 }
0x1498   :  { %v1739_v50 = vmul.f32 %v5002_v49, %v5000_v48 }
0x149a   :  { %1741 = vrot.lane.b32.xlu1 %v1739_v50, %s5411_s3 }
0x150c   :  { %v1742_v52 = vpop.permute.xlu1 %1741 }
0x150d   :  { %1744 = vst.msk [vmem:[#allocation4 + $0x8] sm:$0x3] %vm369_vm2, %v1742_v52  ;;  %4723 = vmatmul.mubr.msk.f32.vlgmr.msra.gmra.mxu0 %vm266_vm3, %v1742_v52 }
0x150e   :  { %1998 = vmatpush1.msra.mxu0 %v5845_v32  ;;  %2045 = vmatprep.mubr.f32.mxu0 %v5410_v0 }
0x150f   :  { %1999 = vmatprep.subr.mxu0 %v5850_v33 }
0x1510   :  { %2000 = vmatpush1.msra.mxu0 %v5854_v4 }
0x1511   :  { %2001 = vmatprep.subr.mxu0 %v5857_v6 }
0x1512   :  { %2002 = vmatpush1.msra.mxu0 %v5860_v8 }
0x1513   :  { %2003 = vmatprep.subr.mxu0 %v5865_v10 }
0x1514   :  { %2004 = vmatpush1.msra.mxu0 %v5869_v14 }
0x1515   :  { %2005 = vmatprep.subr.mxu0 %v5874_v16 }
0x1516   :  { %2006 = vmatpush1.msra.mxu0 %v5877_v47 }
0x1517   :  { %2007 = vmatprep.subr.mxu0 %v5881_v18 }
0x1518   :  { %2008 = vmatpush1.msra.mxu0 %v5884_v19 }
0x1519   :  { %2009 = vmatprep.subr.mxu0 %v5888_v20 }
0x151a   :  { %2010 = vmatpush1.msra.mxu0 %v5891_v21 }
0x151b   :  { %2011 = vmatprep.subr.mxu0 %v5894_v34 }
0x151c   :  { %2012 = vmatpush1.msra.mxu0 %v5897_v22 }
0x15cd   :  { %v1815_v53 = vpop.f32.mrf.mxu0 }
0x15ce   :  { %v1822_v54 = vrot.slane %v1815_v53, 2 }
0x15cf   :  { %v1817_v58 = vpop.f32.mrf.mxu0 }
0x15d0   :  { %v1826_v56 = vadd.f32 %v1822_v54, %v1745_v55  ;;  %v1823_v59 = vrot.slane %v1817_v58, 2 }
0x15d2   :  { %v4724_v57 = vmul.f32 -1.442695, %v1826_v56  ;;  %v1827_v62 = vadd.f32 %v1823_v59, %v1746_v61 }
0x15d4   :  { %5003 = vpow2.f32 %v4724_v57  ;;  %v4725_v29 = vmul.f32 -1.442695, %v1827_v62  ;;  %v1974_v57 = vld [vmem:[#allocation2 + $0x10] sm:$0xc] }
0x15d5   :  { %5005 = vtanh.f32 %v1827_v62 }
0x15e1   :  { %v5004_v63 = vpop.eup %5003 }
0x15e2   :  { %v1831_v3 = vadd.f32 1.0, %v5004_v63  ;;  %v5006_v5 = vpop.eup %5005  ;;  %v1975_v63 = vld [vmem:[#allocation2] sm:$0xc] }
0x15e4   :  { %5007 = vrcp.f32 %v1831_v3 }
0x15e5   :  { %5009 = vpow2.f32 %v4725_v29 }
0x15f1   :  { %v5008_v24 = vpop.eup %5007 }
0x15f2   :  { %v1845_v25 = vmul.f32 %v5008_v24, %v5006_v5  ;;  %v1844_v27 = vmul.f32 %v5008_v24, %v1842_v11  ;;  %v5010_v31 = vpop.eup %5009 }
0x15f3   :  { %v1838_v17 = vadd.f32 1.0, %v5010_v31 }
0x15f4   :  { %1847 = vrot.lane.b32.xlu0 %v1845_v25, %s5411_s3 }
0x15f5   :  { %5011 = vrcp.f32 %v1838_v17 }
0x1602   :  { %v5012_v37 = vpop.eup %5011 }
0x1666   :  { %v1848_v23 = vpop.permute.xlu0 %1847 }
0x1667   :  { %v1850_v36 = vadd.f32 %v1848_v23, %v1844_v27 }
0x1669   :  { %5013 = vtanh.f32 %v1850_v36 }
0x1676   :  { %v5014_v38 = vpop.eup %5013 }
0x1677   :  { %v6041_v39 = vmul.f32 %v5014_v38, %v5012_v37 }
0x1679   :  { %v1860_v30 = vrot.slane %v6041_v39, 6 }
0x167b   :  { %1861 = vrot.lane.b32.xlu1 %v1860_v30, %s5411_s3 }
0x16ed   :  { %v1862_v40 = vpop.permute.xlu1 %1861 }
0x16ee   :  { %4726 = vmatmul.mubr.msk.f32.vlgmr.msra.gmra.mxu1 %vm266_vm3, %v1862_v40 }
0x16ef   :  { %2114 = vmatpush1.msra.mxu1 %v5845_v32  ;;  %2161 = vmatprep.mubr.f32.mxu1 %v5410_v0 }
0x16f0   :  { %2115 = vmatprep.subr.mxu1 %v5850_v33 }
0x16f1   :  { %2116 = vmatpush1.msra.mxu1 %v5854_v4  ;;  %v1858_v4 = vld [vmem:[#allocation2 + $0x10] sm:$0x30] }
0x16f2   :  { %2117 = vmatprep.subr.mxu1 %v5857_v6 }
0x16f3   :  { %2118 = vmatpush1.msra.mxu1 %v5860_v8 }
0x16f4   :  { %2119 = vmatprep.subr.mxu1 %v5865_v10 }
0x16f5   :  { %2120 = vmatpush1.msra.mxu1 %v5869_v14 }
0x16f6   :  { %2121 = vmatprep.subr.mxu1 %v5874_v16  ;;  %v1859_v16 = vld [vmem:[#allocation2] sm:$0x30] }
0x16f7   :  { %2122 = vmatpush1.msra.mxu1 %v5877_v47 }
0x16f8   :  { %2123 = vmatprep.subr.mxu1 %v5881_v18 }
0x16f9   :  { %2124 = vmatpush1.msra.mxu1 %v5884_v19 }
0x16fa   :  { %2125 = vmatprep.subr.mxu1 %v5888_v20 }
0x16fb   :  { %2126 = vmatpush1.msra.mxu1 %v5891_v21  ;;  %v1958_v21 = vrot.slane %v1850_v36, 2 }
0x16fc   :  { %2127 = vmatprep.subr.mxu1 %v5894_v34 }
0x16fd   :  { %2128 = vmatpush1.msra.mxu1 %v5897_v22 }
0x17ae   :  { %v1931_v32 = vpop.f32.mrf.mxu1 }
0x17af   :  { %v1938_v33 = vrot.slane %v1931_v32, 4 }
0x17b0   :  { %v1933_v10 = vpop.f32.mrf.mxu1 }
0x17b1   :  { %v1942_v6 = vadd.f32 %v1938_v33, %v1858_v4  ;;  %v1939_v14 = vrot.slane %v1933_v10, 4 }
0x17b3   :  { %v4727_v8 = vmul.f32 -1.442695, %v1942_v6  ;;  %v1943_v47 = vadd.f32 %v1939_v14, %v1859_v16 }
0x17b5   :  { %5015 = vpow2.f32 %v4727_v8  ;;  %v4728_v22 = vmul.f32 -1.442695, %v1943_v47 }
0x17b6   :  { %5017 = vtanh.f32 %v1943_v47 }
0x17c2   :  { %v5016_v18 = vpop.eup %5015 }
0x17c3   :  { %v1947_v19 = vadd.f32 1.0, %v5016_v18  ;;  %v5018_v20 = vpop.eup %5017 }
0x17c5   :  { %5019 = vrcp.f32 %v1947_v19 }
0x17c6   :  { %5021 = vpow2.f32 %v4728_v22 }
0x17d2   :  { %v5020_v7 = vpop.eup %5019 }
0x17d3   :  { %v1961_v34 = vmul.f32 %v5020_v7, %v5018_v20  ;;  %v1960_v42 = vmul.f32 %v5020_v7, %v1958_v21  ;;  %v5022_v2 = vpop.eup %5021  ;;  %v2090_v20 = vld [vmem:[#allocation2 + $0x10] sm:$0x3] }
0x17d4   :  { %v1954_v44 = vadd.f32 1.0, %v5022_v2 }
0x17d5   :  { %1963 = vrot.lane.b32.xlu0 %v1961_v34, %s5411_s3 }
0x17d6   :  { %5023 = vrcp.f32 %v1954_v44 }
0x17e3   :  { %v5024_v49 = vpop.eup %5023 }
0x1847   :  { %v1964_v46 = vpop.permute.xlu0 %1963 }
0x1848   :  { %v1966_v48 = vadd.f32 %v1964_v46, %v1960_v42 }
0x184a   :  { %5025 = vtanh.f32 %v1966_v48  ;;  %v2074_v25 = vrot.slane %v1966_v48, 2 }
0x1857   :  { %v5026_v50 = vpop.eup %5025 }
0x1858   :  { %v6063_v52 = vmul.f32 %v5026_v50, %v5024_v49 }
0x185a   :  { %v1976_v53 = vrot.slane %v6063_v52, 4 }
0x185c   :  { %1977 = vrot.lane.b32.xlu1 %v1976_v53, %s5411_s3 }
0x18ce   :  { %v1978_v54 = vpop.permute.xlu1 %1977 }
0x18cf   :  { %4729 = vmatmul.mubr.msk.f32.vlgmr.msra.gmra.mxu0 %vm266_vm3, %v1978_v54  ;;  %v2235_v54 = vld [vmem:[#allocation12 + $0xf8] sm:$0xff] }
0x18d0   :  { %2306 = vmatprep.mubr.f32.mxu0 %v5410_v0  ;;  %2258 = vmatprep.subr.mxu0 %v2235_v54  ;;  %v6164_v54 = vld [vmem:[#allocation13 + $0x10] sm:$0xff] }
0x198f   :  { %v2047_v55 = vpop.f32.mrf.mxu0 }
0x1990   :  { %v2054_v56 = vrot.slane %v2047_v55, 6  ;;  %v2234_v55 = vld [vmem:[#allocation12 + $0xf0] sm:$0xff] }
0x1991   :  { %v2049_v61 = vpop.f32.mrf.mxu0  ;;  %2259 = vmatpush1.msra.mxu0 %v2234_v55 }
0x1992   :  { %v2058_v58 = vadd.f32 %v2054_v56, %v1974_v57  ;;  %v2055_v62 = vrot.slane %v2049_v61, 6  ;;  %v2233_v56 = vld [vmem:[#allocation12 + $0xe8] sm:$0xff]  ;;  %v2232_v57 = vld [vmem:[#allocation12 + $0xe0] sm:$0xff]  ;;  %v2218_v61 = vld [vmem:[#allocation12 + $0x70] sm:$0xff] }
0x1993   :  { %2260 = vmatprep.subr.mxu0 %v2233_v56  ;;  %v6170_v56 = vld [vmem:[#allocation13 + $0x8] sm:$0xff] }
0x1994   :  { %v4730_v59 = vmul.f32 -1.442695, %v2058_v58  ;;  %v2059_v3 = vadd.f32 %v2055_v62, %v1975_v63  ;;  %v2219_v58 = vld [vmem:[#allocation12 + $0x78] sm:$0xff]  ;;  %v2230_v62 = vld [vmem:[#allocation12 + $0xd0] sm:$0xff]  ;;  %v2217_v63 = vld [vmem:[#allocation12 + $0x68] sm:$0xff]  ;;  %2261 = vmatpush1.msra.mxu0 %v2232_v57 }
0x1995   :  { %2341 = vmatprep.subr.mxu1 %v2219_v58  ;;  %v6176_v57 = vld [vmem:[#allocation13] sm:$0xff]  ;;  %v2402_v58 = vld [vmem:[%s6701_s9] sm:$0x3] }
0x1996   :  { %5027 = vpow2.f32 %v4730_v59  ;;  %v4731_v17 = vmul.f32 -1.442695, %v2059_v3  ;;  %v2231_v59 = vld [vmem:[#allocation12 + $0xd8] sm:$0xff] }
0x1997   :  { %5029 = vtanh.f32 %v2059_v3  ;;  %v2216_v3 = vld [vmem:[#allocation12 + $0x60] sm:$0xff]  ;;  %2262 = vmatprep.subr.mxu0 %v2231_v59 }
0x1998   :  { %2263 = vmatpush1.msra.mxu0 %v2230_v62 }
0x19a3   :  { %v5028_v5 = vpop.eup %5027 }
0x19a4   :  { %v2063_v11 = vadd.f32 1.0, %v5028_v5  ;;  %v5030_v24 = vpop.eup %5029  ;;  %v2229_v5 = vld [vmem:[#allocation12 + $0xc8] sm:$0xff] }
0x19a5   :  { %2264 = vmatprep.subr.mxu0 %v2229_v5 }
0x19a6   :  { %5031 = vrcp.f32 %v2063_v11 }
0x19a7   :  { %5033 = vpow2.f32 %v4731_v17  ;;  %v2227_v17 = vld [vmem:[#allocation12 + $0xb8] sm:$0xff] }
0x19b3   :  { %v5032_v27 = vpop.eup %5031 }
0x19b4   :  { %v2077_v29 = vmul.f32 %v5032_v27, %v5030_v24  ;;  %v2076_v31 = vmul.f32 %v5032_v27, %v2074_v25  ;;  %v5034_v23 = vpop.eup %5033 }
0x19b5   :  { %v2070_v36 = vadd.f32 1.0, %v5034_v23  ;;  %v2215_v23 = vld [vmem:[#allocation12 + $0x58] sm:$0xff] }
0x19b6   :  { %2079 = vrot.lane.b32.xlu0 %v2077_v29, %s5411_s3 }
0x19b7   :  { %5035 = vrcp.f32 %v2070_v36  ;;  %v2226_v36 = vld [vmem:[#allocation12 + $0xb0] sm:$0xff] }
0x19c4   :  { %v5036_v30 = vpop.eup %5035 }
0x1a28   :  { %v2080_v37 = vpop.permute.xlu0 %2079 }
0x1a29   :  { %v6070_v38 = vadd.f32 %v2080_v37, %v2076_v31  ;;  %v2214_v37 = vld [vmem:[#allocation12 + $0x50] sm:$0xff] }
0x1a2b   :  { %5037 = vtanh.f32 %v6070_v38  ;;  %v2184_v48 = vrot.slane %v6070_v38, 2  ;;  %v2225_v38 = vld [vmem:[#allocation12 + $0xa8] sm:$0xff] }
0x1a38   :  { %v5038_v40 = vpop.eup %5037 }
0x1a39   :  { %v2084_v32 = vmul.f32 %v5038_v40, %v5036_v30  ;;  %v2213_v30 = vld [vmem:[#allocation12 + $0x48] sm:$0xff]  ;;  %v2224_v40 = vld [vmem:[#allocation12 + $0xa0] sm:$0xff] }
0x1a3b   :  { %v2092_v33 = vrot.slane %v2084_v32, 2 }
0x1a3d   :  { %2093 = vrot.lane.b32.xlu1 %v2092_v33, %s5411_s3  ;;  %v2223_v33 = vld [vmem:[#allocation12 + $0x98] sm:$0xff] }
0x1a41   :  { %1854 = vrot.lane.b32.xlu1 %v6041_v39, %s5411_s3  ;;  %v4707_v39 = vmul.f32 -1.442695, %v5943_v60 }
0x1a43   :  { %5039 = vpow2.f32 %v4707_v39  ;;  %v2222_v39 = vld [vmem:[#allocation12 + $0x90] sm:$0xff] }
0x1a45   :  { %2086 = vrot.lane.b32.xlu1 %v2084_v32, %s5411_s3  ;;  %v2212_v32 = vld [vmem:[#allocation12 + $0x40] sm:$0xff] }
0x1a49   :  { %480 = vrot.lane.b32.xlu1 %v5724_v41, %s5411_s3 }
0x1a4d   :  { %714 = vrot.lane.b32.xlu1 %v5770_v51, %s5411_s3 }
0x1a51   :  { %1515 = vrot.lane.b32.xlu1 %v5975_v35, %s5411_s3  ;;  %v5040_v35 = vpop.eup %5039 }
0x1a52   :  { %v1154_v6 = vadd.f32 1.0, %v5040_v35  ;;  %v2208_v35 = vld [vmem:[#allocation12 + $0x20] sm:$0xff] }
0x1a54   :  { %5041 = vrcp.f32 %v1154_v6  ;;  %v6104_v6 = vld [vmem:[#allocation13 + $0x78] sm:$0xff] }
0x1a55   :  { %1163 = vrot.lane.b32.xlu1 %v5947_v13, %s5411_s3 }
0x1a59   :  { %938 = vrot.lane.b32.xlu1 %v5812_v43, %s5411_s3 }
0x1a61   :  { %v5042_v16 = vpop.eup %5041 }
0x1aaf   :  { %v2094_v4 = vpop.permute.xlu1 %2093 }
0x1ab0   :  { %4732 = vmatmul.mubr.msk.f32.vlgmr.msra.gmra.mxu1 %vm266_vm3, %v2094_v4  ;;  %v2211_v4 = vld [vmem:[#allocation12 + $0x38] sm:$0xff] }
0x1ab1   :  { %2389 = vmatprep.mubr.f32.mxu1 %v5410_v0  ;;  %2342 = vmatpush1.msra.mxu1 %v2218_v61  ;;  %v6215_v61 = vrot.slane %v2402_v58, %v5688_v26 }
0x1ab2   :  { %2343 = vmatprep.subr.mxu1 %v2217_v63 }
0x1ab3   :  { %v1855_v41 = vpop.permute.xlu1 %1854  ;;  %2344 = vmatpush1.msra.mxu1 %v2216_v3  ;;  %v6218_v3 = vrot.slane %v2402_v58, %v5693_v28 }
0x1ab4   :  { %1857 = vst.msk [vmem:[#allocation4] sm:$0xc0] %vm717_vm4, %v1855_v41  ;;  %2345 = vmatprep.subr.mxu1 %v2215_v23  ;;  %v2210_v41 = vld [vmem:[#allocation12 + $0x30] sm:$0xff] }
0x1ab5   :  { %2346 = vmatpush1.msra.mxu1 %v2214_v37 }
0x1ab6   :  { %2347 = vmatprep.subr.mxu1 %v2213_v30 }
0x1ab7   :  { %v2087_v51 = vpop.permute.xlu1 %2086  ;;  %2348 = vmatpush1.msra.mxu1 %v2212_v32 }
0x1ab8   :  { %2089 = vst.msk [vmem:[#allocation4] sm:$0xc] %vm483_vm5, %v2087_v51  ;;  %2349 = vmatprep.subr.mxu1 %v2211_v4  ;;  %v2221_v51 = vld [vmem:[#allocation12 + $0x88] sm:$0xff] }
0x1ab9   :  { %2350 = vmatpush1.msra.mxu1 %v2210_v41 }
0x1abb   :  { %v481_v13 = vpop.permute.xlu1 %480 }
0x1abc   :  { %484 = vst.msk [vmem:[#allocation3] sm:$0xc] %vm483_vm5, %v481_v13  ;;  %v2209_v13 = vld [vmem:[#allocation12 + $0x28] sm:$0xff] }
0x1abd   :  { %2351 = vmatprep.subr.mxu1 %v2209_v13 }
0x1abe   :  { %2352 = vmatpush1.msra.mxu1 %v2208_v35 }
0x1abf   :  { %v715_v43 = vpop.permute.xlu1 %714 }
0x1ac0   :  { %718 = vst.msk [vmem:[#allocation3] sm:$0xc0] %vm717_vm4, %v715_v43  ;;  %v2220_v43 = vld [vmem:[#allocation12 + $0x80] sm:$0xff] }
0x1ac3   :  { %v1516_v60 = vpop.permute.xlu1 %1515 }
0x1ac4   :  { %1518 = vst.msk [vmem:[#allocation4 + $0x8] sm:$0x30] %vm600_vm6, %v1516_v60  ;;  %v2207_v60 = vld [vmem:[#allocation12 + $0x18] sm:$0xff] }
0x1ac5   :  { %2353 = vmatprep.subr.mxu1 %v2207_v60 }
0x1ac7   :  { %v1164_v8 = vpop.permute.xlu1 %1163 }
0x1ac8   :  { %v1166_v10 = vadd.f32 %v1164_v8, %v5949_v12  ;;  %v2091_v12 = vld [vmem:[#allocation2] sm:$0x3] }
0x1ac9   :  { %v2206_v8 = vld [vmem:[#allocation12 + $0x10] sm:$0xff] }
0x1aca   :  { %5043 = vtanh.f32 %v1166_v10  ;;  %2354 = vmatpush1.msra.mxu1 %v2206_v8 }
0x1acb   :  { %v939_v14 = vpop.permute.xlu1 %938 }
0x1acc   :  { %941 = vst.msk [vmem:[#allocation3 + $0x8] sm:$0xc] %vm483_vm5, %v939_v14  ;;  %v2205_v14 = vld [vmem:[#allocation12 + $0x8] sm:$0xff] }
0x1acd   :  { %2355 = vmatprep.subr.mxu1 %v2205_v14 }
0x1ad7   :  { %v5044_v47 = vpop.eup %5043 }
0x1ad8   :  { %v1168_v18 = vmul.f32 %v5044_v47, %v5042_v16  ;;  %v2204_v47 = vld [vmem:[#allocation12] sm:$0xff] }
0x1ad9   :  { %2356 = vmatpush1.msra.mxu1 %v2204_v47 }
0x1ada   :  { %1170 = vrot.lane.b32.xlu1 %v1168_v18, %s5411_s3  ;;  %2560 = vmatprep.subr.mxu1 %v6104_v6 }
0x1b4c   :  { %v1171_v19 = vpop.permute.xlu1 %1170 }
0x1b4d   :  { %1173 = vst.msk [vmem:[#allocation3 + $0x8] sm:$0xc0] %vm717_vm4, %v1171_v19 }
0x1b70   :  { %v2163_v21 = vpop.f32.mrf.mxu1 }
0x1b71   :  { %v2168_v7 = vadd.f32 %v2163_v21, %v2090_v20  ;;  %v6117_v21 = vld [vmem:[#allocation13 + $0x70] sm:$0xff] }
0x1b72   :  { %v2165_v42 = vpop.f32.mrf.mxu1 }
0x1b73   :  { %v4733_v34 = vmul.f32 -1.442695, %v2168_v7  ;;  %v2169_v22 = vadd.f32 %v2165_v42, %v2091_v12  ;;  %v6121_v42 = vld [vmem:[#allocation13 + $0x68] sm:$0xff] }
0x1b75   :  { %5045 = vpow2.f32 %v4733_v34  ;;  %v4734_v11 = vmul.f32 -1.442695, %v2169_v22 }
0x1b76   :  { %5047 = vtanh.f32 %v2169_v22 }
0x1b82   :  { %v5046_v2 = vpop.eup %5045 }
0x1b83   :  { %v2173_v44 = vadd.f32 1.0, %v5046_v2  ;;  %v5048_v46 = vpop.eup %5047  ;;  %v6136_v2 = vld [vmem:[#allocation13 + $0x48] sm:$0xff] }
0x1b85   :  { %5049 = vrcp.f32 %v2173_v44  ;;  %v6141_v44 = vld [vmem:[#allocation13 + $0x40] sm:$0xff] }
0x1b86   :  { %5051 = vpow2.f32 %v4734_v11 }
0x1b92   :  { %v5050_v49 = vpop.eup %5049 }
0x1b93   :  { %v2187_v50 = vmul.f32 %v5050_v49, %v5048_v46  ;;  %v2186_v53 = vmul.f32 %v5050_v49, %v2184_v48  ;;  %v5052_v24 = vpop.eup %5051  ;;  %v6144_v46 = vld [vmem:[#allocation13 + $0x38] sm:$0xff]  ;;  %v6148_v48 = vld [vmem:[#allocation13 + $0x30] sm:$0xff]  ;;  %v6152_v49 = vld [vmem:[#allocation13 + $0x28] sm:$0xff] }
0x1b94   :  { %v2180_v25 = vadd.f32 1.0, %v5052_v24 }
0x1b95   :  { %2189 = vrot.lane.b32.xlu0 %v2187_v50, %s5411_s3  ;;  %v6156_v50 = vld [vmem:[#allocation13 + $0x20] sm:$0xff] }
0x1b96   :  { %5053 = vrcp.f32 %v2180_v25 }
0x1b99   :  { %1970 = vrot.lane.b32.xlu0 %v6063_v52, %s5411_s3  ;;  %v2228_v52 = vld [vmem:[#allocation12 + $0xc0] sm:$0xff] }
0x1b9a   :  { %2265 = vmatpush1.msra.mxu0 %v2228_v52 }
0x1b9b   :  { %2266 = vmatprep.subr.mxu0 %v2227_v17 }
0x1b9c   :  { %2267 = vmatpush1.msra.mxu0 %v2226_v36 }
0x1b9d   :  { %2268 = vmatprep.subr.mxu0 %v2225_v38 }
0x1b9e   :  { %2269 = vmatpush1.msra.mxu0 %v2224_v40 }
0x1b9f   :  { %2270 = vmatprep.subr.mxu0 %v2223_v33 }
0x1ba0   :  { %2271 = vmatpush1.msra.mxu0 %v2222_v39 }
0x1ba1   :  { %2272 = vmatprep.subr.mxu0 %v2221_v51 }
0x1ba2   :  { %2273 = vmatpush1.msra.mxu0 %v2220_v43 }
0x1ba3   :  { %v5054_v10 = vpop.eup %5053  ;;  %2456 = vmatprep.subr.mxu0 %v6104_v6 }
0x1c07   :  { %v2190_v27 = vpop.permute.xlu0 %2189 }
0x1c08   :  { %v2192_v29 = vadd.f32 %v2190_v27, %v2186_v53  ;;  %v6160_v53 = vld [vmem:[#allocation13 + $0x18] sm:$0xff] }
0x1c0a   :  { %5055 = vtanh.f32 %v2192_v29 }
0x1c0b   :  { %v1971_v31 = vpop.permute.xlu0 %1970 }
0x1c0c   :  { %1973 = vst.msk [vmem:[#allocation4] sm:$0x30] %vm600_vm6, %v1971_v31 }
0x1c17   :  { %v5056_v16 = vpop.eup %5055 }
0x1c18   :  { %v2194_v18 = vmul.f32 %v5056_v16, %v5054_v10 }
0x1c1a   :  { %2196 = vrot.lane.b32.xlu0 %v2194_v18, %s5411_s3 }
0x1c1e   :  { %597 = vrot.lane.b32.xlu0 %v5747_v9, %s5411_s3  ;;  %v6126_v9 = vld [vmem:[#allocation13 + $0x60] sm:$0xff] }
0x1c22   :  { %1399 = vrot.lane.b32.xlu0 %v5952_v45, %s5411_s3  ;;  %v6129_v45 = vld [vmem:[#allocation13 + $0x58] sm:$0xff] }
0x1c26   :  { %1631 = vrot.lane.b32.xlu0 %v5998_v1, %s5411_s3  ;;  %v6133_v1 = vld [vmem:[#allocation13 + $0x50] sm:$0xff] }
0x1c8c   :  { %v2197_v19 = vpop.permute.xlu0 %2196 }
0x1c8d   :  { %2199 = vst.msk [vmem:[#allocation4] sm:$0x3] %vm369_vm2, %v2197_v19 }
0x1c90   :  { %v598_v20 = vpop.permute.xlu0 %597 }
0x1c91   :  { %601 = vst.msk [vmem:[#allocation3] sm:$0x30] %vm600_vm6, %v598_v20 }
0x1c94   :  { %v1400_v7 = vpop.permute.xlu0 %1399  ;;  %v6119_v34 = vld [vmem:[#allocation4] sm:$0xff] }
0x1c95   :  { %1402 = vst.msk [vmem:[#allocation4 + $0x8] sm:$0xc0] %vm717_vm4, %v1400_v7  ;;  %4735 = vmatmul.mubr.msk.f32.vlgmr.msra.gmra.mxu0 %vm266_vm3, %v6119_v34 }
0x1c96   :  { %2457 = vmatpush1.msra.mxu0 %v6117_v21  ;;  %2312 = vmatprep.mubr.f32.mxu0 %v5410_v0 }
0x1c97   :  { %2458 = vmatprep.subr.mxu0 %v6121_v42 }
0x1c98   :  { %v1632_v12 = vpop.permute.xlu0 %1631  ;;  %2459 = vmatpush1.msra.mxu0 %v6126_v9  ;;  %v2200_v22 = vld [vmem:[#allocation3] sm:$0xff] }
0x1c99   :  { %1634 = vst.msk [vmem:[#allocation4 + $0x8] sm:$0xc] %vm483_vm5, %v1632_v12  ;;  %4737 = vmatmul.mubr.msk.f32.vlgmr.msra.gmra.mxu1 %vm266_vm3, %v2200_v22  ;;  %2460 = vmatprep.subr.mxu0 %v6129_v45 }
0x1c9a   :  { %2461 = vmatpush1.msra.mxu0 %v6133_v1  ;;  %2395 = vmatprep.mubr.f32.mxu1 %v5410_v0 }
0x1c9b   :  { %2462 = vmatprep.subr.mxu0 %v6136_v2  ;;  %2561 = vmatpush1.msra.mxu1 %v6117_v21 }
0x1c9c   :  { %2463 = vmatpush1.msra.mxu0 %v6141_v44  ;;  %2562 = vmatprep.subr.mxu1 %v6121_v42 }
0x1c9d   :  { %2464 = vmatprep.subr.mxu0 %v6144_v46  ;;  %2563 = vmatpush1.msra.mxu1 %v6126_v9 }
0x1c9e   :  { %2465 = vmatpush1.msra.mxu0 %v6148_v48  ;;  %2564 = vmatprep.subr.mxu1 %v6129_v45 }
0x1c9f   :  { %2466 = vmatprep.subr.mxu0 %v6152_v49  ;;  %2565 = vmatpush1.msra.mxu1 %v6133_v1 }
0x1ca0   :  { %2467 = vmatpush1.msra.mxu0 %v6156_v50  ;;  %v6168_v55 = vld [vmem:[#allocation4 + $0x8] sm:$0xff]  ;;  %2566 = vmatprep.subr.mxu1 %v6136_v2 }
0x1ca1   :  { %4736 = vmatmul.mubr.msk.f32.gmra.mxu0 %vm266_vm3, %v6168_v55  ;;  %2468 = vmatprep.subr.mxu0 %v6160_v53 }
0x1ca2   :  { %2469 = vmatpush1.msra.mxu0 %v6164_v54  ;;  %2504 = vmatprep.mubr.f32.mxu0 %v5410_v0 }
0x1ca3   :  { %2470 = vmatprep.subr.mxu0 %v6170_v56  ;;  %2567 = vmatpush1.msra.mxu1 %v6141_v44 }
0x1ca4   :  { %2471 = vmatpush1.msra.mxu0 %v6176_v57  ;;  %2568 = vmatprep.subr.mxu1 %v6144_v46 }
0x1ca5   :  { %2505 = vmatmul.mubr.f32.vlgmr.msra.gmra.mxu0 %v5410_v0  ;;  %2569 = vmatpush1.msra.mxu1 %v6148_v48 }
0x1ca6   :  { %2570 = vmatprep.subr.mxu1 %v6152_v49  ;;  %2676 = vmatprep.subr.mxu0 %v6104_v6 }
0x1ca7   :  { %2571 = vmatpush1.msra.mxu1 %v6156_v50  ;;  %2677 = vmatpush1.msra.mxu0 %v6117_v21 }
0x1ca8   :  { %2572 = vmatprep.subr.mxu1 %v6160_v53  ;;  %2678 = vmatprep.subr.mxu0 %v6121_v42 }
0x1ca9   :  { %2573 = vmatpush1.msra.mxu1 %v6164_v54  ;;  %2679 = vmatpush1.msra.mxu0 %v6126_v9 }
0x1caa   :  { %2574 = vmatprep.subr.mxu1 %v6170_v56  ;;  %2680 = vmatprep.subr.mxu0 %v6129_v45 }
0x1cab   :  { %2575 = vmatpush1.msra.mxu1 %v6176_v57  ;;  %2681 = vmatpush1.msra.mxu0 %v6133_v1 }
0x1cac   :  { %2682 = vmatprep.subr.mxu0 %v6136_v2  ;;  %2724 = vmatprep.mubr.f32.mxu0 %v5410_v0 }
0x1cad   :  { %2683 = vmatpush1.msra.mxu0 %v6141_v44  ;;  %2792 = vmatprep.subr.mxu1 %v6104_v6 }
0x1cae   :  { %2684 = vmatprep.subr.mxu0 %v6144_v46 }
0x1caf   :  { %2685 = vmatpush1.msra.mxu0 %v6148_v48 }
0x1cb0   :  { %2686 = vmatprep.subr.mxu0 %v6152_v49 }
0x1cb1   :  { %2687 = vmatpush1.msra.mxu0 %v6156_v50 }
0x1cb2   :  { %2688 = vmatprep.subr.mxu0 %v6160_v53 }
0x1cb3   :  { %2689 = vmatpush1.msra.mxu0 %v6164_v54 }
0x1cb4   :  { %2690 = vmatprep.subr.mxu0 %v6170_v56 }
0x1cb5   :  { %2691 = vmatpush1.msra.mxu0 %v6176_v57 }
0x1cb6   :  { %2908 = vmatprep.subr.mxu0 %v6104_v6 }
0x1d55   :  { %v2308_v59 = vpop.f32.mrf.mxu0 }
0x1d57   :  { %v2310_v5 = vpop.f32.mrf.mxu0 }
0x1d59   :  { %v2391_v62 = vpop.f32.mrf.mxu1 }
0x1d5a   :  { %v2392_v63 = vadd.f32 %v2391_v62, %v2308_v59 }
0x1d5b   :  { %v2393_v52 = vpop.f32.mrf.mxu1 }
0x1d5c   :  { %v2414_v11 = vadd.f32 %v6215_v61, %v2392_v63  ;;  %v2394_v24 = vadd.f32 %v2393_v52, %v2310_v5 }
0x1d5e   :  { %2418 = vst [vmem:[#allocation2 + $0x10] sm:$0xff] %v2414_v11  ;;  %v2415_v25 = vadd.f32 %v6218_v3, %v2394_v24 }
0x1d60   :  { %2419 = vst [vmem:[#allocation2] sm:$0xff] %v2415_v25 }
0x1d61   :  { %v2314_v27 = vpop.f32.mrf.mxu0 }
0x1d63   :  { %v2316_v29 = vpop.f32.mrf.mxu0 }
0x1d65   :  { %v2438_v31 = vld [vmem:[#allocation2 + $0x10] sm:$0x3]  ;;  %v2506_v17 = vpop.f32.mrf.mxu0  ;;  %v2540_v62 = vld [vmem:[#allocation2 + $0x10] sm:$0xc] }
0x1d66   :  { %v2511_v23 = vadd.f32 %v2506_v17, %v2438_v31 }
0x1d67   :  { %v2439_v37 = vld [vmem:[#allocation2] sm:$0x3]  ;;  %v2508_v38 = vpop.f32.mrf.mxu0  ;;  %v2541_v24 = vld [vmem:[#allocation2] sm:$0xc] }
0x1d68   :  { %v4739_v36 = vmul.f32 -1.442695, %v2511_v23  ;;  %v2512_v30 = vadd.f32 %v2508_v38, %v2439_v37 }
0x1d6a   :  { %5057 = vpow2.f32 %v4739_v36  ;;  %v4740_v41 = vmul.f32 -1.442695, %v2512_v30 }
0x1d6b   :  { %5059 = vtanh.f32 %v2512_v30 }
0x1d77   :  { %v5058_v40 = vpop.eup %5057 }
0x1d78   :  { %v2516_v32 = vadd.f32 1.0, %v5058_v40  ;;  %v5060_v33 = vpop.eup %5059 }
0x1d7a   :  { %5061 = vrcp.f32 %v2516_v32 }
0x1d7b   :  { %5063 = vpow2.f32 %v4740_v41 }
0x1d87   :  { %v5062_v4 = vpop.eup %5061 }
0x1d88   :  { %v2527_v39 = vmul.f32 %v5062_v4, %v5060_v33  ;;  %v5064_v51 = vpop.eup %5063  ;;  %v2526_v43 = vmul.f32 0.0, %v5062_v4 }
0x1d89   :  { %v2523_v13 = vadd.f32 1.0, %v5064_v51 }
0x1d8a   :  { %2529 = vrot.lane.b32.xlu0 %v2527_v39, %s5411_s3 }
0x1d8b   :  { %5065 = vrcp.f32 %v2523_v13 }
0x1d8e   :  { %1054 = vrot.lane.b32.xlu0 %v5872_v15, %s5411_s3 }
0x1d98   :  { %v5066_v15 = vpop.eup %5065 }
0x1dfc   :  { %v2530_v35 = vpop.permute.xlu0 %2529 }
0x1dfd   :  { %v2532_v60 = vadd.f32 %v2530_v35, %v2526_v43  ;;  %v2653_v43 = vld [vmem:[#allocation2 + $0x10] sm:$0x30] }
0x1dff   :  { %5067 = vtanh.f32 %v2532_v60 }
0x1e00   :  { %v1055_v8 = vpop.permute.xlu0 %1054 }
0x1e01   :  { %1057 = vst.msk [vmem:[#allocation3 + $0x8] sm:$0x30] %vm600_vm6, %v1055_v8 }
0x1e08   :  { %v6226_v10 = vld [vmem:[#allocation3 + $0x8] sm:$0xff] }
0x1e09   :  { %4738 = vmatmul.mubr.msk.f32.gmra.mxu1 %vm266_vm3, %v6226_v10 }
0x1e0a   :  { %2608 = vmatprep.mubr.f32.mxu1 %v5410_v0 }
0x1e0c   :  { %v5068_v14 = vpop.eup %5067 }
0x1e0d   :  { %v2534_v16 = vmul.f32 %v5068_v14, %v5066_v15  ;;  %v2654_v14 = vld [vmem:[#allocation2] sm:$0x30] }
0x1e0f   :  { %2536 = vrot.lane.b32.xlu0 %v2534_v16, %s5411_s3 }
0x1e81   :  { %v2537_v47 = vpop.permute.xlu0 %2536 }
0x1e82   :  { %2539 = vst.msk [vmem:[#allocation5] sm:$0x3] %vm369_vm2, %v2537_v47  ;;  %4741 = vmatmul.mubr.msk.f32.vlgmr.msra.gmra.mxu1 %vm266_vm3, %v2537_v47 }
0x1e83   :  { %2793 = vmatpush1.msra.mxu1 %v6117_v21  ;;  %2840 = vmatprep.mubr.f32.mxu1 %v5410_v0 }
0x1e84   :  { %2794 = vmatprep.subr.mxu1 %v6121_v42 }
0x1e85   :  { %2795 = vmatpush1.msra.mxu1 %v6126_v9 }
0x1e86   :  { %2796 = vmatprep.subr.mxu1 %v6129_v45 }
0x1e87   :  { %2797 = vmatpush1.msra.mxu1 %v6133_v1 }
0x1e88   :  { %2798 = vmatprep.subr.mxu1 %v6136_v2 }
0x1e89   :  { %2799 = vmatpush1.msra.mxu1 %v6141_v44 }
0x1e8a   :  { %2800 = vmatprep.subr.mxu1 %v6144_v46 }
0x1e8b   :  { %2801 = vmatpush1.msra.mxu1 %v6148_v48 }
0x1e8c   :  { %2802 = vmatprep.subr.mxu1 %v6152_v49 }
0x1e8d   :  { %2803 = vmatpush1.msra.mxu1 %v6156_v50 }
0x1e8e   :  { %2804 = vmatprep.subr.mxu1 %v6160_v53 }
0x1e8f   :  { %2805 = vmatpush1.msra.mxu1 %v6164_v54 }
0x1e90   :  { %2806 = vmatprep.subr.mxu1 %v6170_v56 }
0x1e91   :  { %2807 = vmatpush1.msra.mxu1 %v6176_v57 }
0x1e92   :  { %3015 = vmatprep.subr.mxu1 %v6104_v6 }
0x1ec9   :  { %v2397_v18 = vpop.f32.mrf.mxu1 }
0x1eca   :  { %v2398_v19 = vadd.f32 %v2397_v18, %v2314_v27 }
0x1ecb   :  { %v2399_v20 = vpop.f32.mrf.mxu1 }
0x1ecc   :  { %v2416_v7 = vadd.f32 %v6215_v61, %v2398_v19  ;;  %v2400_v12 = vadd.f32 %v2399_v20, %v2316_v29  ;;  %v2637_v29 = vrot.slane %v2532_v60, 6 }
0x1ece   :  { %2420 = vst [vmem:[#allocation2 + $0x18] sm:$0xff] %v2416_v7  ;;  %v2417_v22 = vadd.f32 %v6218_v3, %v2400_v12 }
0x1ed0   :  { %2421 = vst [vmem:[#allocation2 + $0x8] sm:$0xff] %v2417_v22 }
0x1f42   :  { %v2610_v58 = vpop.f32.mrf.mxu1 }
0x1f43   :  { %v2617_v59 = vrot.slane %v2610_v58, 6 }
0x1f44   :  { %v2612_v52 = vpop.f32.mrf.mxu1 }
0x1f45   :  { %v2621_v63 = vadd.f32 %v2617_v59, %v2540_v62  ;;  %v2618_v11 = vrot.slane %v2612_v52, 6 }
0x1f47   :  { %v4742_v5 = vmul.f32 -1.442695, %v2621_v63  ;;  %v2622_v25 = vadd.f32 %v2618_v11, %v2541_v24 }
0x1f49   :  { %5069 = vpow2.f32 %v4742_v5  ;;  %v4743_v36 = vmul.f32 -1.442695, %v2622_v25 }
0x1f4a   :  { %5071 = vtanh.f32 %v2622_v25 }
0x1f56   :  { %v5070_v31 = vpop.eup %5069 }
0x1f57   :  { %v2626_v27 = vadd.f32 1.0, %v5070_v31  ;;  %v5072_v61 = vpop.eup %5071 }
0x1f59   :  { %5073 = vrcp.f32 %v2626_v27 }
0x1f5a   :  { %5075 = vpow2.f32 %v4743_v36 }
0x1f66   :  { %v5074_v17 = vpop.eup %5073 }
0x1f67   :  { %v2640_v23 = vmul.f32 %v5074_v17, %v5072_v61  ;;  %v2639_v3 = vmul.f32 %v5074_v17, %v2637_v29  ;;  %v5076_v37 = vpop.eup %5075  ;;  %v2769_v29 = vld [vmem:[#allocation2 + $0x10] sm:$0xc0] }
0x1f68   :  { %v2633_v38 = vadd.f32 1.0, %v5076_v37  ;;  %v2770_v37 = vld [vmem:[#allocation2] sm:$0xc0] }
0x1f69   :  { %2642 = vrot.lane.b32.xlu1 %v2640_v23, %s5411_s3 }
0x1f6a   :  { %5077 = vrcp.f32 %v2633_v38 }
0x1f77   :  { %v5078_v32 = vpop.eup %5077 }
0x1fdb   :  { %v2643_v30 = vpop.permute.xlu1 %2642 }
0x1fdc   :  { %v2645_v40 = vadd.f32 %v2643_v30, %v2639_v3 }
0x1fde   :  { %5079 = vtanh.f32 %v2645_v40  ;;  %v2753_v20 = vrot.slane %v2645_v40, 6 }
0x1feb   :  { %v5080_v33 = vpop.eup %5079 }
0x1fec   :  { %v6254_v4 = vmul.f32 %v5080_v33, %v5078_v32 }
0x1fee   :  { %v2655_v39 = vrot.slane %v6254_v4, 2 }
0x1ff0   :  { %2656 = vrot.lane.b32.xlu0 %v2655_v39, %s5411_s3 }
0x2062   :  { %v2657_v41 = vpop.permute.xlu0 %2656 }
0x2063   :  { %4744 = vmatmul.mubr.msk.f32.vlgmr.msra.gmra.mxu0 %vm266_vm3, %v2657_v41 }
0x2064   :  { %2909 = vmatpush1.msra.mxu0 %v6117_v21  ;;  %2956 = vmatprep.mubr.f32.mxu0 %v5410_v0 }
0x2065   :  { %2910 = vmatprep.subr.mxu0 %v6121_v42 }
0x2066   :  { %2911 = vmatpush1.msra.mxu0 %v6126_v9 }
0x2067   :  { %2912 = vmatprep.subr.mxu0 %v6129_v45 }
0x2068   :  { %2913 = vmatpush1.msra.mxu0 %v6133_v1 }
0x2069   :  { %2914 = vmatprep.subr.mxu0 %v6136_v2 }
0x206a   :  { %2915 = vmatpush1.msra.mxu0 %v6141_v44 }
0x206b   :  { %2916 = vmatprep.subr.mxu0 %v6144_v46 }
0x206c   :  { %2917 = vmatpush1.msra.mxu0 %v6148_v48 }
0x206d   :  { %2918 = vmatprep.subr.mxu0 %v6152_v49 }
0x206e   :  { %2919 = vmatpush1.msra.mxu0 %v6156_v50 }
0x206f   :  { %2920 = vmatprep.subr.mxu0 %v6160_v53 }
0x2070   :  { %2921 = vmatpush1.msra.mxu0 %v6164_v54 }
0x2071   :  { %2922 = vmatprep.subr.mxu0 %v6170_v56 }
0x2072   :  { %2923 = vmatpush1.msra.mxu0 %v6176_v57 }
0x2073   :  { %3131 = vmatprep.subr.mxu0 %v6104_v6 }
0x2123   :  { %v2726_v51 = vpop.f32.mrf.mxu0 }
0x2124   :  { %v2733_v13 = vrot.slane %v2726_v51, 4 }
0x2125   :  { %v2728_v8 = vpop.f32.mrf.mxu0 }
0x2126   :  { %v2737_v35 = vadd.f32 %v2733_v13, %v2653_v43  ;;  %v2734_v15 = vrot.slane %v2728_v8, 4 }
0x2128   :  { %v4745_v60 = vmul.f32 -1.442695, %v2737_v35  ;;  %v2738_v16 = vadd.f32 %v2734_v15, %v2654_v14 }
0x212a   :  { %5081 = vpow2.f32 %v4745_v60  ;;  %v4746_v58 = vmul.f32 -1.442695, %v2738_v16 }
0x212b   :  { %5083 = vtanh.f32 %v2738_v16 }
0x2137   :  { %v5082_v47 = vpop.eup %5081 }
0x2138   :  { %v2742_v18 = vadd.f32 1.0, %v5082_v47  ;;  %v5084_v19 = vpop.eup %5083 }
0x213a   :  { %5085 = vrcp.f32 %v2742_v18  ;;  %v2885_v18 = vld [vmem:[#allocation2 + $0x18] sm:$0x3] }
0x213b   :  { %5087 = vpow2.f32 %v4746_v58 }
0x2147   :  { %v5086_v7 = vpop.eup %5085 }
0x2148   :  { %v2756_v12 = vmul.f32 %v5086_v7, %v5084_v19  ;;  %v2755_v22 = vmul.f32 %v5086_v7, %v2753_v20  ;;  %v5088_v59 = vpop.eup %5087 }
0x2149   :  { %v2749_v62 = vadd.f32 1.0, %v5088_v59 }
0x214a   :  { %2758 = vrot.lane.b32.xlu1 %v2756_v12, %s5411_s3 }
0x214b   :  { %5089 = vrcp.f32 %v2749_v62 }
0x2158   :  { %v5090_v52 = vpop.eup %5089 }
0x21bc   :  { %v2759_v63 = vpop.permute.xlu1 %2758 }
0x21bd   :  { %v2761_v5 = vadd.f32 %v2759_v63, %v2755_v22  ;;  %v2886_v22 = vld [vmem:[#allocation2 + $0x8] sm:$0x3] }
0x21bf   :  { %5091 = vtanh.f32 %v2761_v5  ;;  %v2869_v33 = vrot.slane %v2761_v5, 6 }
0x21cc   :  { %v5092_v11 = vpop.eup %5091 }
0x21cd   :  { %v6277_v24 = vmul.f32 %v5092_v11, %v5090_v52 }
0x21cf   :  { %v2771_v25 = vrot.slane %v6277_v24, 4 }
0x21d1   :  { %2772 = vrot.lane.b32.xlu0 %v2771_v25, %s5411_s3 }
0x2243   :  { %v2773_v31 = vpop.permute.xlu0 %2772 }
0x2244   :  { %4747 = vmatmul.mubr.msk.f32.vlgmr.msra.gmra.mxu1 %vm266_vm3, %v2773_v31 }
0x2245   :  { %3016 = vmatpush1.msra.mxu1 %v6117_v21  ;;  %3063 = vmatprep.mubr.f32.mxu1 %v5410_v0 }
0x2246   :  { %3017 = vmatprep.subr.mxu1 %v6121_v42 }
0x2247   :  { %3018 = vmatpush1.msra.mxu1 %v6126_v9 }
0x2248   :  { %3019 = vmatprep.subr.mxu1 %v6129_v45 }
0x2249   :  { %3020 = vmatpush1.msra.mxu1 %v6133_v1 }
0x224a   :  { %3021 = vmatprep.subr.mxu1 %v6136_v2 }
0x224b   :  { %3022 = vmatpush1.msra.mxu1 %v6141_v44 }
0x224c   :  { %3023 = vmatprep.subr.mxu1 %v6144_v46 }
0x224d   :  { %3024 = vmatpush1.msra.mxu1 %v6148_v48 }
0x224e   :  { %3025 = vmatprep.subr.mxu1 %v6152_v49 }
0x224f   :  { %3026 = vmatpush1.msra.mxu1 %v6156_v50 }
0x2250   :  { %3027 = vmatprep.subr.mxu1 %v6160_v53 }
0x2251   :  { %3028 = vmatpush1.msra.mxu1 %v6164_v54 }
0x2252   :  { %3029 = vmatprep.subr.mxu1 %v6170_v56 }
0x2253   :  { %3030 = vmatpush1.msra.mxu1 %v6176_v57 }
0x2254   :  { %3247 = vmatprep.subr.mxu1 %v6104_v6 }
0x2304   :  { %v2842_v27 = vpop.f32.mrf.mxu1 }
0x2305   :  { %v2849_v61 = vrot.slane %v2842_v27, 2 }
0x2306   :  { %v2844_v3 = vpop.f32.mrf.mxu1 }
0x2307   :  { %v2853_v17 = vadd.f32 %v2849_v61, %v2769_v29  ;;  %v2850_v36 = vrot.slane %v2844_v3, 2 }
0x2309   :  { %v4748_v23 = vmul.f32 -1.442695, %v2853_v17  ;;  %v2854_v38 = vadd.f32 %v2850_v36, %v2770_v37 }
0x230b   :  { %5093 = vpow2.f32 %v4748_v23  ;;  %v4749_v6 = vmul.f32 -1.442695, %v2854_v38 }
0x230c   :  { %5095 = vtanh.f32 %v2854_v38 }
0x2318   :  { %v5094_v30 = vpop.eup %5093 }
0x2319   :  { %v2858_v40 = vadd.f32 1.0, %v5094_v30  ;;  %v5096_v32 = vpop.eup %5095 }
0x231b   :  { %5097 = vrcp.f32 %v2858_v40 }
0x231c   :  { %5099 = vpow2.f32 %v4749_v6 }
0x2328   :  { %v5098_v39 = vpop.eup %5097 }
0x2329   :  { %v2872_v41 = vmul.f32 %v5098_v39, %v5096_v32  ;;  %v2871_v51 = vmul.f32 %v5098_v39, %v2869_v33  ;;  %v5100_v13 = vpop.eup %5099 }
0x232a   :  { %v2865_v43 = vadd.f32 1.0, %v5100_v13 }
0x232b   :  { %2874 = vrot.lane.b32.xlu1 %v2872_v41, %s5411_s3 }
0x232c   :  { %5101 = vrcp.f32 %v2865_v43 }
0x2339   :  { %v5102_v8 = vpop.eup %5101 }
0x239d   :  { %v2875_v35 = vpop.permute.xlu1 %2874 }
0x239e   :  { %v2877_v60 = vadd.f32 %v2875_v35, %v2871_v51  ;;  %v3370_v35 = vld [vmem:[#allocation15 + $0xf0] sm:$0xff] }
0x23a0   :  { %5103 = vtanh.f32 %v2877_v60  ;;  %v2979_v5 = vrot.slane %v2877_v60, 6 }
0x23ad   :  { %v5104_v15 = vpop.eup %5103 }
0x23ae   :  { %v6300_v14 = vmul.f32 %v5104_v15, %v5102_v8  ;;  %v3369_v8 = vld [vmem:[#allocation15 + $0xe8] sm:$0xff]  ;;  %v3368_v15 = vld [vmem:[#allocation15 + $0xe0] sm:$0xff] }
0x23b0   :  { %v2887_v16 = vrot.slane %v6300_v14, 6 }
0x23b2   :  { %2888 = vrot.lane.b32.xlu0 %v2887_v16, %s5411_s3  ;;  %v3367_v16 = vld [vmem:[#allocation15 + $0xd8] sm:$0xff] }
0x2424   :  { %v2889_v47 = vpop.permute.xlu0 %2888 }
0x2425   :  { %4750 = vmatmul.mubr.msk.f32.vlgmr.msra.gmra.mxu0 %vm266_vm3, %v2889_v47  ;;  %v3366_v47 = vld [vmem:[#allocation15 + $0xd0] sm:$0xff] }
0x2426   :  { %3132 = vmatpush1.msra.mxu0 %v6117_v21  ;;  %3179 = vmatprep.mubr.f32.mxu0 %v5410_v0 }
0x2427   :  { %3133 = vmatprep.subr.mxu0 %v6121_v42 }
0x2428   :  { %3134 = vmatpush1.msra.mxu0 %v6126_v9 }
0x2429   :  { %3135 = vmatprep.subr.mxu0 %v6129_v45 }
0x242a   :  { %3136 = vmatpush1.msra.mxu0 %v6133_v1 }
0x242b   :  { %3137 = vmatprep.subr.mxu0 %v6136_v2 }
0x242c   :  { %3138 = vmatpush1.msra.mxu0 %v6141_v44 }
0x242d   :  { %3139 = vmatprep.subr.mxu0 %v6144_v46 }
0x242e   :  { %3140 = vmatpush1.msra.mxu0 %v6148_v48 }
0x242f   :  { %3141 = vmatprep.subr.mxu0 %v6152_v49 }
0x2430   :  { %3142 = vmatpush1.msra.mxu0 %v6156_v50 }
0x2431   :  { %3143 = vmatprep.subr.mxu0 %v6160_v53 }
0x2432   :  { %3144 = vmatpush1.msra.mxu0 %v6164_v54 }
0x2433   :  { %3145 = vmatprep.subr.mxu0 %v6170_v56 }
0x2434   :  { %3146 = vmatpush1.msra.mxu0 %v6176_v57 }
0x24e5   :  { %v2958_v19 = vpop.f32.mrf.mxu0 }
0x24e6   :  { %v2963_v20 = vadd.f32 %v2958_v19, %v2885_v18  ;;  %v3365_v18 = vld [vmem:[#allocation15 + $0xc8] sm:$0xff]  ;;  %v3364_v19 = vld [vmem:[#allocation15 + $0xc0] sm:$0xff] }
0x24e7   :  { %v2960_v12 = vpop.f32.mrf.mxu0 }
0x24e8   :  { %v4751_v7 = vmul.f32 -1.442695, %v2963_v20  ;;  %v2964_v58 = vadd.f32 %v2960_v12, %v2886_v22  ;;  %v3363_v20 = vld [vmem:[#allocation15 + $0xb8] sm:$0xff]  ;;  %v3361_v12 = vld [vmem:[#allocation15 + $0xa8] sm:$0xff]  ;;  %v3360_v22 = vld [vmem:[#allocation15 + $0xa0] sm:$0xff] }
0x24ea   :  { %5105 = vpow2.f32 %v4751_v7  ;;  %v4752_v31 = vmul.f32 -1.442695, %v2964_v58  ;;  %v3362_v7 = vld [vmem:[#allocation15 + $0xb0] sm:$0xff] }
0x24eb   :  { %5107 = vtanh.f32 %v2964_v58  ;;  %v3359_v58 = vld [vmem:[#allocation15 + $0x98] sm:$0xff] }
0x24f7   :  { %v5106_v59 = vpop.eup %5105 }
0x24f8   :  { %v2968_v62 = vadd.f32 1.0, %v5106_v59  ;;  %v5108_v63 = vpop.eup %5107  ;;  %v3358_v59 = vld [vmem:[#allocation15 + $0x90] sm:$0xff] }
0x24fa   :  { %5109 = vrcp.f32 %v2968_v62  ;;  %v3357_v62 = vld [vmem:[#allocation15 + $0x88] sm:$0xff] }
0x24fb   :  { %5111 = vpow2.f32 %v4752_v31 }
0x2507   :  { %v5110_v52 = vpop.eup %5109 }
0x2508   :  { %v2982_v11 = vmul.f32 %v5110_v52, %v5108_v63  ;;  %v2981_v25 = vmul.f32 %v5110_v52, %v2979_v5  ;;  %v5112_v27 = vpop.eup %5111  ;;  %v3356_v63 = vld [vmem:[#allocation15 + $0x80] sm:$0xff] }
0x2509   :  { %v2975_v61 = vadd.f32 1.0, %v5112_v27 }
0x250a   :  { %2984 = vrot.lane.b32.xlu1 %v2982_v11, %s5411_s3  ;;  %v3108_v11 = vld [vmem:[#allocation2 + $0x18] sm:$0x30] }
0x250b   :  { %5113 = vrcp.f32 %v2975_v61 }
0x2518   :  { %v5114_v23 = vpop.eup %5113 }
0x257c   :  { %v2985_v29 = vpop.permute.xlu1 %2984 }
0x257d   :  { %v2987_v17 = vadd.f32 %v2985_v29, %v2981_v25  ;;  %v3109_v29 = vld [vmem:[#allocation2 + $0x8] sm:$0x30] }
0x257f   :  { %5115 = vtanh.f32 %v2987_v17 }
0x258c   :  { %v5116_v3 = vpop.eup %5115 }
0x258d   :  { %v2989_v36 = vmul.f32 %v5116_v3, %v5114_v23 }
0x258f   :  { %2991 = vrot.lane.b32.xlu0 %v2989_v36, %s5411_s3 }
0x2601   :  { %v2992_v37 = vpop.permute.xlu0 %2991 }
0x2602   :  { %2994 = vst.msk [vmem:[#allocation5 + $0x8] sm:$0x3] %vm369_vm2, %v2992_v37  ;;  %4753 = vmatmul.mubr.msk.f32.vlgmr.msra.gmra.mxu1 %vm266_vm3, %v2992_v37 }
0x2603   :  { %3248 = vmatpush1.msra.mxu1 %v6117_v21  ;;  %3295 = vmatprep.mubr.f32.mxu1 %v5410_v0 }
0x2604   :  { %3249 = vmatprep.subr.mxu1 %v6121_v42 }
0x2605   :  { %3250 = vmatpush1.msra.mxu1 %v6126_v9  ;;  %v2995_v9 = vld [vmem:[#allocation2 + $0x18] sm:$0xc] }
0x2606   :  { %3251 = vmatprep.subr.mxu1 %v6129_v45 }
0x2607   :  { %3252 = vmatpush1.msra.mxu1 %v6133_v1 }
0x2608   :  { %3253 = vmatprep.subr.mxu1 %v6136_v2 }
0x2609   :  { %3254 = vmatpush1.msra.mxu1 %v6141_v44 }
0x260a   :  { %3255 = vmatprep.subr.mxu1 %v6144_v46  ;;  %v2996_v46 = vld [vmem:[#allocation2 + $0x8] sm:$0xc] }
0x260b   :  { %3256 = vmatpush1.msra.mxu1 %v6148_v48 }
0x260c   :  { %3257 = vmatprep.subr.mxu1 %v6152_v49 }
0x260d   :  { %3258 = vmatpush1.msra.mxu1 %v6156_v50 }
0x260e   :  { %3259 = vmatprep.subr.mxu1 %v6160_v53 }
0x260f   :  { %3260 = vmatpush1.msra.mxu1 %v6164_v54  ;;  %v3092_v54 = vrot.slane %v2987_v17, 6 }
0x2610   :  { %3261 = vmatprep.subr.mxu1 %v6170_v56 }
0x2611   :  { %3262 = vmatpush1.msra.mxu1 %v6176_v57  ;;  %v3371_v57 = vld [vmem:[#allocation15 + $0xf8] sm:$0xff] }
0x2612   :  { %3388 = vmatprep.subr.mxu0 %v3371_v57  ;;  %v6380_v57 = vld [vmem:[#allocation16 + $0x50] sm:$0xff] }
0x26c2   :  { %v3065_v21 = vpop.f32.mrf.mxu1 }
0x26c3   :  { %v3072_v42 = vrot.slane %v3065_v21, 6 }
0x26c4   :  { %v3067_v2 = vpop.f32.mrf.mxu1 }
0x26c5   :  { %v3076_v45 = vadd.f32 %v3072_v42, %v2995_v9  ;;  %v3073_v44 = vrot.slane %v3067_v2, 6  ;;  %v3355_v42 = vld [vmem:[#allocation15 + $0x78] sm:$0xff] }
0x26c6   :  { %3465 = vmatprep.subr.mxu1 %v3355_v42 }
0x26c7   :  { %v4754_v1 = vmul.f32 -1.442695, %v3076_v45  ;;  %v3077_v48 = vadd.f32 %v3073_v44, %v2996_v46 }
0x26c9   :  { %5117 = vpow2.f32 %v4754_v1  ;;  %v4755_v40 = vmul.f32 -1.442695, %v3077_v48 }
0x26ca   :  { %5119 = vtanh.f32 %v3077_v48 }
0x26d6   :  { %v5118_v49 = vpop.eup %5117 }
0x26d7   :  { %v3081_v50 = vadd.f32 1.0, %v5118_v49  ;;  %v5120_v53 = vpop.eup %5119 }
0x26d9   :  { %5121 = vrcp.f32 %v3081_v50 }
0x26da   :  { %5123 = vpow2.f32 %v4755_v40  ;;  %v6382_v40 = vld [vmem:[#allocation16 + $0x48] sm:$0xff] }
0x26e6   :  { %v5122_v38 = vpop.eup %5121 }
0x26e7   :  { %v3095_v56 = vmul.f32 %v5122_v38, %v5120_v53  ;;  %v3094_v30 = vmul.f32 %v5122_v38, %v3092_v54  ;;  %v5124_v32 = vpop.eup %5123  ;;  %v6365_v53 = vld [vmem:[#allocation16 + $0x78] sm:$0xff]  ;;  %v6369_v54 = vld [vmem:[#allocation16 + $0x70] sm:$0xff]  ;;  %v6372_v38 = vld [vmem:[#allocation16 + $0x68] sm:$0xff] }
0x26e8   :  { %v3088_v33 = vadd.f32 1.0, %v5124_v32  ;;  %v6385_v32 = vld [vmem:[#allocation16 + $0x40] sm:$0xff] }
0x26e9   :  { %3097 = vrot.lane.b32.xlu1 %v3095_v56, %s5411_s3  ;;  %v6375_v56 = vld [vmem:[#allocation16 + $0x60] sm:$0xff] }
0x26ea   :  { %5125 = vrcp.f32 %v3088_v33  ;;  %v6390_v33 = vld [vmem:[#allocation16 + $0x38] sm:$0xff] }
0x26f7   :  { %v5126_v51 = vpop.eup %5125 }
0x275b   :  { %v3098_v39 = vpop.permute.xlu1 %3097 }
0x275c   :  { %v6342_v41 = vadd.f32 %v3098_v39, %v3094_v30  ;;  %v6378_v30 = vld [vmem:[#allocation16 + $0x58] sm:$0xff]  ;;  %v6392_v39 = vld [vmem:[#allocation16 + $0x30] sm:$0xff] }
0x275e   :  { %5127 = vtanh.f32 %v6342_v41  ;;  %v3208_v36 = vrot.slane %v6342_v41, 6  ;;  %v6394_v41 = vld [vmem:[#allocation16 + $0x28] sm:$0xff] }
0x276b   :  { %v5128_v6 = vpop.eup %5127 }
0x276c   :  { %v6345_v13 = vmul.f32 %v5128_v6, %v5126_v51  ;;  %v6397_v51 = vld [vmem:[#allocation16 + $0x20] sm:$0xff]  ;;  %v6400_v6 = vld [vmem:[#allocation16 + $0x18] sm:$0xff] }
0x276e   :  { %v3110_v43 = vrot.slane %v6345_v13, 2 }
0x2770   :  { %3111 = vrot.lane.b32.xlu0 %v3110_v43, %s5411_s3  ;;  %v6403_v43 = vld [vmem:[#allocation16 + $0x10] sm:$0xff] }
0x27e2   :  { %v3112_v60 = vpop.permute.xlu0 %3111 }
0x27e3   :  { %4756 = vmatmul.mubr.msk.f32.vlgmr.msra.gmra.mxu0 %vm266_vm3, %v3112_v60  ;;  %v6409_v60 = vld [vmem:[#allocation16] sm:$0xff] }
0x27e4   :  { %3389 = vmatpush1.msra.mxu0 %v3370_v35  ;;  %3436 = vmatprep.mubr.f32.mxu0 %v5410_v0  ;;  %v6406_v35 = vld [vmem:[#allocation16 + $0x8] sm:$0xff] }
0x27e5   :  { %3390 = vmatprep.subr.mxu0 %v3369_v8  ;;  %v3354_v8 = vld [vmem:[#allocation15 + $0x70] sm:$0xff] }
0x27e6   :  { %3391 = vmatpush1.msra.mxu0 %v3368_v15 }
0x27e7   :  { %3392 = vmatprep.subr.mxu0 %v3367_v16  ;;  %v3353_v16 = vld [vmem:[#allocation15 + $0x68] sm:$0xff] }
0x27e8   :  { %3393 = vmatpush1.msra.mxu0 %v3366_v47  ;;  %v3352_v47 = vld [vmem:[#allocation15 + $0x60] sm:$0xff] }
0x27e9   :  { %3394 = vmatprep.subr.mxu0 %v3365_v18  ;;  %v3351_v18 = vld [vmem:[#allocation15 + $0x58] sm:$0xff] }
0x27ea   :  { %3395 = vmatpush1.msra.mxu0 %v3364_v19  ;;  %v3350_v19 = vld [vmem:[#allocation15 + $0x50] sm:$0xff] }
0x27eb   :  { %3396 = vmatprep.subr.mxu0 %v3363_v20  ;;  %v3349_v20 = vld [vmem:[#allocation15 + $0x48] sm:$0xff] }
0x27ec   :  { %3397 = vmatpush1.msra.mxu0 %v3362_v7  ;;  %v3348_v7 = vld [vmem:[#allocation15 + $0x40] sm:$0xff] }
0x27ed   :  { %3398 = vmatprep.subr.mxu0 %v3361_v12  ;;  %v3347_v12 = vld [vmem:[#allocation15 + $0x38] sm:$0xff] }
0x27ee   :  { %3399 = vmatpush1.msra.mxu0 %v3360_v22  ;;  %v3346_v22 = vld [vmem:[#allocation15 + $0x30] sm:$0xff] }
0x27ef   :  { %3400 = vmatprep.subr.mxu0 %v3359_v58  ;;  %v3345_v58 = vld [vmem:[#allocation15 + $0x28] sm:$0xff] }
0x27f0   :  { %3401 = vmatpush1.msra.mxu0 %v3358_v59  ;;  %v3344_v59 = vld [vmem:[#allocation15 + $0x20] sm:$0xff] }
0x27f1   :  { %3402 = vmatprep.subr.mxu0 %v3357_v62  ;;  %v3343_v62 = vld [vmem:[#allocation15 + $0x18] sm:$0xff] }
0x27f2   :  { %3403 = vmatpush1.msra.mxu0 %v3356_v63  ;;  %v3342_v63 = vld [vmem:[#allocation15 + $0x10] sm:$0xff] }
0x27f3   :  { %4762 = vmatmul.mubr.msk.f32.vlgmr.msra.gmra.mxu0 %vm266_vm3, %v6119_v34  ;;  %3580 = vmatprep.subr.mxu0 %v6365_v53 }
0x27f4   :  { %3442 = vmatprep.mubr.f32.mxu0 %v5410_v0  ;;  %3581 = vmatpush1.msra.mxu0 %v6369_v54 }
0x27f5   :  { %3582 = vmatprep.subr.mxu0 %v6372_v38 }
0x27f6   :  { %3583 = vmatpush1.msra.mxu0 %v6375_v56 }
0x27f7   :  { %4763 = vmatmul.mubr.msk.f32.gmra.mxu0 %vm266_vm3, %v6168_v55  ;;  %3584 = vmatprep.subr.mxu0 %v6378_v30 }
0x27f8   :  { %3628 = vmatprep.mubr.f32.mxu0 %v5410_v0  ;;  %3585 = vmatpush1.msra.mxu0 %v6380_v57 }
0x27f9   :  { %3586 = vmatprep.subr.mxu0 %v6382_v40 }
0x27fa   :  { %3587 = vmatpush1.msra.mxu0 %v6385_v32 }
0x27fb   :  { %3588 = vmatprep.subr.mxu0 %v6390_v33 }
0x27fc   :  { %3589 = vmatpush1.msra.mxu0 %v6392_v39 }
0x27fd   :  { %3590 = vmatprep.subr.mxu0 %v6394_v41 }
0x27fe   :  { %3591 = vmatpush1.msra.mxu0 %v6397_v51 }
0x27ff   :  { %3592 = vmatprep.subr.mxu0 %v6400_v6 }
0x2800   :  { %3593 = vmatpush1.msra.mxu0 %v6403_v43 }
0x2801   :  { %3594 = vmatprep.subr.mxu0 %v6406_v35 }
0x2802   :  { %3595 = vmatpush1.msra.mxu0 %v6409_v60 }
0x2803   :  { %3629 = vmatmul.mubr.f32.vlgmr.msra.gmra.mxu0 %v5410_v0  ;;  %3809 = vmatprep.subr.mxu0 %v6365_v53 }
0x2804   :  { %3810 = vmatpush1.msra.mxu0 %v6369_v54  ;;  %3857 = vmatprep.mubr.f32.mxu0 %v5410_v0 }
0x2805   :  { %3811 = vmatprep.subr.mxu0 %v6372_v38 }
0x2806   :  { %3812 = vmatpush1.msra.mxu0 %v6375_v56 }
0x2807   :  { %3813 = vmatprep.subr.mxu0 %v6378_v30 }
0x2808   :  { %3814 = vmatpush1.msra.mxu0 %v6380_v57 }
0x2809   :  { %3815 = vmatprep.subr.mxu0 %v6382_v40 }
0x280a   :  { %3816 = vmatpush1.msra.mxu0 %v6385_v32 }
0x280b   :  { %3817 = vmatprep.subr.mxu0 %v6390_v33 }
0x280c   :  { %3818 = vmatpush1.msra.mxu0 %v6392_v39 }
0x280d   :  { %3819 = vmatprep.subr.mxu0 %v6394_v41 }
0x280e   :  { %3820 = vmatpush1.msra.mxu0 %v6397_v51 }
0x280f   :  { %3821 = vmatprep.subr.mxu0 %v6400_v6 }
0x2810   :  { %3822 = vmatpush1.msra.mxu0 %v6403_v43 }
0x2811   :  { %3823 = vmatprep.subr.mxu0 %v6406_v35 }
0x2812   :  { %3824 = vmatpush1.msra.mxu0 %v6409_v60 }
0x2813   :  { %4032 = vmatprep.subr.mxu0 %v6365_v53 }
0x28a3   :  { %v3181_v5 = vpop.f32.mrf.mxu0 }
0x28a4   :  { %v3188_v52 = vrot.slane %v3181_v5, 4  ;;  %v3341_v5 = vld [vmem:[#allocation15 + $0x8] sm:$0xff] }
0x28a5   :  { %v3183_v27 = vpop.f32.mrf.mxu0 }
0x28a6   :  { %v3192_v25 = vadd.f32 %v3188_v52, %v3108_v11  ;;  %v3189_v61 = vrot.slane %v3183_v27, 4  ;;  %v3340_v52 = vld [vmem:[#allocation15] sm:$0xff]  ;;  %v5249_v11 = vld [vmem:[#allocation3] sm:$0xff] }
0x28a8   :  { %v4757_v31 = vmul.f32 -1.442695, %v3192_v25  ;;  %v3193_v17 = vadd.f32 %v3189_v61, %v3109_v29 }
0x28aa   :  { %5129 = vpow2.f32 %v4757_v31  ;;  %v4758_v9 = vmul.f32 -1.442695, %v3193_v17  ;;  %v3224_v31 = vld [vmem:[#allocation2 + $0x18] sm:$0xc0] }
0x28ab   :  { %5131 = vtanh.f32 %v3193_v17  ;;  %v3225_v17 = vld [vmem:[#allocation2 + $0x8] sm:$0xc0] }
0x28b7   :  { %v5130_v23 = vpop.eup %5129 }
0x28b8   :  { %v3197_v3 = vadd.f32 1.0, %v5130_v23  ;;  %v5132_v34 = vpop.eup %5131 }
0x28ba   :  { %5133 = vrcp.f32 %v3197_v3 }
0x28bb   :  { %5135 = vpow2.f32 %v4758_v9 }
0x28c7   :  { %v5134_v55 = vpop.eup %5133 }
0x28c8   :  { %v3211_v37 = vmul.f32 %v5134_v55, %v5132_v34  ;;  %v3210_v21 = vmul.f32 %v5134_v55, %v3208_v36  ;;  %v5136_v45 = vpop.eup %5135  ;;  %v3438_v34 = vpop.f32.mrf.mxu0  ;;  %v3526_v36 = vld [vmem:[%s6704_s12] sm:$0x3] }
0x28c9   :  { %v3204_v1 = vadd.f32 1.0, %v5136_v45  ;;  %v3535_v9 = vrot.slane %v3526_v36, %v5693_v28 }
0x28ca   :  { %3213 = vrot.lane.b32.xlu1 %v3211_v37, %s5411_s3  ;;  %v3440_v55 = vpop.f32.mrf.mxu0  ;;  %v3531_v37 = vrot.slane %v3526_v36, %v5688_v26 }
0x28cb   :  { %5137 = vrcp.f32 %v3204_v1 }
0x28cc   :  { %v3444_v45 = vpop.f32.mrf.mxu0 }
0x28d8   :  { %v5138_v46 = vpop.eup %5137 }
0x293c   :  { %v3214_v2 = vpop.permute.xlu1 %3213 }
0x293d   :  { %v6359_v44 = vadd.f32 %v3214_v2, %v3210_v21 }
0x293f   :  { %5139 = vtanh.f32 %v6359_v44 }
0x294c   :  { %v5140_v48 = vpop.eup %5139 }
0x294d   :  { %v6362_v49 = vmul.f32 %v5140_v48, %v5138_v46 }
0x294f   :  { %v3226_v50 = vrot.slane %v6362_v49, 4 }
0x2951   :  { %3227 = vrot.lane.b32.xlu0 %v3226_v50, %s5411_s3 }
0x29c3   :  { %v3228_v15 = vpop.permute.xlu0 %3227 }
0x29c4   :  { %4759 = vmatmul.mubr.msk.f32.vlgmr.msra.gmra.mxu1 %vm266_vm3, %v3228_v15 }
0x29c5   :  { %3466 = vmatpush1.msra.mxu1 %v3354_v8  ;;  %3513 = vmatprep.mubr.f32.mxu1 %v5410_v0 }
0x29c6   :  { %3467 = vmatprep.subr.mxu1 %v3353_v16 }
0x29c7   :  { %3468 = vmatpush1.msra.mxu1 %v3352_v47  ;;  %v3446_v47 = vpop.f32.mrf.mxu0 }
0x29c8   :  { %3469 = vmatprep.subr.mxu1 %v3351_v18 }
0x29c9   :  { %3470 = vmatpush1.msra.mxu1 %v3350_v19 }
0x29ca   :  { %3471 = vmatprep.subr.mxu1 %v3349_v20  ;;  %v3630_v20 = vpop.f32.mrf.mxu0 }
0x29cb   :  { %3472 = vmatpush1.msra.mxu1 %v3348_v7  ;;  %v3637_v7 = vrot.slane %v3630_v20, 2 }
0x29cc   :  { %3473 = vmatprep.subr.mxu1 %v3347_v12 }
0x29cd   :  { %3474 = vmatpush1.msra.mxu1 %v3346_v22 }
0x29ce   :  { %3475 = vmatprep.subr.mxu1 %v3345_v58 }
0x29cf   :  { %3476 = vmatpush1.msra.mxu1 %v3344_v59  ;;  %v3324_v59 = vrot.slane %v6359_v44, 6 }
0x29d0   :  { %3477 = vmatprep.subr.mxu1 %v3343_v62 }
0x29d1   :  { %3478 = vmatpush1.msra.mxu1 %v3342_v63 }
0x29d2   :  { %3479 = vmatprep.subr.mxu1 %v3341_v5 }
0x29d3   :  { %3480 = vmatpush1.msra.mxu1 %v3340_v52 }
0x29d4   :  { %4764 = vmatmul.mubr.msk.f32.vlgmr.msra.gmra.mxu1 %vm266_vm3, %v5249_v11  ;;  %3693 = vmatprep.subr.mxu1 %v6365_v53  ;;  %v3632_v11 = vpop.f32.mrf.mxu0 }
0x29d5   :  { %3519 = vmatprep.mubr.f32.mxu1 %v5410_v0  ;;  %3694 = vmatpush1.msra.mxu1 %v6369_v54 }
0x29d6   :  { %3695 = vmatprep.subr.mxu1 %v6372_v38 }
0x29d7   :  { %3696 = vmatpush1.msra.mxu1 %v6375_v56 }
0x29d8   :  { %4765 = vmatmul.mubr.msk.f32.gmra.mxu1 %vm266_vm3, %v6226_v10  ;;  %3697 = vmatprep.subr.mxu1 %v6378_v30 }
0x29d9   :  { %3698 = vmatpush1.msra.mxu1 %v6380_v57  ;;  %3741 = vmatprep.mubr.f32.mxu1 %v5410_v0 }
0x29da   :  { %3699 = vmatprep.subr.mxu1 %v6382_v40 }
0x29db   :  { %3700 = vmatpush1.msra.mxu1 %v6385_v32 }
0x29dc   :  { %3701 = vmatprep.subr.mxu1 %v6390_v33 }
0x29dd   :  { %3702 = vmatpush1.msra.mxu1 %v6392_v39 }
0x29de   :  { %3703 = vmatprep.subr.mxu1 %v6394_v41 }
0x29df   :  { %3704 = vmatpush1.msra.mxu1 %v6397_v51 }
0x29e0   :  { %3705 = vmatprep.subr.mxu1 %v6400_v6 }
0x29e1   :  { %3706 = vmatpush1.msra.mxu1 %v6403_v43 }
0x29e2   :  { %3707 = vmatprep.subr.mxu1 %v6406_v35 }
0x29e3   :  { %3708 = vmatpush1.msra.mxu1 %v6409_v60 }
0x29e4   :  { %3925 = vmatprep.subr.mxu1 %v6365_v53 }
0x2a84   :  { %v3297_v10 = vpop.f32.mrf.mxu1 }
0x2a85   :  { %v3304_v25 = vrot.slane %v3297_v10, 2 }
0x2a86   :  { %v3299_v27 = vpop.f32.mrf.mxu1 }
0x2a87   :  { %v3308_v61 = vadd.f32 %v3304_v25, %v3224_v31  ;;  %v3305_v29 = vrot.slane %v3299_v27, 2  ;;  %v3638_v25 = vrot.slane %v3632_v11, 2 }
0x2a89   :  { %v4760_v23 = vmul.f32 -1.442695, %v3308_v61  ;;  %v6457_v3 = vadd.f32 %v3305_v29, %v3225_v17 }
0x2a8b   :  { %5141 = vpow2.f32 %v4760_v23 }
0x2a8c   :  { %5143 = vtanh.f32 %v6457_v3 }
0x2a94   :  { %v3515_v21 = vpop.f32.mrf.mxu1 }
0x2a95   :  { %v3516_v42 = vadd.f32 %v3515_v21, %v3438_v34 }
0x2a96   :  { %v3517_v1 = vpop.f32.mrf.mxu1 }
0x2a97   :  { %v3538_v2 = vadd.f32 %v3531_v37, %v3516_v42  ;;  %v3518_v46 = vadd.f32 %v3517_v1, %v3440_v55 }
0x2a98   :  { %v5142_v48 = vpop.eup %5141  ;;  %v3521_v50 = vpop.f32.mrf.mxu1 }
0x2a99   :  { %v3313_v8 = vadd.f32 1.0, %v5142_v48  ;;  %3542 = vst [vmem:[#allocation2 + $0x10] sm:$0xff] %v3538_v2  ;;  %v3539_v15 = vadd.f32 %v3535_v9, %v3518_v46  ;;  %v3522_v16 = vadd.f32 %v3521_v50, %v3444_v45  ;;  %v5144_v58 = vpop.eup %5143 }
0x2a9a   :  { %v3523_v18 = vpop.f32.mrf.mxu1 }
0x2a9b   :  { %5145 = vrcp.f32 %v3313_v8  ;;  %3543 = vst [vmem:[#allocation2] sm:$0xff] %v3539_v15  ;;  %v3540_v26 = vadd.f32 %v3531_v37, %v3522_v16  ;;  %v3524_v19 = vadd.f32 %v3523_v18, %v3446_v47 }
0x2a9d   :  { %3544 = vst [vmem:[#allocation2 + $0x18] sm:$0xff] %v3540_v26  ;;  %v3541_v28 = vadd.f32 %v3535_v9, %v3524_v19 }
0x2a9f   :  { %3545 = vst [vmem:[#allocation2 + $0x8] sm:$0xff] %v3541_v28 }
0x2aa4   :  { %v3562_v12 = vld [vmem:[#allocation2 + $0x18] sm:$0xc0]  ;;  %v3670_v50 = vld [vmem:[#allocation2 + $0x18] sm:$0x30] }
0x2aa5   :  { %v3641_v22 = vadd.f32 %v3637_v7, %v3562_v12 }
0x2aa6   :  { %v3563_v10 = vld [vmem:[#allocation2 + $0x8] sm:$0xc0]  ;;  %v3671_v18 = vld [vmem:[#allocation2 + $0x8] sm:$0x30] }
0x2aa7   :  { %v4766_v62 = vmul.f32 -1.442695, %v3641_v22  ;;  %v3642_v31 = vadd.f32 %v3638_v25, %v3563_v10 }
0x2aa8   :  { %v5146_v63 = vpop.eup %5145 }
0x2aa9   :  { %5147 = vpow2.f32 %v4766_v62  ;;  %v6466_v5 = vmul.f32 %v5146_v63, %v5144_v58  ;;  %v6468_v52 = vmul.f32 %v5146_v63, %v3324_v59  ;;  %v4767_v44 = vmul.f32 -1.442695, %v3642_v31 }
0x2aaa   :  { %5149 = vtanh.f32 %v3642_v31 }
0x2ab6   :  { %v5148_v27 = vpop.eup %5147 }
0x2ab7   :  { %v3646_v61 = vadd.f32 1.0, %v5148_v27  ;;  %v5150_v29 = vpop.eup %5149 }
0x2ab9   :  { %5151 = vrcp.f32 %v3646_v61 }
0x2aba   :  { %5153 = vpow2.f32 %v4767_v44  ;;  %v3786_v44 = vld [vmem:[#allocation2 + $0x18] sm:$0xc] }
0x2ac6   :  { %v5152_v17 = vpop.eup %5151 }
0x2ac7   :  { %v3657_v23 = vmul.f32 %v5152_v17, %v5150_v29  ;;  %v5154_v34 = vpop.eup %5153  ;;  %v3656_v55 = vmul.f32 0.0, %v5152_v17 }
0x2ac8   :  { %v3653_v36 = vadd.f32 1.0, %v5154_v34 }
0x2ac9   :  { %3659 = vrot.lane.b32.xlu1 %v3657_v23, %s5411_s3 }
0x2aca   :  { %5155 = vrcp.f32 %v3653_v36 }
0x2ad7   :  { %v5156_v42 = vpop.eup %5155 }
0x2b3b   :  { %v3660_v37 = vpop.permute.xlu1 %3659 }
0x2b3c   :  { %v3662_v21 = vadd.f32 %v3660_v37, %v3656_v55 }
0x2b3e   :  { %5157 = vtanh.f32 %v3662_v21  ;;  %v3770_v7 = vrot.slane %v3662_v21, 2  ;;  %v3787_v21 = vld [vmem:[#allocation2 + $0x8] sm:$0xc] }
0x2b4b   :  { %v5158_v9 = vpop.eup %5157 }
0x2b4c   :  { %v6471_v45 = vmul.f32 %v5158_v9, %v5156_v42 }
0x2b4e   :  { %v3672_v1 = vrot.slane %v6471_v45, 6 }
0x2b50   :  { %3673 = vrot.lane.b32.xlu0 %v3672_v1, %s5411_s3 }
0x2bc2   :  { %v3674_v2 = vpop.permute.xlu0 %3673 }
0x2bc3   :  { %4768 = vmatmul.mubr.msk.f32.vlgmr.msra.gmra.mxu1 %vm266_vm3, %v3674_v2 }
0x2bc4   :  { %3926 = vmatpush1.msra.mxu1 %v6369_v54  ;;  %3973 = vmatprep.mubr.f32.mxu1 %v5410_v0 }
0x2bc5   :  { %3927 = vmatprep.subr.mxu1 %v6372_v38 }
0x2bc6   :  { %3928 = vmatpush1.msra.mxu1 %v6375_v56 }
0x2bc7   :  { %3929 = vmatprep.subr.mxu1 %v6378_v30 }
0x2bc8   :  { %3930 = vmatpush1.msra.mxu1 %v6380_v57 }
0x2bc9   :  { %3931 = vmatprep.subr.mxu1 %v6382_v40 }
0x2bca   :  { %3932 = vmatpush1.msra.mxu1 %v6385_v32 }
0x2bcb   :  { %3933 = vmatprep.subr.mxu1 %v6390_v33 }
0x2bcc   :  { %3934 = vmatpush1.msra.mxu1 %v6392_v39 }
0x2bcd   :  { %3935 = vmatprep.subr.mxu1 %v6394_v41 }
0x2bce   :  { %3936 = vmatpush1.msra.mxu1 %v6397_v51 }
0x2bcf   :  { %3937 = vmatprep.subr.mxu1 %v6400_v6 }
0x2bd0   :  { %3938 = vmatpush1.msra.mxu1 %v6403_v43 }
0x2bd1   :  { %3939 = vmatprep.subr.mxu1 %v6406_v35 }
0x2bd2   :  { %3940 = vmatpush1.msra.mxu1 %v6409_v60 }
0x2bd3   :  { %4148 = vmatprep.subr.mxu1 %v6365_v53 }
0x2c83   :  { %v3743_v46 = vpop.f32.mrf.mxu1 }
0x2c84   :  { %v3750_v48 = vrot.slane %v3743_v46, 4 }
0x2c85   :  { %v3745_v16 = vpop.f32.mrf.mxu1 }
0x2c86   :  { %v3754_v8 = vadd.f32 %v3750_v48, %v3670_v50  ;;  %v3751_v47 = vrot.slane %v3745_v16, 4 }
0x2c88   :  { %v4769_v15 = vmul.f32 -1.442695, %v3754_v8  ;;  %v3755_v26 = vadd.f32 %v3751_v47, %v3671_v18 }
0x2c8a   :  { %5159 = vpow2.f32 %v4769_v15  ;;  %v4770_v59 = vmul.f32 -1.442695, %v3755_v26 }
0x2c8b   :  { %5161 = vtanh.f32 %v3755_v26 }
0x2c97   :  { %v5160_v19 = vpop.eup %5159 }
0x2c98   :  { %v3759_v28 = vadd.f32 1.0, %v5160_v19  ;;  %v5162_v20 = vpop.eup %5161 }
0x2c9a   :  { %5163 = vrcp.f32 %v3759_v28 }
0x2c9b   :  { %5165 = vpow2.f32 %v4770_v59 }
0x2ca7   :  { %v5164_v12 = vpop.eup %5163 }
0x2ca8   :  { %v3773_v22 = vmul.f32 %v5164_v12, %v5162_v20  ;;  %v3772_v58 = vmul.f32 %v5164_v12, %v3770_v7  ;;  %v5166_v62 = vpop.eup %5165 }
0x2ca9   :  { %v3766_v63 = vadd.f32 1.0, %v5166_v62 }
0x2caa   :  { %3775 = vrot.lane.b32.xlu1 %v3773_v22, %s5411_s3  ;;  %v3902_v22 = vld [vmem:[#allocation2 + $0x18] sm:$0x3] }
0x2cab   :  { %5167 = vrcp.f32 %v3766_v63 }
0x2cb8   :  { %v5168_v25 = vpop.eup %5167 }
0x2d1c   :  { %v3776_v11 = vpop.permute.xlu1 %3775 }
0x2d1d   :  { %v3778_v10 = vadd.f32 %v3776_v11, %v3772_v58  ;;  %v3903_v11 = vld [vmem:[#allocation2 + $0x8] sm:$0x3] }
0x2d1f   :  { %5169 = vtanh.f32 %v3778_v10  ;;  %v3886_v46 = vrot.slane %v3778_v10, 2 }
0x2d2c   :  { %v5170_v31 = vpop.eup %5169 }
0x2d2d   :  { %v6494_v27 = vmul.f32 %v5170_v31, %v5168_v25 }
0x2d2f   :  { %v3788_v61 = vrot.slane %v6494_v27, 4 }
0x2d31   :  { %3789 = vrot.lane.b32.xlu0 %v3788_v61, %s5411_s3 }
0x2da3   :  { %v3790_v29 = vpop.permute.xlu0 %3789 }
0x2da4   :  { %4771 = vmatmul.mubr.msk.f32.vlgmr.msra.gmra.mxu0 %vm266_vm3, %v3790_v29 }
0x2da5   :  { %4033 = vmatpush1.msra.mxu0 %v6369_v54  ;;  %4080 = vmatprep.mubr.f32.mxu0 %v5410_v0 }
0x2da6   :  { %4034 = vmatprep.subr.mxu0 %v6372_v38 }
0x2da7   :  { %4035 = vmatpush1.msra.mxu0 %v6375_v56 }
0x2da8   :  { %4036 = vmatprep.subr.mxu0 %v6378_v30 }
0x2da9   :  { %4037 = vmatpush1.msra.mxu0 %v6380_v57 }
0x2daa   :  { %4038 = vmatprep.subr.mxu0 %v6382_v40 }
0x2dab   :  { %4039 = vmatpush1.msra.mxu0 %v6385_v32 }
0x2dac   :  { %4040 = vmatprep.subr.mxu0 %v6390_v33 }
0x2dad   :  { %4041 = vmatpush1.msra.mxu0 %v6392_v39 }
0x2dae   :  { %4042 = vmatprep.subr.mxu0 %v6394_v41 }
0x2daf   :  { %4043 = vmatpush1.msra.mxu0 %v6397_v51 }
0x2db0   :  { %4044 = vmatprep.subr.mxu0 %v6400_v6 }
0x2db1   :  { %4045 = vmatpush1.msra.mxu0 %v6403_v43 }
0x2db2   :  { %4046 = vmatprep.subr.mxu0 %v6406_v35 }
0x2db3   :  { %4047 = vmatpush1.msra.mxu0 %v6409_v60 }
0x2db4   :  { %4264 = vmatprep.subr.mxu0 %v6365_v53 }
0x2e64   :  { %v3859_v17 = vpop.f32.mrf.mxu0 }
0x2e65   :  { %v3866_v23 = vrot.slane %v3859_v17, 6 }
0x2e66   :  { %v3861_v55 = vpop.f32.mrf.mxu0 }
0x2e67   :  { %v3870_v34 = vadd.f32 %v3866_v23, %v3786_v44  ;;  %v3867_v37 = vrot.slane %v3861_v55, 6 }
0x2e69   :  { %v4772_v36 = vmul.f32 -1.442695, %v3870_v34  ;;  %v3871_v42 = vadd.f32 %v3867_v37, %v3787_v21 }
0x2e6b   :  { %5171 = vpow2.f32 %v4772_v36  ;;  %v4773_v15 = vmul.f32 -1.442695, %v3871_v42 }
0x2e6c   :  { %5173 = vtanh.f32 %v3871_v42 }
0x2e78   :  { %v5172_v9 = vpop.eup %5171 }
0x2e79   :  { %v3875_v1 = vadd.f32 1.0, %v5172_v9  ;;  %v5174_v2 = vpop.eup %5173 }
0x2e7b   :  { %5175 = vrcp.f32 %v3875_v1 }
0x2e7c   :  { %5177 = vpow2.f32 %v4773_v15 }
0x2e88   :  { %v5176_v48 = vpop.eup %5175 }
0x2e89   :  { %v3889_v50 = vmul.f32 %v5176_v48, %v5174_v2  ;;  %v3888_v8 = vmul.f32 %v5176_v48, %v3886_v46  ;;  %v5178_v16 = vpop.eup %5177  ;;  %v4012_v48 = vld [vmem:[#allocation2 + $0x10] sm:$0xc0] }
0x2e8a   :  { %v3882_v47 = vadd.f32 1.0, %v5178_v16 }
0x2e8b   :  { %3891 = vrot.lane.b32.xlu1 %v3889_v50, %s5411_s3 }
0x2e8c   :  { %5179 = vrcp.f32 %v3882_v47  ;;  %v4013_v47 = vld [vmem:[#allocation2] sm:$0xc0] }
0x2e99   :  { %v5180_v19 = vpop.eup %5179 }
0x2efd   :  { %v3892_v18 = vpop.permute.xlu1 %3891 }
0x2efe   :  { %v3894_v26 = vadd.f32 %v3892_v18, %v3888_v8 }
0x2f00   :  { %5181 = vtanh.f32 %v3894_v26  ;;  %v3996_v29 = vrot.slane %v3894_v26, 2 }
0x2f0d   :  { %v5182_v28 = vpop.eup %5181 }
0x2f0e   :  { %v6517_v20 = vmul.f32 %v5182_v28, %v5180_v19 }
0x2f10   :  { %v3904_v7 = vrot.slane %v6517_v20, 2 }
0x2f12   :  { %3905 = vrot.lane.b32.xlu0 %v3904_v7, %s5411_s3 }
0x2f84   :  { %v3906_v12 = vpop.permute.xlu0 %3905 }
0x2f85   :  { %4774 = vmatmul.mubr.msk.f32.vlgmr.msra.gmra.mxu1 %vm266_vm3, %v3906_v12 }
0x2f86   :  { %4149 = vmatpush1.msra.mxu1 %v6369_v54  ;;  %4196 = vmatprep.mubr.f32.mxu1 %v5410_v0 }
0x2f87   :  { %4150 = vmatprep.subr.mxu1 %v6372_v38 }
0x2f88   :  { %4151 = vmatpush1.msra.mxu1 %v6375_v56 }
0x2f89   :  { %4152 = vmatprep.subr.mxu1 %v6378_v30 }
0x2f8a   :  { %4153 = vmatpush1.msra.mxu1 %v6380_v57 }
0x2f8b   :  { %4154 = vmatprep.subr.mxu1 %v6382_v40 }
0x2f8c   :  { %4155 = vmatpush1.msra.mxu1 %v6385_v32 }
0x2f8d   :  { %4156 = vmatprep.subr.mxu1 %v6390_v33 }
0x2f8e   :  { %4157 = vmatpush1.msra.mxu1 %v6392_v39 }
0x2f8f   :  { %4158 = vmatprep.subr.mxu1 %v6394_v41 }
0x2f90   :  { %4159 = vmatpush1.msra.mxu1 %v6397_v51 }
0x2f91   :  { %4160 = vmatprep.subr.mxu1 %v6400_v6 }
0x2f92   :  { %4161 = vmatpush1.msra.mxu1 %v6403_v43 }
0x2f93   :  { %4162 = vmatprep.subr.mxu1 %v6406_v35 }
0x2f94   :  { %4163 = vmatpush1.msra.mxu1 %v6409_v60 }
0x2f95   :  { %4380 = vmatprep.subr.mxu1 %v6365_v53 }
0x3045   :  { %v3975_v58 = vpop.f32.mrf.mxu1 }
0x3046   :  { %v3980_v59 = vadd.f32 %v3975_v58, %v3902_v22 }
0x3047   :  { %v3977_v63 = vpop.f32.mrf.mxu1 }
0x3048   :  { %v4775_v62 = vmul.f32 -1.442695, %v3980_v59  ;;  %v3981_v10 = vadd.f32 %v3977_v63, %v3903_v11 }
0x304a   :  { %5183 = vpow2.f32 %v4775_v62  ;;  %v4776_v53 = vmul.f32 -1.442695, %v3981_v10 }
0x304b   :  { %5185 = vtanh.f32 %v3981_v10 }
0x3057   :  { %v5184_v25 = vpop.eup %5183 }
0x3058   :  { %v3985_v31 = vadd.f32 1.0, %v5184_v25  ;;  %v5186_v61 = vpop.eup %5185 }
0x305a   :  { %5187 = vrcp.f32 %v3985_v31 }
0x305b   :  { %5189 = vpow2.f32 %v4776_v53 }
0x3067   :  { %v5188_v17 = vpop.eup %5187 }
0x3068   :  { %v3999_v23 = vmul.f32 %v5188_v17, %v5186_v61  ;;  %v3998_v44 = vmul.f32 %v5188_v17, %v3996_v29  ;;  %v5190_v34 = vpop.eup %5189 }
0x3069   :  { %v3992_v36 = vadd.f32 1.0, %v5190_v34 }
0x306a   :  { %4001 = vrot.lane.b32.xlu1 %v3999_v23, %s5411_s3 }
0x306b   :  { %5191 = vrcp.f32 %v3992_v36 }
0x3078   :  { %v5192_v21 = vpop.eup %5191 }
0x30dc   :  { %v4002_v55 = vpop.permute.xlu1 %4001 }
0x30dd   :  { %v4004_v37 = vadd.f32 %v4002_v55, %v3998_v44 }
0x30df   :  { %5193 = vtanh.f32 %v4004_v37  ;;  %v4109_v7 = vrot.slane %v4004_v37, 2 }
0x30ec   :  { %v5194_v42 = vpop.eup %5193 }
0x30ed   :  { %v4006_v9 = vmul.f32 %v5194_v42, %v5192_v21 }
0x30ef   :  { %4008 = vrot.lane.b32.xlu0 %v4006_v9, %s5411_s3 }
0x3161   :  { %v4009_v1 = vpop.permute.xlu0 %4008 }
0x3162   :  { %4011 = vst.msk [vmem:[#allocation6 + $0x8] sm:$0x3] %vm369_vm2, %v4009_v1  ;;  %4777 = vmatmul.mubr.msk.f32.vlgmr.msra.gmra.mxu0 %vm266_vm3, %v4009_v1 }
0x3163   :  { %4265 = vmatpush1.msra.mxu0 %v6369_v54  ;;  %4312 = vmatprep.mubr.f32.mxu0 %v5410_v0 }
0x3164   :  { %4266 = vmatprep.subr.mxu0 %v6372_v38 }
0x3165   :  { %4267 = vmatpush1.msra.mxu0 %v6375_v56 }
0x3166   :  { %4268 = vmatprep.subr.mxu0 %v6378_v30 }
0x3167   :  { %4269 = vmatpush1.msra.mxu0 %v6380_v57 }
0x3168   :  { %4270 = vmatprep.subr.mxu0 %v6382_v40 }
0x3169   :  { %4271 = vmatpush1.msra.mxu0 %v6385_v32 }
0x316a   :  { %4272 = vmatprep.subr.mxu0 %v6390_v33 }
0x316b   :  { %4273 = vmatpush1.msra.mxu0 %v6392_v39 }
0x316c   :  { %4274 = vmatprep.subr.mxu0 %v6394_v41 }
0x316d   :  { %4275 = vmatpush1.msra.mxu0 %v6397_v51 }
0x316e   :  { %4276 = vmatprep.subr.mxu0 %v6400_v6 }
0x316f   :  { %4277 = vmatpush1.msra.mxu0 %v6403_v43 }
0x3170   :  { %4278 = vmatprep.subr.mxu0 %v6406_v35 }
0x3171   :  { %4279 = vmatpush1.msra.mxu0 %v6409_v60 }
0x3222   :  { %v4082_v2 = vpop.f32.mrf.mxu0 }
0x3223   :  { %v4089_v46 = vrot.slane %v4082_v2, 2 }
0x3224   :  { %v4084_v15 = vpop.f32.mrf.mxu0 }
0x3225   :  { %v4093_v50 = vadd.f32 %v4089_v46, %v4012_v48  ;;  %v4090_v16 = vrot.slane %v4084_v15, 2  ;;  %v4241_v46 = vld [vmem:[#allocation2 + $0x10] sm:$0xc] }
0x3227   :  { %v4778_v8 = vmul.f32 -1.442695, %v4093_v50  ;;  %v4094_v18 = vadd.f32 %v4090_v16, %v4013_v47  ;;  %v4242_v16 = vld [vmem:[#allocation2] sm:$0xc] }
0x3229   :  { %5195 = vpow2.f32 %v4778_v8  ;;  %v4779_v59 = vmul.f32 -1.442695, %v4094_v18 }
0x322a   :  { %5197 = vtanh.f32 %v4094_v18 }
0x3236   :  { %v5196_v26 = vpop.eup %5195 }
0x3237   :  { %v4098_v19 = vadd.f32 1.0, %v5196_v26  ;;  %v5198_v28 = vpop.eup %5197 }
0x3239   :  { %5199 = vrcp.f32 %v4098_v19 }
0x323a   :  { %5201 = vpow2.f32 %v4779_v59 }
0x3246   :  { %v5200_v12 = vpop.eup %5199 }
0x3247   :  { %v4112_v22 = vmul.f32 %v5200_v12, %v5198_v28  ;;  %v4111_v58 = vmul.f32 %v5200_v12, %v4109_v7  ;;  %v5202_v62 = vpop.eup %5201 }
0x3248   :  { %v4105_v63 = vadd.f32 1.0, %v5202_v62 }
0x3249   :  { %4114 = vrot.lane.b32.xlu1 %v4112_v22, %s5411_s3 }
0x324a   :  { %5203 = vrcp.f32 %v4105_v63 }
0x3257   :  { %v5204_v25 = vpop.eup %5203 }
0x32bb   :  { %v4115_v11 = vpop.permute.xlu1 %4114 }
0x32bc   :  { %v4117_v10 = vadd.f32 %v4115_v11, %v4111_v58 }
0x32be   :  { %5205 = vtanh.f32 %v4117_v10 }
0x32cb   :  { %v5206_v31 = vpop.eup %5205 }
0x32cc   :  { %v6560_v61 = vmul.f32 %v5206_v31, %v5204_v25 }
0x32ce   :  { %v4127_v29 = vrot.slane %v6560_v61, 6 }
0x32d0   :  { %4128 = vrot.lane.b32.xlu0 %v4127_v29, %s5411_s3 }
0x3342   :  { %v4129_v17 = vpop.permute.xlu0 %4128 }
0x3343   :  { %4780 = vmatmul.mubr.msk.f32.vlgmr.msra.gmra.mxu1 %vm266_vm3, %v4129_v17  ;;  %v4761_v17 = vmul.f32 -1.442695, %v6457_v3 }
0x3344   :  { %4381 = vmatpush1.msra.mxu1 %v6369_v54  ;;  %4428 = vmatprep.mubr.f32.mxu1 %v5410_v0 }
0x3345   :  { %4382 = vmatprep.subr.mxu1 %v6372_v38  ;;  %v4125_v38 = vld [vmem:[#allocation2 + $0x10] sm:$0x30] }
0x3346   :  { %4383 = vmatpush1.msra.mxu1 %v6375_v56 }
0x3347   :  { %4384 = vmatprep.subr.mxu1 %v6378_v30 }
0x3348   :  { %4385 = vmatpush1.msra.mxu1 %v6380_v57 }
0x3349   :  { %4386 = vmatprep.subr.mxu1 %v6382_v40 }
0x334a   :  { %4387 = vmatpush1.msra.mxu1 %v6385_v32  ;;  %v4126_v32 = vld [vmem:[#allocation2] sm:$0x30] }
0x334b   :  { %4388 = vmatprep.subr.mxu1 %v6390_v33 }
0x334c   :  { %4389 = vmatpush1.msra.mxu1 %v6392_v39 }
0x334d   :  { %4390 = vmatprep.subr.mxu1 %v6394_v41 }
0x334e   :  { %4391 = vmatpush1.msra.mxu1 %v6397_v51 }
0x334f   :  { %4392 = vmatprep.subr.mxu1 %v6400_v6  ;;  %v4225_v6 = vrot.slane %v4117_v10, 2 }
0x3350   :  { %4393 = vmatpush1.msra.mxu1 %v6403_v43 }
0x3351   :  { %4394 = vmatprep.subr.mxu1 %v6406_v35 }
0x3352   :  { %4395 = vmatpush1.msra.mxu1 %v6409_v60 }
0x3403   :  { %v4198_v0 = vpop.f32.mrf.mxu1 }
0x3404   :  { %v4205_v54 = vrot.slane %v4198_v0, 4 }
0x3405   :  { %v4200_v57 = vpop.f32.mrf.mxu1 }
0x3406   :  { %v4209_v56 = vadd.f32 %v4205_v54, %v4125_v38  ;;  %v4206_v40 = vrot.slane %v4200_v57, 4 }
0x3408   :  { %v4781_v30 = vmul.f32 -1.442695, %v4209_v56  ;;  %v4210_v33 = vadd.f32 %v4206_v40, %v4126_v32 }
0x340a   :  { %5207 = vpow2.f32 %v4781_v30  ;;  %v4782_v60 = vmul.f32 -1.442695, %v4210_v33 }
0x340b   :  { %5209 = vtanh.f32 %v4210_v33  ;;  %v4357_v33 = vld [vmem:[#allocation2 + $0x10] sm:$0x3] }
0x3417   :  { %v5208_v39 = vpop.eup %5207 }
0x3418   :  { %v4214_v41 = vadd.f32 1.0, %v5208_v39  ;;  %v5210_v51 = vpop.eup %5209 }
0x341a   :  { %5211 = vrcp.f32 %v4214_v41 }
0x341b   :  { %5213 = vpow2.f32 %v4782_v60 }
0x3427   :  { %v5212_v43 = vpop.eup %5211 }
0x3428   :  { %v4228_v35 = vmul.f32 %v5212_v43, %v5210_v51  ;;  %v4227_v23 = vmul.f32 %v5212_v43, %v4225_v6  ;;  %v5214_v44 = vpop.eup %5213  ;;  %v4358_v43 = vld [vmem:[#allocation2] sm:$0x3] }
0x3429   :  { %v4221_v53 = vadd.f32 1.0, %v5214_v44  ;;  %v4475_v44 = vld [vmem:[%s6705_s13 + $0x30] sm:$0xff] }
0x342a   :  { %4230 = vrot.lane.b32.xlu1 %v4228_v35, %s5411_s3 }
0x342b   :  { %5215 = vrcp.f32 %v4221_v53 }
0x3438   :  { %v5216_v55 = vpop.eup %5215 }
0x349c   :  { %v4231_v34 = vpop.permute.xlu1 %4230 }
0x349d   :  { %v4233_v36 = vadd.f32 %v4231_v34, %v4227_v23 }
0x349f   :  { %5217 = vtanh.f32 %v4233_v36  ;;  %v4341_v28 = vrot.slane %v4233_v36, 2 }
0x34ac   :  { %v5218_v37 = vpop.eup %5217 }
0x34ad   :  { %v6582_v21 = vmul.f32 %v5218_v37, %v5216_v55 }
0x34af   :  { %v4243_v42 = vrot.slane %v6582_v21, 4 }
0x34b1   :  { %4244 = vrot.lane.b32.xlu0 %v4243_v42, %s5411_s3  ;;  %v4474_v42 = vld [vmem:[%s6705_s13 + $0x28] sm:$0xff] }
0x3523   :  { %v4245_v9 = vpop.permute.xlu0 %4244 }
0x3524   :  { %4783 = vmatmul.mubr.msk.f32.vlgmr.msra.gmra.mxu0 %vm266_vm3, %v4245_v9  ;;  %v4473_v9 = vld [vmem:[%s6705_s13 + $0x20] sm:$0xff] }
0x35e4   :  { %v4314_v1 = vpop.f32.mrf.mxu0 }
0x35e5   :  { %v4321_v2 = vrot.slane %v4314_v1, 6  ;;  %v4472_v1 = vld [vmem:[%s6705_s13 + $0x18] sm:$0xff] }
0x35e6   :  { %v4316_v8 = vpop.f32.mrf.mxu0 }
0x35e7   :  { %v4325_v48 = vadd.f32 %v4321_v2, %v4241_v46  ;;  %v4322_v15 = vrot.slane %v4316_v8, 6  ;;  %v4471_v2 = vld [vmem:[%s6705_s13 + $0x10] sm:$0xff]  ;;  %v4470_v46 = vld [vmem:[%s6705_s13 + $0x8] sm:$0xff] }
0x35e9   :  { %v4784_v50 = vmul.f32 -1.442695, %v4325_v48  ;;  %v4326_v47 = vadd.f32 %v4322_v15, %v4242_v16  ;;  %v4469_v48 = vld [vmem:[%s6705_s13] sm:$0xff] }
0x35eb   :  { %5219 = vpow2.f32 %v4784_v50  ;;  %v4785_v58 = vmul.f32 -1.442695, %v4326_v47  ;;  %v4485_v50 = vld [vmem:[%s6705_s13 + $0x70] sm:$0xff] }
0x35ec   :  { %5221 = vtanh.f32 %v4326_v47 }
0x35f8   :  { %v5220_v18 = vpop.eup %5219 }
0x35f9   :  { %v4330_v26 = vadd.f32 1.0, %v5220_v18  ;;  %v5222_v19 = vpop.eup %5221 }
0x35fb   :  { %5223 = vrcp.f32 %v4330_v26  ;;  %v4482_v26 = vld [vmem:[%s6705_s13 + $0x58] sm:$0xff] }
0x35fc   :  { %5225 = vpow2.f32 %v4785_v58 }
0x3608   :  { %v5224_v7 = vpop.eup %5223 }
0x3609   :  { %v4344_v12 = vmul.f32 %v5224_v7, %v5222_v19  ;;  %v4343_v22 = vmul.f32 %v5224_v7, %v4341_v28  ;;  %v5226_v59 = vpop.eup %5225  ;;  %v4481_v19 = vld [vmem:[%s6705_s13 + $0x50] sm:$0xff]  ;;  %v4480_v7 = vld [vmem:[%s6705_s13 + $0x48] sm:$0xff] }
0x360a   :  { %v4337_v62 = vadd.f32 1.0, %v5226_v59 }
0x360b   :  { %4346 = vrot.lane.b32.xlu1 %v4344_v12, %s5411_s3  ;;  %v4479_v12 = vld [vmem:[%s6705_s13 + $0x40] sm:$0xff] }
0x360c   :  { %5227 = vrcp.f32 %v4337_v62 }
0x3619   :  { %v5228_v10 = vpop.eup %5227 }
0x367d   :  { %v4347_v63 = vpop.permute.xlu1 %4346 }
0x367e   :  { %v4349_v11 = vadd.f32 %v4347_v63, %v4343_v22 }
0x3680   :  { %5229 = vtanh.f32 %v4349_v11  ;;  %v4451_v34 = vrot.slane %v4349_v11, 2 }
0x3681   :  { %5231 = vpow2.f32 %v4761_v17 }
0x368d   :  { %v5230_v25 = vpop.eup %5229 }
0x368e   :  { %v4351_v31 = vmul.f32 %v5230_v25, %v5228_v10  ;;  %v5232_v0 = vpop.eup %5231 }
0x368f   :  { %v3320_v38 = vadd.f32 1.0, %v5232_v0 }
0x3690   :  { %v4359_v29 = vrot.slane %v4351_v31, 2 }
0x3691   :  { %5233 = vrcp.f32 %v3320_v38 }
0x3692   :  { %4360 = vrot.lane.b32.xlu0 %v4359_v29, %s5411_s3 }
0x3696   :  { %3329 = vrot.lane.b32.xlu0 %v6466_v5, %s5411_s3 }
0x369a   :  { %2765 = vrot.lane.b32.xlu0 %v6277_v24, %s5411_s3 }
0x369e   :  { %4121 = vrot.lane.b32.xlu0 %v6560_v61, %s5411_s3  ;;  %v5234_v3 = vpop.eup %5233 }
0x36a2   :  { %4353 = vrot.lane.b32.xlu0 %v4351_v31, %s5411_s3 }
0x36a6   :  { %3104 = vrot.lane.b32.xlu0 %v6345_v13, %s5411_s3 }
0x3704   :  { %v4361_v54 = vpop.permute.xlu0 %4360 }
0x3705   :  { %4786 = vmatmul.mubr.msk.f32.vlgmr.msra.gmra.mxu1 %vm266_vm3, %v4361_v54 }
0x3708   :  { %v3330_v5 = vpop.permute.xlu0 %3329 }
0x3709   :  { %v3332_v56 = vadd.f32 %v3330_v5, %v6468_v52 }
0x370b   :  { %5235 = vtanh.f32 %v3332_v56 }
0x370c   :  { %v2766_v24 = vpop.permute.xlu0 %2765 }
0x370d   :  { %2768 = vst.msk [vmem:[#allocation5] sm:$0x30] %vm600_vm6, %v2766_v24 }
0x3710   :  { %v4122_v61 = vpop.permute.xlu0 %4121 }
0x3711   :  { %4124 = vst.msk [vmem:[#allocation6] sm:$0xc0] %vm717_vm4, %v4122_v61 }
0x3714   :  { %v4354_v13 = vpop.permute.xlu0 %4353 }
0x3715   :  { %4356 = vst.msk [vmem:[#allocation6] sm:$0xc] %vm483_vm5, %v4354_v13 }
0x3718   :  { %v5236_v30 = vpop.eup %5235  ;;  %v3105_v57 = vpop.permute.xlu0 %3104 }
0x3719   :  { %3107 = vst.msk [vmem:[#allocation5 + $0x8] sm:$0xc] %vm483_vm5, %v3105_v57  ;;  %v3334_v40 = vmul.f32 %v5236_v30, %v5234_v3 }
0x371b   :  { %3336 = vrot.lane.b32.xlu0 %v3334_v40, %s5411_s3 }
0x371f   :  { %3782 = vrot.lane.b32.xlu0 %v6494_v27, %s5411_s3  ;;  %v4476_v27 = vld [vmem:[%s6705_s13 + $0x38] sm:$0xff] }
0x3720   :  { %4833 = vmatprep.subr.mxu1 %v4476_v27 }
0x3721   :  { %4834 = vmatpush3.msra.mxu1 %v4476_v27 }
0x3722   :  { %4835 = vmatprep.subr.mxu1 %v4475_v44 }
0x3723   :  { %4836 = vmatpush3.msra.mxu1 %v4475_v44 }
0x3724   :  { %4837 = vmatprep.subr.mxu1 %v4474_v42 }
0x3725   :  { %4838 = vmatpush3.msra.mxu1 %v4474_v42 }
0x3726   :  { %4839 = vmatprep.subr.mxu1 %v4473_v9 }
0x3727   :  { %4840 = vmatpush3.msra.mxu1 %v4473_v9 }
0x3728   :  { %4841 = vmatprep.subr.mxu1 %v4472_v1 }
0x3729   :  { %4842 = vmatpush3.msra.mxu1 %v4472_v1 }
0x372a   :  { %4843 = vmatprep.subr.mxu1 %v4471_v2 }
0x372b   :  { %4844 = vmatpush3.msra.mxu1 %v4471_v2 }
0x372c   :  { %4845 = vmatprep.subr.mxu1 %v4470_v46 }
0x372d   :  { %4846 = vmatpush3.msra.mxu1 %v4470_v46 }
0x372e   :  { %4847 = vmatprep.subr.mxu1 %v4469_v48 }
0x372f   :  { %4848 = vmatpush3.msra.mxu1 %v4469_v48 }
0x378d   :  { %v3337_v52 = vpop.permute.xlu0 %3336 }
0x378e   :  { %3339 = vst.msk [vmem:[#allocation5 + $0x8] sm:$0xc0] %vm717_vm4, %v3337_v52 }
0x3791   :  { %v3783_v32 = vpop.permute.xlu0 %3782 }
0x3792   :  { %3785 = vst.msk [vmem:[#allocation6 + $0x8] sm:$0x30] %vm600_vm6, %v3783_v32 }
0x37c5   :  { %v4430_v39 = vpop.f32.mrf.mxu1 }
0x37c6   :  { %v4435_v41 = vadd.f32 %v4430_v39, %v4357_v33 }
0x37c7   :  { %v4432_v6 = vpop.f32.mrf.mxu1 }
0x37c8   :  { %v4787_v51 = vmul.f32 -1.442695, %v4435_v41  ;;  %v4436_v35 = vadd.f32 %v4432_v6, %v4358_v43 }
0x37ca   :  { %5237 = vpow2.f32 %v4787_v51 }
0x37cb   :  { %5239 = vtanh.f32 %v4436_v35 }
0x37d7   :  { %v5238_v23 = vpop.eup %5237 }
0x37d8   :  { %v4440_v60 = vadd.f32 1.0, %v5238_v23  ;;  %v5240_v53 = vpop.eup %5239 }
0x37da   :  { %5241 = vrcp.f32 %v4440_v60 }
0x37e7   :  { %v5242_v36 = vpop.eup %5241 }
0x37e8   :  { %v4454_v55 = vmul.f32 %v5242_v36, %v5240_v53  ;;  %v4453_v37 = vmul.f32 %v5242_v36, %v4451_v34 }
0x37ea   :  { %4456 = vrot.lane.b32.xlu1 %v4454_v55, %s5411_s3 }
0x37ee   :  { %2649 = vrot.lane.b32.xlu1 %v6254_v4, %s5411_s3  ;;  %v4486_v4 = vld [vmem:[%s6705_s13 + $0x78] sm:$0xff] }
0x37ef   :  { %4814 = vmatprep.subr.mxu0 %v4486_v4 }
0x37f0   :  { %4815 = vmatpush3.msra.mxu0 %v4486_v4 }
0x37f1   :  { %4816 = vmatprep.subr.mxu0 %v4485_v50 }
0x37f2   :  { %2881 = vrot.lane.b32.xlu1 %v6300_v14, %s5411_s3  ;;  %4817 = vmatpush3.msra.mxu0 %v4485_v50  ;;  %v4788_v14 = vmul.f32 -1.442695, %v4436_v35 }
0x37f4   :  { %5243 = vpow2.f32 %v4788_v14 }
0x37f6   :  { %4237 = vrot.lane.b32.xlu1 %v6582_v21, %s5411_s3  ;;  %v4484_v21 = vld [vmem:[%s6705_s13 + $0x68] sm:$0xff] }
0x37f7   :  { %4818 = vmatprep.subr.mxu0 %v4484_v21 }
0x37f8   :  { %4819 = vmatpush3.msra.mxu0 %v4484_v21 }
0x37fa   :  { %3220 = vrot.lane.b32.xlu1 %v6362_v49, %s5411_s3  ;;  %v4483_v49 = vld [vmem:[%s6705_s13 + $0x60] sm:$0xff] }
0x37fb   :  { %4820 = vmatprep.subr.mxu0 %v4483_v49 }
0x37fc   :  { %4821 = vmatpush3.msra.mxu0 %v4483_v49 }
0x37fd   :  { %4822 = vmatprep.subr.mxu0 %v4482_v26 }
0x37fe   :  { %3666 = vrot.lane.b32.xlu1 %v6471_v45, %s5411_s3  ;;  %4823 = vmatpush3.msra.mxu0 %v4482_v26 }
0x37ff   :  { %4824 = vmatprep.subr.mxu0 %v4481_v19 }
0x3800   :  { %4825 = vmatpush3.msra.mxu0 %v4481_v19 }
0x3801   :  { %v5244_v8 = vpop.eup %5243  ;;  %4826 = vmatprep.subr.mxu0 %v4480_v7 }
0x3802   :  { %v4447_v15 = vadd.f32 1.0, %v5244_v8  ;;  %4827 = vmatpush3.msra.mxu0 %v4480_v7 }
0x3803   :  { %4828 = vmatprep.subr.mxu0 %v4479_v12 }
0x3804   :  { %5245 = vrcp.f32 %v4447_v15  ;;  %4829 = vmatpush3.msra.mxu0 %v4479_v12 }
0x3811   :  { %v5246_v22 = vpop.eup %5245 }
0x385c   :  { %v4457_v16 = vpop.permute.xlu1 %4456 }
0x385d   :  { %v4459_v47 = vadd.f32 %v4457_v16, %v4453_v37 }
0x385f   :  { %5247 = vtanh.f32 %v4459_v47 }
0x3860   :  { %v2650_v18 = vpop.permute.xlu1 %2649 }
0x3861   :  { %2652 = vst.msk [vmem:[#allocation5] sm:$0xc] %vm483_vm5, %v2650_v18 }
0x3864   :  { %v2882_v45 = vpop.permute.xlu1 %2881 }
0x3865   :  { %2884 = vst.msk [vmem:[#allocation5] sm:$0xc0] %vm717_vm4, %v2882_v45 }
0x3868   :  { %v4238_v28 = vpop.permute.xlu1 %4237 }
0x3869   :  { %4240 = vst.msk [vmem:[#allocation6] sm:$0x30] %vm600_vm6, %v4238_v28 }
0x386c   :  { %v5248_v58 = vpop.eup %5247  ;;  %v3221_v59 = vpop.permute.xlu1 %3220  ;;  %v4467_v62 = vld [vmem:[#allocation5] sm:$0xff] }
0x386d   :  { %3223 = vst.msk [vmem:[#allocation5 + $0x8] sm:$0x30] %vm600_vm6, %v3221_v59  ;;  %4849 = vmatprep.mubr.msk.f32.mxu1 %vm266_vm3, %v4467_v62  ;;  %v4461_v63 = vmul.f32 %v5248_v58, %v5246_v22 }
0x386f   :  { %4463 = vrot.lane.b32.xlu1 %v4461_v63, %s5411_s3 }
0x3870   :  { %v3667_v11 = vpop.permute.xlu1 %3666 }
0x3871   :  { %3669 = vst.msk [vmem:[#allocation6 + $0x8] sm:$0xc0] %vm717_vm4, %v3667_v11 }
0x3873   :  { %3898 = vrot.lane.b32.xlu1 %v6517_v20, %s5411_s3  ;;  %v4793_v20 = vld [vmem:[%s6706_s14] ss:$0 sm:$0xff]  ;;  %s5412_s3 = smov [#allocation18]  }
0x3874   :  { %v4468_v10 = vld [vmem:[#allocation5 + $0x8] sm:$0xff]  ;;  %s4666_s1 = sshll.u32 %s5412_s3, 4  ;;  %s4667_s1 = int_to_ptr.vmem [resolvable:$true] %s4666_s1 }
0x3875   :  { %4850 = vmatmul.mubr.msk.f32.vlgmr.msra.gmra.mxu1 %vm266_vm3, %v4468_v10  ;;  %s5370_s25 = scalar_lea.vmem %s4667_s1, 256  ;;  %p5375_p3 = scmp.lt.s32.totalorder %s4667_s1, %s4667_s1 }
0x3876   :  { %p5371_p2 = scmp.ne.s32.totalorder %s4667_s1, %s5370_s25  ;;  %p5376_p4 = scmp.lt.s32.totalorder %s5370_s25, %s5370_s25 }
0x3878   :  { %p5377_p5 = por %p5376_p4, %p5375_p3 }
0x387a   :  { %p5378_p6 = pnand %p5377_p5, %p5371_p2 }
0x38e1   :  { %v4464_v25 = vpop.permute.xlu1 %4463 }
0x38e2   :  { %4466 = vst.msk [vmem:[#allocation6] sm:$0x3] %vm369_vm2, %v4464_v25 }
0x38e5   :  { %v3899_v31 = vpop.permute.xlu1 %3898 }
0x38e6   :  { %3901 = vst.msk [vmem:[#allocation6 + $0x8] sm:$0xc] %vm483_vm5, %v3899_v31 }
0x38e9   :  { %v4477_v29 = vld [vmem:[#allocation6] sm:$0xff] }
0x38ea   :  { %4830 = vmatprep.mubr.msk.f32.mxu0 %vm266_vm3, %v4477_v29 }
0x38ed   :  { %v4478_v17 = vld [vmem:[#allocation6 + $0x8] sm:$0xff] }
0x38ee   :  { %4831 = vmatmul.mubr.msk.f32.vlgmr.msra.gmra.mxu0 %vm266_vm3, %v4478_v17 }
0x3935   :  { %v4851_v0 = vpop.f32.mrf.mxu1 }
0x3937   :  { %v4640_v5 = vpop.f32.mrf.mxu1 }
0x39ae   :  { %v4832_v54 = vpop.f32.mrf.mxu0 }
0x39af   :  { %v4646_v38 = vadd.f32 %v4851_v0, %v4832_v54 }
0x39b0   :  { %v4559_v56 = vpop.f32.mrf.mxu0 }
0x39b1   :  { %v4657_v24 = vadd.f32 %v4793_v20, %v4646_v38  ;;  %v4641_v61 = vadd.f32 %v4640_v5, %v4559_v56 }
0x39b3   :  { %v4656_v13 = vadd.f32 %v4793_v20, %v4641_v61  ;;  %4660 = vst.msk [vmem:[#allocation18 + $0x8] sm:$0xff] %vm4658_vm7, %v4657_v24 }
0x39b5   :  { %4659 = vst.msk [vmem:[#allocation18] sm:$0xff] %vm4658_vm7, %v4656_v13 }
0x39b6   :  { %5381 = shalt.err (!%p5378_p6)
}
0x39b7   :  { %4672 = dma.vmem_to_hbm [thread:$0]  %s4667_s1, 256, %s6707_s15, [#allocation9], %s5405_s17, %s5405_s17, %s5406_s18  }
0x39b8   :  { %5398 = dma.done.wait [#allocation9], 256  }
0x39b9   :  { %5399 = vsyncadd [#allocation9], 4294967040 }
0x39ba   :  { %4676 = vsyncpa [#allocation8], 1 }
0x39bb   :  { %4677 = vsyncpa [#allocation11], 1 }
0x39bc   :  { %4678 = vsyncpa [#allocation14], 1 }
0x39bd   :  { %4679 = vsyncpa [#allocation17], 1 }
0x39be   :  { %4680 = vsyncpa [#allocation9], 1 }

</bundles_post_ra>
